<compile_context>
chip_gen: v7x
topology: tpu7x:2x2x1
jax: 0.10.0
libtpu: 0.0.40
codegen_flags: <defaults>
</compile_context>

<pallas_src>
import jax
import jax.numpy as jnp
from jax import lax
from jax.experimental import pallas as pl
from jax.experimental.pallas import tpu as pltpu


def _round_up(x: int, m: int) -> int:
    return (x + m - 1) // m * m


def rdb8c_forward(x_nchw, conv_ws, conv_bs, w9, b9):
    """Forward pass of ResidualDenseBlock_8C.

    x_nchw:  (N, nc, H, W) float32
    conv_ws: list of 8 arrays; conv_ws[l] has shape (gc, nc + l*gc, 3, 3)
    conv_bs: list of 8 arrays of shape (gc,)
    w9:      (nc, nc + 8*gc, 1, 1)  -- 1x1 local-feature-fusion conv
    b9:      (nc,)
    returns: (N, nc, H, W) float32  ==  conv9(cat(x, x1..x8)) * 0.2 + x
    """
    N, nc, H, W = x_nchw.shape
    gc = conv_ws[0].shape[0]
    c_total = nc + 8 * gc
    HW = H * W
    # Zero halo on the flattened pixel axis: >= W+1 so 3x3 row over/underflow
    # lands in zeros, multiple of 128 so interior writes stay lane-aligned.
    HALO = _round_up(W + 1, 128)
    c_stage = max(nc, gc)

    # Channel blocks: block 0 = x (nc channels), blocks 1..8 = x1..x8 (gc each).
    blk_start = [0] + [nc + i * gc for i in range(8)]
    blk_size = [nc] + [gc] * 8
    # p_ref row layout: block b occupies rows [9*blk_start[b], 9*(blk_start[b]+n_b)),
    # ordered (tap t, local channel i) -> row 9*blk_start[b] + t*n_b + i.
    P_ROWS = 9 * c_total

    # ---- one-off parameter packing (tiny; activations never touch XLA glue) ----
    w_packed = []
    for l in range(8):
        w = conv_ws[l]                                      # (gc, c_in, 3, 3)
        parts = []
        for b in range(l + 1):                              # input blocks 0..l
            s_b, n_b = blk_start[b], blk_size[b]
            wb = w[:, s_b:s_b + n_b, :, :]                  # (gc, n_b, 3, 3)
            wb = jnp.transpose(wb, (0, 2, 3, 1))            # (gc, 3, 3, n_b)
            parts.append(wb.reshape(gc, 9 * n_b))           # K-local = t*n_b + i
        w_packed.append(jnp.concatenate(parts, axis=1).astype(jnp.bfloat16))
    bc = jnp.stack([b.reshape(gc, 1) for b in conv_bs]).astype(jnp.float32)  # (8, gc, 1)
    w9_2 = w9.reshape(nc, c_total).astype(jnp.bfloat16)
    b9_2 = b9.reshape(nc, 1).astype(jnp.float32)

    # Left/right image-column masks for the dw = -1 / +1 taps.
    col = jnp.arange(HW, dtype=jnp.int32) % W
    col_mask = jnp.stack([(col > 0), (col < W - 1)]).astype(jnp.float32)     # (2, HW)

    x_flat = x_nchw.reshape(N, nc, HW)                      # NCHW -> (N, C, H*W): free

    def kernel(x_ref, w0, w1, w2, w3, w4, w5, w6, w7,
               bc_ref, w9_ref, b9_ref, m_ref, o_ref, s_ref, p_ref):
        w_refs = (w0, w1, w2, w3, w4, w5, w6, w7)

        # Clear only the two halo strips of the small staging buffer (cheap,
        # megacore-safe); its interior and all read rows of p_ref are fully
        # overwritten every grid step.
        s_ref[:, 0:HALO] = jnp.zeros((c_stage, HALO), jnp.float32)
        s_ref[:, HALO + HW:HALO + HW + HALO] = jnp.zeros((c_stage, HALO), jnp.float32)

        def scatter_block(b, y_f32, last):
            """Write block b and its 9 pre-shifted / masked taps into p_ref (bf16)."""
            s_b, n_b = blk_start[b], blk_size[b]
            base = 9 * s_b
            # Center tap (kh=1, kw=1): no shift, no mask -> store y directly.
            p_ref[base + 4 * n_b:base + 5 * n_b, :] = y_f32.astype(jnp.bfloat16)
            if last:
                return                      # only the center tap of x8 is ever read (conv9)
            s_ref[0:n_b, HALO:HALO + HW] = y_f32
            for t in range(9):
                if t == 4:
                    continue
                kh, kw = t // 3, t % 3
                sh = (kh - 1) * W + (kw - 1)                 # static lane shift
                patch = s_ref[0:n_b, HALO + sh:HALO + sh + HW]
                if kw == 0:
                    patch = patch * m_ref[0:1, :]            # mask left image column
                elif kw == 2:
                    patch = patch * m_ref[1:2, :]            # mask right image column
                p_ref[base + t * n_b:base + (t + 1) * n_b, :] = patch.astype(jnp.bfloat16)

        x_f32 = x_ref[0].astype(jnp.float32)                 # (nc, HW)
        scatter_block(0, x_f32, last=False)

        for l in range(8):                                   # 8 dense conv3x3 + ReLU
            c_in = nc + l * gc
            patch = p_ref[0:9 * c_in, :]                     # contiguous prefix, bf16
            acc = jnp.dot(w_refs[l][...], patch,
                          preferred_element_type=jnp.float32)  # (gc, HW), ONE MXU call
            y = jnp.maximum(acc + bc_ref[l], 0.0)            # bias + ReLU in f32
            scatter_block(l + 1, y, last=(l == 7))

        # 1x1 local feature fusion: gather center-tap rows of every block.
        feat = jnp.concatenate(
            [p_ref[9 * blk_start[b] + 4 * blk_size[b]:
                   9 * blk_start[b] + 5 * blk_size[b], :] for b in range(9)],
            axis=0)                                          # (c_total, HW) bf16
        x9 = jnp.dot(w9_ref[...], feat,
                     preferred_element_type=jnp.float32) + b9_ref[...]
        out = x9 * 0.2 + x_f32                               # residual in f32
        o_ref[...] = out.reshape(1, nc, HW).astype(o_ref.dtype)

    in_specs = [pl.BlockSpec((1, nc, HW), lambda n: (n, 0, 0))]
    for l in range(8):
        c_in = nc + l * gc
        in_specs.append(pl.BlockSpec((gc, 9 * c_in), lambda n: (0, 0)))
    in_specs += [
        pl.BlockSpec((8, gc, 1), lambda n: (0, 0, 0)),
        pl.BlockSpec((nc, c_total), lambda n: (0, 0)),
        pl.BlockSpec((nc, 1), lambda n: (0, 0)),
        pl.BlockSpec((2, HW), lambda n: (0, 0)),
    ]

    out_flat = pl.pallas_call(
        kernel,
        out_shape=jax.ShapeDtypeStruct((N, nc, HW), x_nchw.dtype),
        grid_spec=pltpu.PrefetchScalarGridSpec(
            num_scalar_prefetch=0,
            grid=(N,),
            in_specs=in_specs,
            out_specs=pl.BlockSpec((1, nc, HW), lambda n: (n, 0, 0)),
            scratch_shapes=[
                pltpu.VMEM((c_stage, HW + 2 * HALO), jnp.float32),   # halo staging
                pltpu.VMEM((P_ROWS, HW), jnp.bfloat16),              # im2col features
            ],
        ),
        compiler_params=pltpu.CompilerParams(
            dimension_semantics=("parallel",),
            # toy footprint << this; re-derive per generation when pixel-tiling
            vmem_limit_bytes=32 * 1024 * 1024,
        ),
    )(x_flat, *w_packed, bc, w9_2, b9_2, col_mask)

    return out_flat.reshape(N, nc, H, W)


if __name__ == "__main__":
    # Small shapes consistent with ResidualDenseBlock_8C(nc=16, gc=16)
    # (16-multiples keep bf16 sublane tiles aligned).
    N, nc, gc, H, W = 2, 16, 16, 16, 16
    c_total = nc + 8 * gc

    key = jax.random.PRNGKey(0)
    keys = jax.random.split(key, 19)
    x = jax.random.normal(keys[0], (N, nc, H, W), dtype=jnp.float32)

    conv_ws, conv_bs = [], []
    ki = 1
    for l in range(8):
        c_in = nc + l * gc
        bound = 1.0 / (c_in * 9) ** 0.5
        conv_ws.append(jax.random.uniform(keys[ki], (gc, c_in, 3, 3),
                                          jnp.float32, -bound, bound)); ki += 1
        conv_bs.append(jax.random.uniform(keys[ki], (gc,),
                                          jnp.float32, -bound, bound)); ki += 1
    bound9 = 1.0 / (c_total ** 0.5)
    w9 = jax.random.uniform(keys[ki], (nc, c_total, 1, 1),
                            jnp.float32, -bound9, bound9); ki += 1
    b9 = jax.random.uniform(keys[ki], (nc,), jnp.float32, -bound9, bound9)

    out = jax.block_until_ready(rdb8c_forward(x, conv_ws, conv_bs, w9, b9))

    # Pure-JAX f32 reference: 8x (conv3x3 + ReLU + concat), 1x1 conv, 0.2 residual.
    def conv(inp, w):
        return lax.conv_general_dilated(
            inp, w, (1, 1), "SAME",
            dimension_numbers=("NCHW", "OIHW", "NCHW"),
            precision=lax.Precision.HIGHEST)

    outs = [x]
    cat = x
    for l in range(8):
        y = conv(cat, conv_ws[l]) + conv_bs[l].reshape(1, gc, 1, 1)
        y = jnp.maximum(y, 0.0)
        outs.append(y)
        cat = jnp.concatenate(outs, axis=1)
    x9 = conv(cat, w9) + b9.reshape(1, nc, 1, 1)
    ref = x9 * 0.2 + x

    assert out.shape == (N, nc, H, W)
    max_err = float(jnp.max(jnp.abs(out - ref)))
    # bf16 MXU operands with f32 accumulation -> loosened tolerance vs pure-f32 ref.
    assert jnp.allclose(out, ref, atol=2e-2, rtol=2e-2), max_err
    print("KERNEL_OK")
</pallas_src>

<mosaic_0001>
module attributes {stable_mosaic.version = 11 : i64} {
  func.func @kernel(%arg0: i32, %arg1: memref<1x16x256xf32, #tpu.memory_space<vmem>>, %arg2: memref<16x144xbf16, #tpu.memory_space<vmem>>, %arg3: memref<16x288xbf16, #tpu.memory_space<vmem>>, %arg4: memref<16x432xbf16, #tpu.memory_space<vmem>>, %arg5: memref<16x576xbf16, #tpu.memory_space<vmem>>, %arg6: memref<16x720xbf16, #tpu.memory_space<vmem>>, %arg7: memref<16x864xbf16, #tpu.memory_space<vmem>>, %arg8: memref<16x1008xbf16, #tpu.memory_space<vmem>>, %arg9: memref<16x1152xbf16, #tpu.memory_space<vmem>>, %arg10: memref<8x16x1xf32, #tpu.memory_space<vmem>>, %arg11: memref<16x144xbf16, #tpu.memory_space<vmem>>, %arg12: memref<16x1xf32, #tpu.memory_space<vmem>>, %arg13: memref<2x256xf32, #tpu.memory_space<vmem>>, %arg14: memref<1x16x256xf32, #tpu.memory_space<vmem>>, %arg15: memref<16x512xf32, #tpu.memory_space<vmem>>, %arg16: memref<1296x256xbf16, #tpu.memory_space<vmem>>) attributes {dimension_semantics = [#tpu.dimension_semantics<parallel>], iteration_bounds = array<i64: 2>, scalar_prefetch = 0 : i64, scratch_operands = 2 : i64, tpu.core_type = #tpu.core_type<tc>, window_params = [{transform_indices = @transform_0, window_bounds = array<i64: 1, 16, 256>}, {pipeline_mode = #tpu.pipeline_mode<synchronous>, transform_indices = @transform_1, window_bounds = array<i64: 16, 144>}, {pipeline_mode = #tpu.pipeline_mode<synchronous>, transform_indices = @transform_2, window_bounds = array<i64: 16, 288>}, {pipeline_mode = #tpu.pipeline_mode<synchronous>, transform_indices = @transform_3, window_bounds = array<i64: 16, 432>}, {pipeline_mode = #tpu.pipeline_mode<synchronous>, transform_indices = @transform_4, window_bounds = array<i64: 16, 576>}, {pipeline_mode = #tpu.pipeline_mode<synchronous>, transform_indices = @transform_5, window_bounds = array<i64: 16, 720>}, {pipeline_mode = #tpu.pipeline_mode<synchronous>, transform_indices = @transform_6, window_bounds = array<i64: 16, 864>}, {pipeline_mode = #tpu.pipeline_mode<synchronous>, transform_indices = @transform_7, window_bounds = array<i64: 16, 1008>}, {pipeline_mode = #tpu.pipeline_mode<synchronous>, transform_indices = @transform_8, window_bounds = array<i64: 16, 1152>}, {pipeline_mode = #tpu.pipeline_mode<synchronous>, transform_indices = @transform_9, window_bounds = array<i64: 8, 16, 1>}, {pipeline_mode = #tpu.pipeline_mode<synchronous>, transform_indices = @transform_10, window_bounds = array<i64: 16, 144>}, {pipeline_mode = #tpu.pipeline_mode<synchronous>, transform_indices = @transform_11, window_bounds = array<i64: 16, 1>}, {pipeline_mode = #tpu.pipeline_mode<synchronous>, transform_indices = @transform_12, window_bounds = array<i64: 2, 256>}, {transform_indices = @transform_13, window_bounds = array<i64: 1, 16, 256>}]} {
    %cst = arith.constant 0.000000e+00 : f32
    %0 = vector.broadcast %cst : f32 to vector<16x128xf32>
    %c0 = arith.constant 0 : index
    %c0_0 = arith.constant 0 : index
    %1 = vector.load %arg15[%c0, %c0_0] : memref<16x512xf32, #tpu.memory_space<vmem>>, vector<16x128xf32>
    tpu.vector_store %arg15[%c0, %c0_0], %0 {strides = array<i32>} : memref<16x512xf32, #tpu.memory_space<vmem>>, vector<16x128xf32>,
    %cst_1 = arith.constant 0.000000e+00 : f32
    %2 = vector.broadcast %cst_1 : f32 to vector<16x128xf32>
    %c0_2 = arith.constant 0 : index
    %c384 = arith.constant 384 : index
    %3 = vector.load %arg15[%c0_2, %c384] : memref<16x512xf32, #tpu.memory_space<vmem>>, vector<16x128xf32>
    tpu.vector_store %arg15[%c0_2, %c384], %2 {strides = array<i32>} : memref<16x512xf32, #tpu.memory_space<vmem>>, vector<16x128xf32>,
    %c0_3 = arith.constant 0 : index
    %c0_4 = arith.constant 0 : index
    %c0_5 = arith.constant 0 : index
    %4 = vector.load %arg1[%c0_3, %c0_4, %c0_5] : memref<1x16x256xf32, #tpu.memory_space<vmem>>, vector<1x16x256xf32>
    %5 = vector.shape_cast %4 : vector<1x16x256xf32> to vector<16x256xf32>
    %6 = arith.truncf %5 : vector<16x256xf32> to vector<16x256xbf16>
    %c64 = arith.constant 64 : index
    %c0_6 = arith.constant 0 : index
    %7 = vector.load %arg16[%c64, %c0_6] : memref<1296x256xbf16, #tpu.memory_space<vmem>>, vector<16x256xbf16>
    tpu.vector_store %arg16[%c64, %c0_6], %6 {strides = array<i32>} : memref<1296x256xbf16, #tpu.memory_space<vmem>>, vector<16x256xbf16>,
    %c0_7 = arith.constant 0 : index
    %c128 = arith.constant 128 : index
    %8 = vector.load %arg15[%c0_7, %c128] : memref<16x512xf32, #tpu.memory_space<vmem>>, vector<16x256xf32>
    tpu.vector_store %arg15[%c0_7, %c128], %5 {strides = array<i32>} : memref<16x512xf32, #tpu.memory_space<vmem>>, vector<16x256xf32>,
    %c0_8 = arith.constant 0 : index
    %c111 = arith.constant 111 : index
    %9 = vector.load %arg15[%c0_8, %c111] : memref<16x512xf32, #tpu.memory_space<vmem>>, vector<16x256xf32>
    %c0_9 = arith.constant 0 : index
    %c0_10 = arith.constant 0 : index
    %10 = vector.load %arg13[%c0_9, %c0_10] : memref<2x256xf32, #tpu.memory_space<vmem>>, vector<1x256xf32>
    %11 = vector.broadcast %10 : vector<1x256xf32> to vector<16x256xf32>
    %12 = arith.mulf %9, %11 : vector<16x256xf32>
    %13 = arith.truncf %12 : vector<16x256xf32> to vector<16x256xbf16>
    %c0_11 = arith.constant 0 : index
    %c0_12 = arith.constant 0 : index
    %14 = vector.load %arg16[%c0_11, %c0_12] : memref<1296x256xbf16, #tpu.memory_space<vmem>>, vector<16x256xbf16>
    tpu.vector_store %arg16[%c0_11, %c0_12], %13 {strides = array<i32>} : memref<1296x256xbf16, #tpu.memory_space<vmem>>, vector<16x256xbf16>,
    %c0_13 = arith.constant 0 : index
    %c112 = arith.constant 112 : index
    %15 = vector.load %arg15[%c0_13, %c112] : memref<16x512xf32, #tpu.memory_space<vmem>>, vector<16x256xf32>
    %16 = arith.truncf %15 : vector<16x256xf32> to vector<16x256xbf16>
    %c16 = arith.constant 16 : index
    %c0_14 = arith.constant 0 : index
    %17 = vector.load %arg16[%c16, %c0_14] : memref<1296x256xbf16, #tpu.memory_space<vmem>>, vector<16x256xbf16>
    tpu.vector_store %arg16[%c16, %c0_14], %16 {strides = array<i32>} : memref<1296x256xbf16, #tpu.memory_space<vmem>>, vector<16x256xbf16>,
    %c0_15 = arith.constant 0 : index
    %c113 = arith.constant 113 : index
    %18 = vector.load %arg15[%c0_15, %c113] : memref<16x512xf32, #tpu.memory_space<vmem>>, vector<16x256xf32>
    %c1 = arith.constant 1 : index
    %c0_16 = arith.constant 0 : index
    %19 = vector.load %arg13[%c1, %c0_16] : memref<2x256xf32, #tpu.memory_space<vmem>>, vector<1x256xf32>
    %20 = vector.broadcast %19 : vector<1x256xf32> to vector<16x256xf32>
    %21 = arith.mulf %18, %20 : vector<16x256xf32>
    %22 = arith.truncf %21 : vector<16x256xf32> to vector<16x256xbf16>
    %c32 = arith.constant 32 : index
    %c0_17 = arith.constant 0 : index
    %23 = vector.load %arg16[%c32, %c0_17] : memref<1296x256xbf16, #tpu.memory_space<vmem>>, vector<16x256xbf16>
    tpu.vector_store %arg16[%c32, %c0_17], %22 {strides = array<i32>} : memref<1296x256xbf16, #tpu.memory_space<vmem>>, vector<16x256xbf16>,
    %c0_18 = arith.constant 0 : index
    %c127 = arith.constant 127 : index
    %24 = vector.load %arg15[%c0_18, %c127] : memref<16x512xf32, #tpu.memory_space<vmem>>, vector<16x256xf32>
    %c0_19 = arith.constant 0 : index
    %c0_20 = arith.constant 0 : index
    %25 = vector.load %arg13[%c0_19, %c0_20] : memref<2x256xf32, #tpu.memory_space<vmem>>, vector<1x256xf32>
    %26 = vector.broadcast %25 : vector<1x256xf32> to vector<16x256xf32>
    %27 = arith.mulf %24, %26 : vector<16x256xf32>
    %28 = arith.truncf %27 : vector<16x256xf32> to vector<16x256xbf16>
    %c48 = arith.constant 48 : index
    %c0_21 = arith.constant 0 : index
    %29 = vector.load %arg16[%c48, %c0_21] : memref<1296x256xbf16, #tpu.memory_space<vmem>>, vector<16x256xbf16>
    tpu.vector_store %arg16[%c48, %c0_21], %28 {strides = array<i32>} : memref<1296x256xbf16, #tpu.memory_space<vmem>>, vector<16x256xbf16>,
    %c0_22 = arith.constant 0 : index
    %c129 = arith.constant 129 : index
    %30 = vector.load %arg15[%c0_22, %c129] : memref<16x512xf32, #tpu.memory_space<vmem>>, vector<16x256xf32>
    %c1_23 = arith.constant 1 : index
    %c0_24 = arith.constant 0 : index
    %31 = vector.load %arg13[%c1_23, %c0_24] : memref<2x256xf32, #tpu.memory_space<vmem>>, vector<1x256xf32>
    %32 = vector.broadcast %31 : vector<1x256xf32> to vector<16x256xf32>
    %33 = arith.mulf %30, %32 : vector<16x256xf32>
    %34 = arith.truncf %33 : vector<16x256xf32> to vector<16x256xbf16>
    %c80 = arith.constant 80 : index
    %c0_25 = arith.constant 0 : index
    %35 = vector.load %arg16[%c80, %c0_25] : memref<1296x256xbf16, #tpu.memory_space<vmem>>, vector<16x256xbf16>
    tpu.vector_store %arg16[%c80, %c0_25], %34 {strides = array<i32>} : memref<1296x256xbf16, #tpu.memory_space<vmem>>, vector<16x256xbf16>,
    %c0_26 = arith.constant 0 : index
    %c143 = arith.constant 143 : index
    %36 = vector.load %arg15[%c0_26, %c143] : memref<16x512xf32, #tpu.memory_space<vmem>>, vector<16x256xf32>
    %c0_27 = arith.constant 0 : index
    %c0_28 = arith.constant 0 : index
    %37 = vector.load %arg13[%c0_27, %c0_28] : memref<2x256xf32, #tpu.memory_space<vmem>>, vector<1x256xf32>
    %38 = vector.broadcast %37 : vector<1x256xf32> to vector<16x256xf32>
    %39 = arith.mulf %36, %38 : vector<16x256xf32>
    %40 = arith.truncf %39 : vector<16x256xf32> to vector<16x256xbf16>
    %c96 = arith.constant 96 : index
    %c0_29 = arith.constant 0 : index
    %41 = vector.load %arg16[%c96, %c0_29] : memref<1296x256xbf16, #tpu.memory_space<vmem>>, vector<16x256xbf16>
    tpu.vector_store %arg16[%c96, %c0_29], %40 {strides = array<i32>} : memref<1296x256xbf16, #tpu.memory_space<vmem>>, vector<16x256xbf16>,
    %c0_30 = arith.constant 0 : index
    %c144 = arith.constant 144 : index
    %42 = vector.load %arg15[%c0_30, %c144] : memref<16x512xf32, #tpu.memory_space<vmem>>, vector<16x256xf32>
    %43 = arith.truncf %42 : vector<16x256xf32> to vector<16x256xbf16>
    %c112_31 = arith.constant 112 : index
    %c0_32 = arith.constant 0 : index
    %44 = vector.load %arg16[%c112_31, %c0_32] : memref<1296x256xbf16, #tpu.memory_space<vmem>>, vector<16x256xbf16>
    tpu.vector_store %arg16[%c112_31, %c0_32], %43 {strides = array<i32>} : memref<1296x256xbf16, #tpu.memory_space<vmem>>, vector<16x256xbf16>,
    %c0_33 = arith.constant 0 : index
    %c145 = arith.constant 145 : index
    %45 = vector.load %arg15[%c0_33, %c145] : memref<16x512xf32, #tpu.memory_space<vmem>>, vector<16x256xf32>
    %c1_34 = arith.constant 1 : index
    %c0_35 = arith.constant 0 : index
    %46 = vector.load %arg13[%c1_34, %c0_35] : memref<2x256xf32, #tpu.memory_space<vmem>>, vector<1x256xf32>
    %47 = vector.broadcast %46 : vector<1x256xf32> to vector<16x256xf32>
    %48 = arith.mulf %45, %47 : vector<16x256xf32>
    %49 = arith.truncf %48 : vector<16x256xf32> to vector<16x256xbf16>
    %c128_36 = arith.constant 128 : index
    %c0_37 = arith.constant 0 : index
    %50 = vector.load %arg16[%c128_36, %c0_37] : memref<1296x256xbf16, #tpu.memory_space<vmem>>, vector<16x256xbf16>
    tpu.vector_store %arg16[%c128_36, %c0_37], %49 {strides = array<i32>} : memref<1296x256xbf16, #tpu.memory_space<vmem>>, vector<16x256xbf16>,
    %c0_38 = arith.constant 0 : index
    %c0_39 = arith.constant 0 : index
    %51 = vector.load %arg16[%c0_38, %c0_39] : memref<1296x256xbf16, #tpu.memory_space<vmem>>, vector<144x256xbf16>
    %c0_40 = arith.constant 0 : index
    %c0_41 = arith.constant 0 : index
    %52 = vector.load %arg2[%c0_40, %c0_41] : memref<16x144xbf16, #tpu.memory_space<vmem>>, vector<16x144xbf16>
    %cst_42 = arith.constant dense<0.000000e+00> : vector<16x256xf32>
    %53 = tpu.matmul %52, %51, %cst_42 {dimension_numbers = #tpu.dot_dimension_numbers<[1], [0], [0], [1], [0, 0, 1, 1], [], []>} : vector<16x144xbf16>, vector<144x256xbf16>, vector<16x256xf32> -> vector<16x256xf32>
    %c0_43 = arith.constant 0 : index
    %c0_44 = arith.constant 0 : index
    %c0_45 = arith.constant 0 : index
    %54 = vector.load %arg10[%c0_43, %c0_44, %c0_45] : memref<8x16x1xf32, #tpu.memory_space<vmem>>, vector<1x16x1xf32>
    %55 = vector.shape_cast %54 : vector<1x16x1xf32> to vector<16x1xf32>
    %56 = vector.broadcast %55 : vector<16x1xf32> to vector<16x256xf32>
    %57 = arith.addf %53, %56 : vector<16x256xf32>
    %cst_46 = arith.constant 0.000000e+00 : f32
    %58 = vector.broadcast %cst_46 : f32 to vector<16x256xf32>
    %59 = arith.maximumf %57, %58 : vector<16x256xf32>
    %60 = arith.truncf %59 : vector<16x256xf32> to vector<16x256xbf16>
    %c208 = arith.constant 208 : index
    %c0_47 = arith.constant 0 : index
    %61 = vector.load %arg16[%c208, %c0_47] : memref<1296x256xbf16, #tpu.memory_space<vmem>>, vector<16x256xbf16>
    tpu.vector_store %arg16[%c208, %c0_47], %60 {strides = array<i32>} : memref<1296x256xbf16, #tpu.memory_space<vmem>>, vector<16x256xbf16>,
    %c0_48 = arith.constant 0 : index
    %c128_49 = arith.constant 128 : index
    %62 = vector.load %arg15[%c0_48, %c128_49] : memref<16x512xf32, #tpu.memory_space<vmem>>, vector<16x256xf32>
    tpu.vector_store %arg15[%c0_48, %c128_49], %59 {strides = array<i32>} : memref<16x512xf32, #tpu.memory_space<vmem>>, vector<16x256xf32>,
    %c0_50 = arith.constant 0 : index
    %c111_51 = arith.constant 111 : index
    %63 = vector.load %arg15[%c0_50, %c111_51] : memref<16x512xf32, #tpu.memory_space<vmem>>, vector<16x256xf32>
    %c0_52 = arith.constant 0 : index
    %c0_53 = arith.constant 0 : index
    %64 = vector.load %arg13[%c0_52, %c0_53] : memref<2x256xf32, #tpu.memory_space<vmem>>, vector<1x256xf32>
    %65 = vector.broadcast %64 : vector<1x256xf32> to vector<16x256xf32>
    %66 = arith.mulf %63, %65 : vector<16x256xf32>
    %67 = arith.truncf %66 : vector<16x256xf32> to vector<16x256xbf16>
    %c144_54 = arith.constant 144 : index
    %c0_55 = arith.constant 0 : index
    %68 = vector.load %arg16[%c144_54, %c0_55] : memref<1296x256xbf16, #tpu.memory_space<vmem>>, vector<16x256xbf16>
    tpu.vector_store %arg16[%c144_54, %c0_55], %67 {strides = array<i32>} : memref<1296x256xbf16, #tpu.memory_space<vmem>>, vector<16x256xbf16>,
    %c0_56 = arith.constant 0 : index
    %c112_57 = arith.constant 112 : index
    %69 = vector.load %arg15[%c0_56, %c112_57] : memref<16x512xf32, #tpu.memory_space<vmem>>, vector<16x256xf32>
    %70 = arith.truncf %69 : vector<16x256xf32> to vector<16x256xbf16>
    %c160 = arith.constant 160 : index
    %c0_58 = arith.constant 0 : index
    %71 = vector.load %arg16[%c160, %c0_58] : memref<1296x256xbf16, #tpu.memory_space<vmem>>, vector<16x256xbf16>
    tpu.vector_store %arg16[%c160, %c0_58], %70 {strides = array<i32>} : memref<1296x256xbf16, #tpu.memory_space<vmem>>, vector<16x256xbf16>,
    %c0_59 = arith.constant 0 : index
    %c113_60 = arith.constant 113 : index
    %72 = vector.load %arg15[%c0_59, %c113_60] : memref<16x512xf32, #tpu.memory_space<vmem>>, vector<16x256xf32>
    %c1_61 = arith.constant 1 : index
    %c0_62 = arith.constant 0 : index
    %73 = vector.load %arg13[%c1_61, %c0_62] : memref<2x256xf32, #tpu.memory_space<vmem>>, vector<1x256xf32>
    %74 = vector.broadcast %73 : vector<1x256xf32> to vector<16x256xf32>
    %75 = arith.mulf %72, %74 : vector<16x256xf32>
    %76 = arith.truncf %75 : vector<16x256xf32> to vector<16x256xbf16>
    %c176 = arith.constant 176 : index
    %c0_63 = arith.constant 0 : index
    %77 = vector.load %arg16[%c176, %c0_63] : memref<1296x256xbf16, #tpu.memory_space<vmem>>, vector<16x256xbf16>
    tpu.vector_store %arg16[%c176, %c0_63], %76 {strides = array<i32>} : memref<1296x256xbf16, #tpu.memory_space<vmem>>, vector<16x256xbf16>,
    %c0_64 = arith.constant 0 : index
    %c127_65 = arith.constant 127 : index
    %78 = vector.load %arg15[%c0_64, %c127_65] : memref<16x512xf32, #tpu.memory_space<vmem>>, vector<16x256xf32>
    %c0_66 = arith.constant 0 : index
    %c0_67 = arith.constant 0 : index
    %79 = vector.load %arg13[%c0_66, %c0_67] : memref<2x256xf32, #tpu.memory_space<vmem>>, vector<1x256xf32>
    %80 = vector.broadcast %79 : vector<1x256xf32> to vector<16x256xf32>
    %81 = arith.mulf %78, %80 : vector<16x256xf32>
    %82 = arith.truncf %81 : vector<16x256xf32> to vector<16x256xbf16>
    %c192 = arith.constant 192 : index
    %c0_68 = arith.constant 0 : index
    %83 = vector.load %arg16[%c192, %c0_68] : memref<1296x256xbf16, #tpu.memory_space<vmem>>, vector<16x256xbf16>
    tpu.vector_store %arg16[%c192, %c0_68], %82 {strides = array<i32>} : memref<1296x256xbf16, #tpu.memory_space<vmem>>, vector<16x256xbf16>,
    %c0_69 = arith.constant 0 : index
    %c129_70 = arith.constant 129 : index
    %84 = vector.load %arg15[%c0_69, %c129_70] : memref<16x512xf32, #tpu.memory_space<vmem>>, vector<16x256xf32>
    %c1_71 = arith.constant 1 : index
    %c0_72 = arith.constant 0 : index
    %85 = vector.load %arg13[%c1_71, %c0_72] : memref<2x256xf32, #tpu.memory_space<vmem>>, vector<1x256xf32>
    %86 = vector.broadcast %85 : vector<1x256xf32> to vector<16x256xf32>
    %87 = arith.mulf %84, %86 : vector<16x256xf32>
    %88 = arith.truncf %87 : vector<16x256xf32> to vector<16x256xbf16>
    %c224 = arith.constant 224 : index
    %c0_73 = arith.constant 0 : index
    %89 = vector.load %arg16[%c224, %c0_73] : memref<1296x256xbf16, #tpu.memory_space<vmem>>, vector<16x256xbf16>
    tpu.vector_store %arg16[%c224, %c0_73], %88 {strides = array<i32>} : memref<1296x256xbf16, #tpu.memory_space<vmem>>, vector<16x256xbf16>,
    %c0_74 = arith.constant 0 : index
    %c143_75 = arith.constant 143 : index
    %90 = vector.load %arg15[%c0_74, %c143_75] : memref<16x512xf32, #tpu.memory_space<vmem>>, vector<16x256xf32>
    %c0_76 = arith.constant 0 : index
    %c0_77 = arith.constant 0 : index
    %91 = vector.load %arg13[%c0_76, %c0_77] : memref<2x256xf32, #tpu.memory_space<vmem>>, vector<1x256xf32>
    %92 = vector.broadcast %91 : vector<1x256xf32> to vector<16x256xf32>
    %93 = arith.mulf %90, %92 : vector<16x256xf32>
    %94 = arith.truncf %93 : vector<16x256xf32> to vector<16x256xbf16>
    %c240 = arith.constant 240 : index
    %c0_78 = arith.constant 0 : index
    %95 = vector.load %arg16[%c240, %c0_78] : memref<1296x256xbf16, #tpu.memory_space<vmem>>, vector<16x256xbf16>
    tpu.vector_store %arg16[%c240, %c0_78], %94 {strides = array<i32>} : memref<1296x256xbf16, #tpu.memory_space<vmem>>, vector<16x256xbf16>,
    %c0_79 = arith.constant 0 : index
    %c144_80 = arith.constant 144 : index
    %96 = vector.load %arg15[%c0_79, %c144_80] : memref<16x512xf32, #tpu.memory_space<vmem>>, vector<16x256xf32>
    %97 = arith.truncf %96 : vector<16x256xf32> to vector<16x256xbf16>
    %c256 = arith.constant 256 : index
    %c0_81 = arith.constant 0 : index
    %98 = vector.load %arg16[%c256, %c0_81] : memref<1296x256xbf16, #tpu.memory_space<vmem>>, vector<16x256xbf16>
    tpu.vector_store %arg16[%c256, %c0_81], %97 {strides = array<i32>} : memref<1296x256xbf16, #tpu.memory_space<vmem>>, vector<16x256xbf16>,
    %c0_82 = arith.constant 0 : index
    %c145_83 = arith.constant 145 : index
    %99 = vector.load %arg15[%c0_82, %c145_83] : memref<16x512xf32, #tpu.memory_space<vmem>>, vector<16x256xf32>
    %c1_84 = arith.constant 1 : index
    %c0_85 = arith.constant 0 : index
    %100 = vector.load %arg13[%c1_84, %c0_85] : memref<2x256xf32, #tpu.memory_space<vmem>>, vector<1x256xf32>
    %101 = vector.broadcast %100 : vector<1x256xf32> to vector<16x256xf32>
    %102 = arith.mulf %99, %101 : vector<16x256xf32>
    %103 = arith.truncf %102 : vector<16x256xf32> to vector<16x256xbf16>
    %c272 = arith.constant 272 : index
    %c0_86 = arith.constant 0 : index
    %104 = vector.load %arg16[%c272, %c0_86] : memref<1296x256xbf16, #tpu.memory_space<vmem>>, vector<16x256xbf16>
    tpu.vector_store %arg16[%c272, %c0_86], %103 {strides = array<i32>} : memref<1296x256xbf16, #tpu.memory_space<vmem>>, vector<16x256xbf16>,
    %c0_87 = arith.constant 0 : index
    %c0_88 = arith.constant 0 : index
    %105 = vector.load %arg16[%c0_87, %c0_88] : memref<1296x256xbf16, #tpu.memory_space<vmem>>, vector<288x256xbf16>
    %c0_89 = arith.constant 0 : index
    %c0_90 = arith.constant 0 : index
    %106 = vector.load %arg3[%c0_89, %c0_90] : memref<16x288xbf16, #tpu.memory_space<vmem>>, vector<16x288xbf16>
    %cst_91 = arith.constant dense<0.000000e+00> : vector<16x256xf32>
    %107 = tpu.matmul %106, %105, %cst_91 {dimension_numbers = #tpu.dot_dimension_numbers<[1], [0], [0], [1], [0, 0, 1, 1], [], []>} : vector<16x288xbf16>, vector<288x256xbf16>, vector<16x256xf32> -> vector<16x256xf32>
    %c1_92 = arith.constant 1 : index
    %c0_93 = arith.constant 0 : index
    %c0_94 = arith.constant 0 : index
    %108 = vector.load %arg10[%c1_92, %c0_93, %c0_94] : memref<8x16x1xf32, #tpu.memory_space<vmem>>, vector<1x16x1xf32>
    %109 = vector.shape_cast %108 : vector<1x16x1xf32> to vector<16x1xf32>
    %110 = vector.broadcast %109 : vector<16x1xf32> to vector<16x256xf32>
    %111 = arith.addf %107, %110 : vector<16x256xf32>
    %cst_95 = arith.constant 0.000000e+00 : f32
    %112 = vector.broadcast %cst_95 : f32 to vector<16x256xf32>
    %113 = arith.maximumf %111, %112 : vector<16x256xf32>
    %114 = arith.truncf %113 : vector<16x256xf32> to vector<16x256xbf16>
    %c352 = arith.constant 352 : index
    %c0_96 = arith.constant 0 : index
    %115 = vector.load %arg16[%c352, %c0_96] : memref<1296x256xbf16, #tpu.memory_space<vmem>>, vector<16x256xbf16>
    tpu.vector_store %arg16[%c352, %c0_96], %114 {strides = array<i32>} : memref<1296x256xbf16, #tpu.memory_space<vmem>>, vector<16x256xbf16>,
    %c0_97 = arith.constant 0 : index
    %c128_98 = arith.constant 128 : index
    %116 = vector.load %arg15[%c0_97, %c128_98] : memref<16x512xf32, #tpu.memory_space<vmem>>, vector<16x256xf32>
    tpu.vector_store %arg15[%c0_97, %c128_98], %113 {strides = array<i32>} : memref<16x512xf32, #tpu.memory_space<vmem>>, vector<16x256xf32>,
    %c0_99 = arith.constant 0 : index
    %c111_100 = arith.constant 111 : index
    %117 = vector.load %arg15[%c0_99, %c111_100] : memref<16x512xf32, #tpu.memory_space<vmem>>, vector<16x256xf32>
    %c0_101 = arith.constant 0 : index
    %c0_102 = arith.constant 0 : index
    %118 = vector.load %arg13[%c0_101, %c0_102] : memref<2x256xf32, #tpu.memory_space<vmem>>, vector<1x256xf32>
    %119 = vector.broadcast %118 : vector<1x256xf32> to vector<16x256xf32>
    %120 = arith.mulf %117, %119 : vector<16x256xf32>
    %121 = arith.truncf %120 : vector<16x256xf32> to vector<16x256xbf16>
    %c288 = arith.constant 288 : index
    %c0_103 = arith.constant 0 : index
    %122 = vector.load %arg16[%c288, %c0_103] : memref<1296x256xbf16, #tpu.memory_space<vmem>>, vector<16x256xbf16>
    tpu.vector_store %arg16[%c288, %c0_103], %121 {strides = array<i32>} : memref<1296x256xbf16, #tpu.memory_space<vmem>>, vector<16x256xbf16>,
    %c0_104 = arith.constant 0 : index
    %c112_105 = arith.constant 112 : index
    %123 = vector.load %arg15[%c0_104, %c112_105] : memref<16x512xf32, #tpu.memory_space<vmem>>, vector<16x256xf32>
    %124 = arith.truncf %123 : vector<16x256xf32> to vector<16x256xbf16>
    %c304 = arith.constant 304 : index
    %c0_106 = arith.constant 0 : index
    %125 = vector.load %arg16[%c304, %c0_106] : memref<1296x256xbf16, #tpu.memory_space<vmem>>, vector<16x256xbf16>
    tpu.vector_store %arg16[%c304, %c0_106], %124 {strides = array<i32>} : memref<1296x256xbf16, #tpu.memory_space<vmem>>, vector<16x256xbf16>,
    %c0_107 = arith.constant 0 : index
    %c113_108 = arith.constant 113 : index
    %126 = vector.load %arg15[%c0_107, %c113_108] : memref<16x512xf32, #tpu.memory_space<vmem>>, vector<16x256xf32>
    %c1_109 = arith.constant 1 : index
    %c0_110 = arith.constant 0 : index
    %127 = vector.load %arg13[%c1_109, %c0_110] : memref<2x256xf32, #tpu.memory_space<vmem>>, vector<1x256xf32>
    %128 = vector.broadcast %127 : vector<1x256xf32> to vector<16x256xf32>
    %129 = arith.mulf %126, %128 : vector<16x256xf32>
    %130 = arith.truncf %129 : vector<16x256xf32> to vector<16x256xbf16>
    %c320 = arith.constant 320 : index
    %c0_111 = arith.constant 0 : index
    %131 = vector.load %arg16[%c320, %c0_111] : memref<1296x256xbf16, #tpu.memory_space<vmem>>, vector<16x256xbf16>
    tpu.vector_store %arg16[%c320, %c0_111], %130 {strides = array<i32>} : memref<1296x256xbf16, #tpu.memory_space<vmem>>, vector<16x256xbf16>,
    %c0_112 = arith.constant 0 : index
    %c127_113 = arith.constant 127 : index
    %132 = vector.load %arg15[%c0_112, %c127_113] : memref<16x512xf32, #tpu.memory_space<vmem>>, vector<16x256xf32>
    %c0_114 = arith.constant 0 : index
    %c0_115 = arith.constant 0 : index
    %133 = vector.load %arg13[%c0_114, %c0_115] : memref<2x256xf32, #tpu.memory_space<vmem>>, vector<1x256xf32>
    %134 = vector.broadcast %133 : vector<1x256xf32> to vector<16x256xf32>
    %135 = arith.mulf %132, %134 : vector<16x256xf32>
    %136 = arith.truncf %135 : vector<16x256xf32> to vector<16x256xbf16>
    %c336 = arith.constant 336 : index
    %c0_116 = arith.constant 0 : index
    %137 = vector.load %arg16[%c336, %c0_116] : memref<1296x256xbf16, #tpu.memory_space<vmem>>, vector<16x256xbf16>
    tpu.vector_store %arg16[%c336, %c0_116], %136 {strides = array<i32>} : memref<1296x256xbf16, #tpu.memory_space<vmem>>, vector<16x256xbf16>,
    %c0_117 = arith.constant 0 : index
    %c129_118 = arith.constant 129 : index
    %138 = vector.load %arg15[%c0_117, %c129_118] : memref<16x512xf32, #tpu.memory_space<vmem>>, vector<16x256xf32>
    %c1_119 = arith.constant 1 : index
    %c0_120 = arith.constant 0 : index
    %139 = vector.load %arg13[%c1_119, %c0_120] : memref<2x256xf32, #tpu.memory_space<vmem>>, vector<1x256xf32>
    %140 = vector.broadcast %139 : vector<1x256xf32> to vector<16x256xf32>
    %141 = arith.mulf %138, %140 : vector<16x256xf32>
    %142 = arith.truncf %141 : vector<16x256xf32> to vector<16x256xbf16>
    %c368 = arith.constant 368 : index
    %c0_121 = arith.constant 0 : index
    %143 = vector.load %arg16[%c368, %c0_121] : memref<1296x256xbf16, #tpu.memory_space<vmem>>, vector<16x256xbf16>
    tpu.vector_store %arg16[%c368, %c0_121], %142 {strides = array<i32>} : memref<1296x256xbf16, #tpu.memory_space<vmem>>, vector<16x256xbf16>,
    %c0_122 = arith.constant 0 : index
    %c143_123 = arith.constant 143 : index
    %144 = vector.load %arg15[%c0_122, %c143_123] : memref<16x512xf32, #tpu.memory_space<vmem>>, vector<16x256xf32>
    %c0_124 = arith.constant 0 : index
    %c0_125 = arith.constant 0 : index
    %145 = vector.load %arg13[%c0_124, %c0_125] : memref<2x256xf32, #tpu.memory_space<vmem>>, vector<1x256xf32>
    %146 = vector.broadcast %145 : vector<1x256xf32> to vector<16x256xf32>
    %147 = arith.mulf %144, %146 : vector<16x256xf32>
    %148 = arith.truncf %147 : vector<16x256xf32> to vector<16x256xbf16>
    %c384_126 = arith.constant 384 : index
    %c0_127 = arith.constant 0 : index
    %149 = vector.load %arg16[%c384_126, %c0_127] : memref<1296x256xbf16, #tpu.memory_space<vmem>>, vector<16x256xbf16>
    tpu.vector_store %arg16[%c384_126, %c0_127], %148 {strides = array<i32>} : memref<1296x256xbf16, #tpu.memory_space<vmem>>, vector<16x256xbf16>,
    %c0_128 = arith.constant 0 : index
    %c144_129 = arith.constant 144 : index
    %150 = vector.load %arg15[%c0_128, %c144_129] : memref<16x512xf32, #tpu.memory_space<vmem>>, vector<16x256xf32>
    %151 = arith.truncf %150 : vector<16x256xf32> to vector<16x256xbf16>
    %c400 = arith.constant 400 : index
    %c0_130 = arith.constant 0 : index
    %152 = vector.load %arg16[%c400, %c0_130] : memref<1296x256xbf16, #tpu.memory_space<vmem>>, vector<16x256xbf16>
    tpu.vector_store %arg16[%c400, %c0_130], %151 {strides = array<i32>} : memref<1296x256xbf16, #tpu.memory_space<vmem>>, vector<16x256xbf16>,
    %c0_131 = arith.constant 0 : index
    %c145_132 = arith.constant 145 : index
    %153 = vector.load %arg15[%c0_131, %c145_132] : memref<16x512xf32, #tpu.memory_space<vmem>>, vector<16x256xf32>
    %c1_133 = arith.constant 1 : index
    %c0_134 = arith.constant 0 : index
    %154 = vector.load %arg13[%c1_133, %c0_134] : memref<2x256xf32, #tpu.memory_space<vmem>>, vector<1x256xf32>
    %155 = vector.broadcast %154 : vector<1x256xf32> to vector<16x256xf32>
    %156 = arith.mulf %153, %155 : vector<16x256xf32>
    %157 = arith.truncf %156 : vector<16x256xf32> to vector<16x256xbf16>
    %c416 = arith.constant 416 : index
    %c0_135 = arith.constant 0 : index
    %158 = vector.load %arg16[%c416, %c0_135] : memref<1296x256xbf16, #tpu.memory_space<vmem>>, vector<16x256xbf16>
    tpu.vector_store %arg16[%c416, %c0_135], %157 {strides = array<i32>} : memref<1296x256xbf16, #tpu.memory_space<vmem>>, vector<16x256xbf16>,
    %c0_136 = arith.constant 0 : index
    %c0_137 = arith.constant 0 : index
    %159 = vector.load %arg16[%c0_136, %c0_137] : memref<1296x256xbf16, #tpu.memory_space<vmem>>, vector<432x256xbf16>
    %c0_138 = arith.constant 0 : index
    %c0_139 = arith.constant 0 : index
    %160 = vector.load %arg4[%c0_138, %c0_139] : memref<16x432xbf16, #tpu.memory_space<vmem>>, vector<16x432xbf16>
    %cst_140 = arith.constant dense<0.000000e+00> : vector<16x256xf32>
    %161 = tpu.matmul %160, %159, %cst_140 {dimension_numbers = #tpu.dot_dimension_numbers<[1], [0], [0], [1], [0, 0, 1, 1], [], []>} : vector<16x432xbf16>, vector<432x256xbf16>, vector<16x256xf32> -> vector<16x256xf32>
    %c2 = arith.constant 2 : index
    %c0_141 = arith.constant 0 : index
    %c0_142 = arith.constant 0 : index
    %162 = vector.load %arg10[%c2, %c0_141, %c0_142] : memref<8x16x1xf32, #tpu.memory_space<vmem>>, vector<1x16x1xf32>
    %163 = vector.shape_cast %162 : vector<1x16x1xf32> to vector<16x1xf32>
    %164 = vector.broadcast %163 : vector<16x1xf32> to vector<16x256xf32>
    %165 = arith.addf %161, %164 : vector<16x256xf32>
    %cst_143 = arith.constant 0.000000e+00 : f32
    %166 = vector.broadcast %cst_143 : f32 to vector<16x256xf32>
    %167 = arith.maximumf %165, %166 : vector<16x256xf32>
    %168 = arith.truncf %167 : vector<16x256xf32> to vector<16x256xbf16>
    %c496 = arith.constant 496 : index
    %c0_144 = arith.constant 0 : index
    %169 = vector.load %arg16[%c496, %c0_144] : memref<1296x256xbf16, #tpu.memory_space<vmem>>, vector<16x256xbf16>
    tpu.vector_store %arg16[%c496, %c0_144], %168 {strides = array<i32>} : memref<1296x256xbf16, #tpu.memory_space<vmem>>, vector<16x256xbf16>,
    %c0_145 = arith.constant 0 : index
    %c128_146 = arith.constant 128 : index
    %170 = vector.load %arg15[%c0_145, %c128_146] : memref<16x512xf32, #tpu.memory_space<vmem>>, vector<16x256xf32>
    tpu.vector_store %arg15[%c0_145, %c128_146], %167 {strides = array<i32>} : memref<16x512xf32, #tpu.memory_space<vmem>>, vector<16x256xf32>,
    %c0_147 = arith.constant 0 : index
    %c111_148 = arith.constant 111 : index
    %171 = vector.load %arg15[%c0_147, %c111_148] : memref<16x512xf32, #tpu.memory_space<vmem>>, vector<16x256xf32>
    %c0_149 = arith.constant 0 : index
    %c0_150 = arith.constant 0 : index
    %172 = vector.load %arg13[%c0_149, %c0_150] : memref<2x256xf32, #tpu.memory_space<vmem>>, vector<1x256xf32>
    %173 = vector.broadcast %172 : vector<1x256xf32> to vector<16x256xf32>
    %174 = arith.mulf %171, %173 : vector<16x256xf32>
    %175 = arith.truncf %174 : vector<16x256xf32> to vector<16x256xbf16>
    %c432 = arith.constant 432 : index
    %c0_151 = arith.constant 0 : index
    %176 = vector.load %arg16[%c432, %c0_151] : memref<1296x256xbf16, #tpu.memory_space<vmem>>, vector<16x256xbf16>
    tpu.vector_store %arg16[%c432, %c0_151], %175 {strides = array<i32>} : memref<1296x256xbf16, #tpu.memory_space<vmem>>, vector<16x256xbf16>,
    %c0_152 = arith.constant 0 : index
    %c112_153 = arith.constant 112 : index
    %177 = vector.load %arg15[%c0_152, %c112_153] : memref<16x512xf32, #tpu.memory_space<vmem>>, vector<16x256xf32>
    %178 = arith.truncf %177 : vector<16x256xf32> to vector<16x256xbf16>
    %c448 = arith.constant 448 : index
    %c0_154 = arith.constant 0 : index
    %179 = vector.load %arg16[%c448, %c0_154] : memref<1296x256xbf16, #tpu.memory_space<vmem>>, vector<16x256xbf16>
    tpu.vector_store %arg16[%c448, %c0_154], %178 {strides = array<i32>} : memref<1296x256xbf16, #tpu.memory_space<vmem>>, vector<16x256xbf16>,
    %c0_155 = arith.constant 0 : index
    %c113_156 = arith.constant 113 : index
    %180 = vector.load %arg15[%c0_155, %c113_156] : memref<16x512xf32, #tpu.memory_space<vmem>>, vector<16x256xf32>
    %c1_157 = arith.constant 1 : index
    %c0_158 = arith.constant 0 : index
    %181 = vector.load %arg13[%c1_157, %c0_158] : memref<2x256xf32, #tpu.memory_space<vmem>>, vector<1x256xf32>
    %182 = vector.broadcast %181 : vector<1x256xf32> to vector<16x256xf32>
    %183 = arith.mulf %180, %182 : vector<16x256xf32>
    %184 = arith.truncf %183 : vector<16x256xf32> to vector<16x256xbf16>
    %c464 = arith.constant 464 : index
    %c0_159 = arith.constant 0 : index
    %185 = vector.load %arg16[%c464, %c0_159] : memref<1296x256xbf16, #tpu.memory_space<vmem>>, vector<16x256xbf16>
    tpu.vector_store %arg16[%c464, %c0_159], %184 {strides = array<i32>} : memref<1296x256xbf16, #tpu.memory_space<vmem>>, vector<16x256xbf16>,
    %c0_160 = arith.constant 0 : index
    %c127_161 = arith.constant 127 : index
    %186 = vector.load %arg15[%c0_160, %c127_161] : memref<16x512xf32, #tpu.memory_space<vmem>>, vector<16x256xf32>
    %c0_162 = arith.constant 0 : index
    %c0_163 = arith.constant 0 : index
    %187 = vector.load %arg13[%c0_162, %c0_163] : memref<2x256xf32, #tpu.memory_space<vmem>>, vector<1x256xf32>
    %188 = vector.broadcast %187 : vector<1x256xf32> to vector<16x256xf32>
    %189 = arith.mulf %186, %188 : vector<16x256xf32>
    %190 = arith.truncf %189 : vector<16x256xf32> to vector<16x256xbf16>
    %c480 = arith.constant 480 : index
    %c0_164 = arith.constant 0 : index
    %191 = vector.load %arg16[%c480, %c0_164] : memref<1296x256xbf16, #tpu.memory_space<vmem>>, vector<16x256xbf16>
    tpu.vector_store %arg16[%c480, %c0_164], %190 {strides = array<i32>} : memref<1296x256xbf16, #tpu.memory_space<vmem>>, vector<16x256xbf16>,
    %c0_165 = arith.constant 0 : index
    %c129_166 = arith.constant 129 : index
    %192 = vector.load %arg15[%c0_165, %c129_166] : memref<16x512xf32, #tpu.memory_space<vmem>>, vector<16x256xf32>
    %c1_167 = arith.constant 1 : index
    %c0_168 = arith.constant 0 : index
    %193 = vector.load %arg13[%c1_167, %c0_168] : memref<2x256xf32, #tpu.memory_space<vmem>>, vector<1x256xf32>
    %194 = vector.broadcast %193 : vector<1x256xf32> to vector<16x256xf32>
    %195 = arith.mulf %192, %194 : vector<16x256xf32>
    %196 = arith.truncf %195 : vector<16x256xf32> to vector<16x256xbf16>
    %c512 = arith.constant 512 : index
    %c0_169 = arith.constant 0 : index
    %197 = vector.load %arg16[%c512, %c0_169] : memref<1296x256xbf16, #tpu.memory_space<vmem>>, vector<16x256xbf16>
    tpu.vector_store %arg16[%c512, %c0_169], %196 {strides = array<i32>} : memref<1296x256xbf16, #tpu.memory_space<vmem>>, vector<16x256xbf16>,
    %c0_170 = arith.constant 0 : index
    %c143_171 = arith.constant 143 : index
    %198 = vector.load %arg15[%c0_170, %c143_171] : memref<16x512xf32, #tpu.memory_space<vmem>>, vector<16x256xf32>
    %c0_172 = arith.constant 0 : index
    %c0_173 = arith.constant 0 : index
    %199 = vector.load %arg13[%c0_172, %c0_173] : memref<2x256xf32, #tpu.memory_space<vmem>>, vector<1x256xf32>
    %200 = vector.broadcast %199 : vector<1x256xf32> to vector<16x256xf32>
    %201 = arith.mulf %198, %200 : vector<16x256xf32>
    %202 = arith.truncf %201 : vector<16x256xf32> to vector<16x256xbf16>
    %c528 = arith.constant 528 : index
    %c0_174 = arith.constant 0 : index
    %203 = vector.load %arg16[%c528, %c0_174] : memref<1296x256xbf16, #tpu.memory_space<vmem>>, vector<16x256xbf16>
    tpu.vector_store %arg16[%c528, %c0_174], %202 {strides = array<i32>} : memref<1296x256xbf16, #tpu.memory_space<vmem>>, vector<16x256xbf16>,
    %c0_175 = arith.constant 0 : index
    %c144_176 = arith.constant 144 : index
    %204 = vector.load %arg15[%c0_175, %c144_176] : memref<16x512xf32, #tpu.memory_space<vmem>>, vector<16x256xf32>
    %205 = arith.truncf %204 : vector<16x256xf32> to vector<16x256xbf16>
    %c544 = arith.constant 544 : index
    %c0_177 = arith.constant 0 : index
    %206 = vector.load %arg16[%c544, %c0_177] : memref<1296x256xbf16, #tpu.memory_space<vmem>>, vector<16x256xbf16>
    tpu.vector_store %arg16[%c544, %c0_177], %205 {strides = array<i32>} : memref<1296x256xbf16, #tpu.memory_space<vmem>>, vector<16x256xbf16>,
    %c0_178 = arith.constant 0 : index
    %c145_179 = arith.constant 145 : index
    %207 = vector.load %arg15[%c0_178, %c145_179] : memref<16x512xf32, #tpu.memory_space<vmem>>, vector<16x256xf32>
    %c1_180 = arith.constant 1 : index
    %c0_181 = arith.constant 0 : index
    %208 = vector.load %arg13[%c1_180, %c0_181] : memref<2x256xf32, #tpu.memory_space<vmem>>, vector<1x256xf32>
    %209 = vector.broadcast %208 : vector<1x256xf32> to vector<16x256xf32>
    %210 = arith.mulf %207, %209 : vector<16x256xf32>
    %211 = arith.truncf %210 : vector<16x256xf32> to vector<16x256xbf16>
    %c560 = arith.constant 560 : index
    %c0_182 = arith.constant 0 : index
    %212 = vector.load %arg16[%c560, %c0_182] : memref<1296x256xbf16, #tpu.memory_space<vmem>>, vector<16x256xbf16>
    tpu.vector_store %arg16[%c560, %c0_182], %211 {strides = array<i32>} : memref<1296x256xbf16, #tpu.memory_space<vmem>>, vector<16x256xbf16>,
    %c0_183 = arith.constant 0 : index
    %c0_184 = arith.constant 0 : index
    %213 = vector.load %arg16[%c0_183, %c0_184] : memref<1296x256xbf16, #tpu.memory_space<vmem>>, vector<576x256xbf16>
    %c0_185 = arith.constant 0 : index
    %c0_186 = arith.constant 0 : index
    %214 = vector.load %arg5[%c0_185, %c0_186] : memref<16x576xbf16, #tpu.memory_space<vmem>>, vector<16x576xbf16>
    %cst_187 = arith.constant dense<0.000000e+00> : vector<16x256xf32>
    %215 = tpu.matmul %214, %213, %cst_187 {dimension_numbers = #tpu.dot_dimension_numbers<[1], [0], [0], [1], [0, 0, 1, 1], [], []>} : vector<16x576xbf16>, vector<576x256xbf16>, vector<16x256xf32> -> vector<16x256xf32>
    %c3 = arith.constant 3 : index
    %c0_188 = arith.constant 0 : index
    %c0_189 = arith.constant 0 : index
    %216 = vector.load %arg10[%c3, %c0_188, %c0_189] : memref<8x16x1xf32, #tpu.memory_space<vmem>>, vector<1x16x1xf32>
    %217 = vector.shape_cast %216 : vector<1x16x1xf32> to vector<16x1xf32>
    %218 = vector.broadcast %217 : vector<16x1xf32> to vector<16x256xf32>
    %219 = arith.addf %215, %218 : vector<16x256xf32>
    %cst_190 = arith.constant 0.000000e+00 : f32
    %220 = vector.broadcast %cst_190 : f32 to vector<16x256xf32>
    %221 = arith.maximumf %219, %220 : vector<16x256xf32>
    %222 = arith.truncf %221 : vector<16x256xf32> to vector<16x256xbf16>
    %c640 = arith.constant 640 : index
    %c0_191 = arith.constant 0 : index
    %223 = vector.load %arg16[%c640, %c0_191] : memref<1296x256xbf16, #tpu.memory_space<vmem>>, vector<16x256xbf16>
    tpu.vector_store %arg16[%c640, %c0_191], %222 {strides = array<i32>} : memref<1296x256xbf16, #tpu.memory_space<vmem>>, vector<16x256xbf16>,
    %c0_192 = arith.constant 0 : index
    %c128_193 = arith.constant 128 : index
    %224 = vector.load %arg15[%c0_192, %c128_193] : memref<16x512xf32, #tpu.memory_space<vmem>>, vector<16x256xf32>
    tpu.vector_store %arg15[%c0_192, %c128_193], %221 {strides = array<i32>} : memref<16x512xf32, #tpu.memory_space<vmem>>, vector<16x256xf32>,
    %c0_194 = arith.constant 0 : index
    %c111_195 = arith.constant 111 : index
    %225 = vector.load %arg15[%c0_194, %c111_195] : memref<16x512xf32, #tpu.memory_space<vmem>>, vector<16x256xf32>
    %c0_196 = arith.constant 0 : index
    %c0_197 = arith.constant 0 : index
    %226 = vector.load %arg13[%c0_196, %c0_197] : memref<2x256xf32, #tpu.memory_space<vmem>>, vector<1x256xf32>
    %227 = vector.broadcast %226 : vector<1x256xf32> to vector<16x256xf32>
    %228 = arith.mulf %225, %227 : vector<16x256xf32>
    %229 = arith.truncf %228 : vector<16x256xf32> to vector<16x256xbf16>
    %c576 = arith.constant 576 : index
    %c0_198 = arith.constant 0 : index
    %230 = vector.load %arg16[%c576, %c0_198] : memref<1296x256xbf16, #tpu.memory_space<vmem>>, vector<16x256xbf16>
    tpu.vector_store %arg16[%c576, %c0_198], %229 {strides = array<i32>} : memref<1296x256xbf16, #tpu.memory_space<vmem>>, vector<16x256xbf16>,
    %c0_199 = arith.constant 0 : index
    %c112_200 = arith.constant 112 : index
    %231 = vector.load %arg15[%c0_199, %c112_200] : memref<16x512xf32, #tpu.memory_space<vmem>>, vector<16x256xf32>
    %232 = arith.truncf %231 : vector<16x256xf32> to vector<16x256xbf16>
    %c592 = arith.constant 592 : index
    %c0_201 = arith.constant 0 : index
    %233 = vector.load %arg16[%c592, %c0_201] : memref<1296x256xbf16, #tpu.memory_space<vmem>>, vector<16x256xbf16>
    tpu.vector_store %arg16[%c592, %c0_201], %232 {strides = array<i32>} : memref<1296x256xbf16, #tpu.memory_space<vmem>>, vector<16x256xbf16>,
    %c0_202 = arith.constant 0 : index
    %c113_203 = arith.constant 113 : index
    %234 = vector.load %arg15[%c0_202, %c113_203] : memref<16x512xf32, #tpu.memory_space<vmem>>, vector<16x256xf32>
    %c1_204 = arith.constant 1 : index
    %c0_205 = arith.constant 0 : index
    %235 = vector.load %arg13[%c1_204, %c0_205] : memref<2x256xf32, #tpu.memory_space<vmem>>, vector<1x256xf32>
    %236 = vector.broadcast %235 : vector<1x256xf32> to vector<16x256xf32>
    %237 = arith.mulf %234, %236 : vector<16x256xf32>
    %238 = arith.truncf %237 : vector<16x256xf32> to vector<16x256xbf16>
    %c608 = arith.constant 608 : index
    %c0_206 = arith.constant 0 : index
    %239 = vector.load %arg16[%c608, %c0_206] : memref<1296x256xbf16, #tpu.memory_space<vmem>>, vector<16x256xbf16>
    tpu.vector_store %arg16[%c608, %c0_206], %238 {strides = array<i32>} : memref<1296x256xbf16, #tpu.memory_space<vmem>>, vector<16x256xbf16>,
    %c0_207 = arith.constant 0 : index
    %c127_208 = arith.constant 127 : index
    %240 = vector.load %arg15[%c0_207, %c127_208] : memref<16x512xf32, #tpu.memory_space<vmem>>, vector<16x256xf32>
    %c0_209 = arith.constant 0 : index
    %c0_210 = arith.constant 0 : index
    %241 = vector.load %arg13[%c0_209, %c0_210] : memref<2x256xf32, #tpu.memory_space<vmem>>, vector<1x256xf32>
    %242 = vector.broadcast %241 : vector<1x256xf32> to vector<16x256xf32>
    %243 = arith.mulf %240, %242 : vector<16x256xf32>
    %244 = arith.truncf %243 : vector<16x256xf32> to vector<16x256xbf16>
    %c624 = arith.constant 624 : index
    %c0_211 = arith.constant 0 : index
    %245 = vector.load %arg16[%c624, %c0_211] : memref<1296x256xbf16, #tpu.memory_space<vmem>>, vector<16x256xbf16>
    tpu.vector_store %arg16[%c624, %c0_211], %244 {strides = array<i32>} : memref<1296x256xbf16, #tpu.memory_space<vmem>>, vector<16x256xbf16>,
    %c0_212 = arith.constant 0 : index
    %c129_213 = arith.constant 129 : index
    %246 = vector.load %arg15[%c0_212, %c129_213] : memref<16x512xf32, #tpu.memory_space<vmem>>, vector<16x256xf32>
    %c1_214 = arith.constant 1 : index
    %c0_215 = arith.constant 0 : index
    %247 = vector.load %arg13[%c1_214, %c0_215] : memref<2x256xf32, #tpu.memory_space<vmem>>, vector<1x256xf32>
    %248 = vector.broadcast %247 : vector<1x256xf32> to vector<16x256xf32>
    %249 = arith.mulf %246, %248 : vector<16x256xf32>
    %250 = arith.truncf %249 : vector<16x256xf32> to vector<16x256xbf16>
    %c656 = arith.constant 656 : index
    %c0_216 = arith.constant 0 : index
    %251 = vector.load %arg16[%c656, %c0_216] : memref<1296x256xbf16, #tpu.memory_space<vmem>>, vector<16x256xbf16>
    tpu.vector_store %arg16[%c656, %c0_216], %250 {strides = array<i32>} : memref<1296x256xbf16, #tpu.memory_space<vmem>>, vector<16x256xbf16>,
    %c0_217 = arith.constant 0 : index
    %c143_218 = arith.constant 143 : index
    %252 = vector.load %arg15[%c0_217, %c143_218] : memref<16x512xf32, #tpu.memory_space<vmem>>, vector<16x256xf32>
    %c0_219 = arith.constant 0 : index
    %c0_220 = arith.constant 0 : index
    %253 = vector.load %arg13[%c0_219, %c0_220] : memref<2x256xf32, #tpu.memory_space<vmem>>, vector<1x256xf32>
    %254 = vector.broadcast %253 : vector<1x256xf32> to vector<16x256xf32>
    %255 = arith.mulf %252, %254 : vector<16x256xf32>
    %256 = arith.truncf %255 : vector<16x256xf32> to vector<16x256xbf16>
    %c672 = arith.constant 672 : index
    %c0_221 = arith.constant 0 : index
    %257 = vector.load %arg16[%c672, %c0_221] : memref<1296x256xbf16, #tpu.memory_space<vmem>>, vector<16x256xbf16>
    tpu.vector_store %arg16[%c672, %c0_221], %256 {strides = array<i32>} : memref<1296x256xbf16, #tpu.memory_space<vmem>>, vector<16x256xbf16>,
    %c0_222 = arith.constant 0 : index
    %c144_223 = arith.constant 144 : index
    %258 = vector.load %arg15[%c0_222, %c144_223] : memref<16x512xf32, #tpu.memory_space<vmem>>, vector<16x256xf32>
    %259 = arith.truncf %258 : vector<16x256xf32> to vector<16x256xbf16>
    %c688 = arith.constant 688 : index
    %c0_224 = arith.constant 0 : index
    %260 = vector.load %arg16[%c688, %c0_224] : memref<1296x256xbf16, #tpu.memory_space<vmem>>, vector<16x256xbf16>
    tpu.vector_store %arg16[%c688, %c0_224], %259 {strides = array<i32>} : memref<1296x256xbf16, #tpu.memory_space<vmem>>, vector<16x256xbf16>,
    %c0_225 = arith.constant 0 : index
    %c145_226 = arith.constant 145 : index
    %261 = vector.load %arg15[%c0_225, %c145_226] : memref<16x512xf32, #tpu.memory_space<vmem>>, vector<16x256xf32>
    %c1_227 = arith.constant 1 : index
    %c0_228 = arith.constant 0 : index
    %262 = vector.load %arg13[%c1_227, %c0_228] : memref<2x256xf32, #tpu.memory_space<vmem>>, vector<1x256xf32>
    %263 = vector.broadcast %262 : vector<1x256xf32> to vector<16x256xf32>
    %264 = arith.mulf %261, %263 : vector<16x256xf32>
    %265 = arith.truncf %264 : vector<16x256xf32> to vector<16x256xbf16>
    %c704 = arith.constant 704 : index
    %c0_229 = arith.constant 0 : index
    %266 = vector.load %arg16[%c704, %c0_229] : memref<1296x256xbf16, #tpu.memory_space<vmem>>, vector<16x256xbf16>
    tpu.vector_store %arg16[%c704, %c0_229], %265 {strides = array<i32>} : memref<1296x256xbf16, #tpu.memory_space<vmem>>, vector<16x256xbf16>,
    %c0_230 = arith.constant 0 : index
    %c0_231 = arith.constant 0 : index
    %267 = vector.load %arg16[%c0_230, %c0_231] : memref<1296x256xbf16, #tpu.memory_space<vmem>>, vector<720x256xbf16>
    %c0_232 = arith.constant 0 : index
    %c0_233 = arith.constant 0 : index
    %268 = vector.load %arg6[%c0_232, %c0_233] : memref<16x720xbf16, #tpu.memory_space<vmem>>, vector<16x720xbf16>
    %cst_234 = arith.constant dense<0.000000e+00> : vector<16x256xf32>
    %269 = tpu.matmul %268, %267, %cst_234 {dimension_numbers = #tpu.dot_dimension_numbers<[1], [0], [0], [1], [0, 0, 1, 1], [], []>} : vector<16x720xbf16>, vector<720x256xbf16>, vector<16x256xf32> -> vector<16x256xf32>
    %c4 = arith.constant 4 : index
    %c0_235 = arith.constant 0 : index
    %c0_236 = arith.constant 0 : index
    %270 = vector.load %arg10[%c4, %c0_235, %c0_236] : memref<8x16x1xf32, #tpu.memory_space<vmem>>, vector<1x16x1xf32>
    %271 = vector.shape_cast %270 : vector<1x16x1xf32> to vector<16x1xf32>
    %272 = vector.broadcast %271 : vector<16x1xf32> to vector<16x256xf32>
    %273 = arith.addf %269, %272 : vector<16x256xf32>
    %cst_237 = arith.constant 0.000000e+00 : f32
    %274 = vector.broadcast %cst_237 : f32 to vector<16x256xf32>
    %275 = arith.maximumf %273, %274 : vector<16x256xf32>
    %276 = arith.truncf %275 : vector<16x256xf32> to vector<16x256xbf16>
    %c784 = arith.constant 784 : index
    %c0_238 = arith.constant 0 : index
    %277 = vector.load %arg16[%c784, %c0_238] : memref<1296x256xbf16, #tpu.memory_space<vmem>>, vector<16x256xbf16>
    tpu.vector_store %arg16[%c784, %c0_238], %276 {strides = array<i32>} : memref<1296x256xbf16, #tpu.memory_space<vmem>>, vector<16x256xbf16>,
    %c0_239 = arith.constant 0 : index
    %c128_240 = arith.constant 128 : index
    %278 = vector.load %arg15[%c0_239, %c128_240] : memref<16x512xf32, #tpu.memory_space<vmem>>, vector<16x256xf32>
    tpu.vector_store %arg15[%c0_239, %c128_240], %275 {strides = array<i32>} : memref<16x512xf32, #tpu.memory_space<vmem>>, vector<16x256xf32>,
    %c0_241 = arith.constant 0 : index
    %c111_242 = arith.constant 111 : index
    %279 = vector.load %arg15[%c0_241, %c111_242] : memref<16x512xf32, #tpu.memory_space<vmem>>, vector<16x256xf32>
    %c0_243 = arith.constant 0 : index
    %c0_244 = arith.constant 0 : index
    %280 = vector.load %arg13[%c0_243, %c0_244] : memref<2x256xf32, #tpu.memory_space<vmem>>, vector<1x256xf32>
    %281 = vector.broadcast %280 : vector<1x256xf32> to vector<16x256xf32>
    %282 = arith.mulf %279, %281 : vector<16x256xf32>
    %283 = arith.truncf %282 : vector<16x256xf32> to vector<16x256xbf16>
    %c720 = arith.constant 720 : index
    %c0_245 = arith.constant 0 : index
    %284 = vector.load %arg16[%c720, %c0_245] : memref<1296x256xbf16, #tpu.memory_space<vmem>>, vector<16x256xbf16>
    tpu.vector_store %arg16[%c720, %c0_245], %283 {strides = array<i32>} : memref<1296x256xbf16, #tpu.memory_space<vmem>>, vector<16x256xbf16>,
    %c0_246 = arith.constant 0 : index
    %c112_247 = arith.constant 112 : index
    %285 = vector.load %arg15[%c0_246, %c112_247] : memref<16x512xf32, #tpu.memory_space<vmem>>, vector<16x256xf32>
    %286 = arith.truncf %285 : vector<16x256xf32> to vector<16x256xbf16>
    %c736 = arith.constant 736 : index
    %c0_248 = arith.constant 0 : index
    %287 = vector.load %arg16[%c736, %c0_248] : memref<1296x256xbf16, #tpu.memory_space<vmem>>, vector<16x256xbf16>
    tpu.vector_store %arg16[%c736, %c0_248], %286 {strides = array<i32>} : memref<1296x256xbf16, #tpu.memory_space<vmem>>, vector<16x256xbf16>,
    %c0_249 = arith.constant 0 : index
    %c113_250 = arith.constant 113 : index
    %288 = vector.load %arg15[%c0_249, %c113_250] : memref<16x512xf32, #tpu.memory_space<vmem>>, vector<16x256xf32>
    %c1_251 = arith.constant 1 : index
    %c0_252 = arith.constant 0 : index
    %289 = vector.load %arg13[%c1_251, %c0_252] : memref<2x256xf32, #tpu.memory_space<vmem>>, vector<1x256xf32>
    %290 = vector.broadcast %289 : vector<1x256xf32> to vector<16x256xf32>
    %291 = arith.mulf %288, %290 : vector<16x256xf32>
    %292 = arith.truncf %291 : vector<16x256xf32> to vector<16x256xbf16>
    %c752 = arith.constant 752 : index
    %c0_253 = arith.constant 0 : index
    %293 = vector.load %arg16[%c752, %c0_253] : memref<1296x256xbf16, #tpu.memory_space<vmem>>, vector<16x256xbf16>
    tpu.vector_store %arg16[%c752, %c0_253], %292 {strides = array<i32>} : memref<1296x256xbf16, #tpu.memory_space<vmem>>, vector<16x256xbf16>,
    %c0_254 = arith.constant 0 : index
    %c127_255 = arith.constant 127 : index
    %294 = vector.load %arg15[%c0_254, %c127_255] : memref<16x512xf32, #tpu.memory_space<vmem>>, vector<16x256xf32>
    %c0_256 = arith.constant 0 : index
    %c0_257 = arith.constant 0 : index
    %295 = vector.load %arg13[%c0_256, %c0_257] : memref<2x256xf32, #tpu.memory_space<vmem>>, vector<1x256xf32>
    %296 = vector.broadcast %295 : vector<1x256xf32> to vector<16x256xf32>
    %297 = arith.mulf %294, %296 : vector<16x256xf32>
    %298 = arith.truncf %297 : vector<16x256xf32> to vector<16x256xbf16>
    %c768 = arith.constant 768 : index
    %c0_258 = arith.constant 0 : index
    %299 = vector.load %arg16[%c768, %c0_258] : memref<1296x256xbf16, #tpu.memory_space<vmem>>, vector<16x256xbf16>
    tpu.vector_store %arg16[%c768, %c0_258], %298 {strides = array<i32>} : memref<1296x256xbf16, #tpu.memory_space<vmem>>, vector<16x256xbf16>,
    %c0_259 = arith.constant 0 : index
    %c129_260 = arith.constant 129 : index
    %300 = vector.load %arg15[%c0_259, %c129_260] : memref<16x512xf32, #tpu.memory_space<vmem>>, vector<16x256xf32>
    %c1_261 = arith.constant 1 : index
    %c0_262 = arith.constant 0 : index
    %301 = vector.load %arg13[%c1_261, %c0_262] : memref<2x256xf32, #tpu.memory_space<vmem>>, vector<1x256xf32>
    %302 = vector.broadcast %301 : vector<1x256xf32> to vector<16x256xf32>
    %303 = arith.mulf %300, %302 : vector<16x256xf32>
    %304 = arith.truncf %303 : vector<16x256xf32> to vector<16x256xbf16>
    %c800 = arith.constant 800 : index
    %c0_263 = arith.constant 0 : index
    %305 = vector.load %arg16[%c800, %c0_263] : memref<1296x256xbf16, #tpu.memory_space<vmem>>, vector<16x256xbf16>
    tpu.vector_store %arg16[%c800, %c0_263], %304 {strides = array<i32>} : memref<1296x256xbf16, #tpu.memory_space<vmem>>, vector<16x256xbf16>,
    %c0_264 = arith.constant 0 : index
    %c143_265 = arith.constant 143 : index
    %306 = vector.load %arg15[%c0_264, %c143_265] : memref<16x512xf32, #tpu.memory_space<vmem>>, vector<16x256xf32>
    %c0_266 = arith.constant 0 : index
    %c0_267 = arith.constant 0 : index
    %307 = vector.load %arg13[%c0_266, %c0_267] : memref<2x256xf32, #tpu.memory_space<vmem>>, vector<1x256xf32>
    %308 = vector.broadcast %307 : vector<1x256xf32> to vector<16x256xf32>
    %309 = arith.mulf %306, %308 : vector<16x256xf32>
    %310 = arith.truncf %309 : vector<16x256xf32> to vector<16x256xbf16>
    %c816 = arith.constant 816 : index
    %c0_268 = arith.constant 0 : index
    %311 = vector.load %arg16[%c816, %c0_268] : memref<1296x256xbf16, #tpu.memory_space<vmem>>, vector<16x256xbf16>
    tpu.vector_store %arg16[%c816, %c0_268], %310 {strides = array<i32>} : memref<1296x256xbf16, #tpu.memory_space<vmem>>, vector<16x256xbf16>,
    %c0_269 = arith.constant 0 : index
    %c144_270 = arith.constant 144 : index
    %312 = vector.load %arg15[%c0_269, %c144_270] : memref<16x512xf32, #tpu.memory_space<vmem>>, vector<16x256xf32>
    %313 = arith.truncf %312 : vector<16x256xf32> to vector<16x256xbf16>
    %c832 = arith.constant 832 : index
    %c0_271 = arith.constant 0 : index
    %314 = vector.load %arg16[%c832, %c0_271] : memref<1296x256xbf16, #tpu.memory_space<vmem>>, vector<16x256xbf16>
    tpu.vector_store %arg16[%c832, %c0_271], %313 {strides = array<i32>} : memref<1296x256xbf16, #tpu.memory_space<vmem>>, vector<16x256xbf16>,
    %c0_272 = arith.constant 0 : index
    %c145_273 = arith.constant 145 : index
    %315 = vector.load %arg15[%c0_272, %c145_273] : memref<16x512xf32, #tpu.memory_space<vmem>>, vector<16x256xf32>
    %c1_274 = arith.constant 1 : index
    %c0_275 = arith.constant 0 : index
    %316 = vector.load %arg13[%c1_274, %c0_275] : memref<2x256xf32, #tpu.memory_space<vmem>>, vector<1x256xf32>
    %317 = vector.broadcast %316 : vector<1x256xf32> to vector<16x256xf32>
    %318 = arith.mulf %315, %317 : vector<16x256xf32>
    %319 = arith.truncf %318 : vector<16x256xf32> to vector<16x256xbf16>
    %c848 = arith.constant 848 : index
    %c0_276 = arith.constant 0 : index
    %320 = vector.load %arg16[%c848, %c0_276] : memref<1296x256xbf16, #tpu.memory_space<vmem>>, vector<16x256xbf16>
    tpu.vector_store %arg16[%c848, %c0_276], %319 {strides = array<i32>} : memref<1296x256xbf16, #tpu.memory_space<vmem>>, vector<16x256xbf16>,
    %c0_277 = arith.constant 0 : index
    %c0_278 = arith.constant 0 : index
    %321 = vector.load %arg16[%c0_277, %c0_278] : memref<1296x256xbf16, #tpu.memory_space<vmem>>, vector<864x256xbf16>
    %c0_279 = arith.constant 0 : index
    %c0_280 = arith.constant 0 : index
    %322 = vector.load %arg7[%c0_279, %c0_280] : memref<16x864xbf16, #tpu.memory_space<vmem>>, vector<16x864xbf16>
    %cst_281 = arith.constant dense<0.000000e+00> : vector<16x256xf32>
    %323 = tpu.matmul %322, %321, %cst_281 {dimension_numbers = #tpu.dot_dimension_numbers<[1], [0], [0], [1], [0, 0, 1, 1], [], []>} : vector<16x864xbf16>, vector<864x256xbf16>, vector<16x256xf32> -> vector<16x256xf32>
    %c5 = arith.constant 5 : index
    %c0_282 = arith.constant 0 : index
    %c0_283 = arith.constant 0 : index
    %324 = vector.load %arg10[%c5, %c0_282, %c0_283] : memref<8x16x1xf32, #tpu.memory_space<vmem>>, vector<1x16x1xf32>
    %325 = vector.shape_cast %324 : vector<1x16x1xf32> to vector<16x1xf32>
    %326 = vector.broadcast %325 : vector<16x1xf32> to vector<16x256xf32>
    %327 = arith.addf %323, %326 : vector<16x256xf32>
    %cst_284 = arith.constant 0.000000e+00 : f32
    %328 = vector.broadcast %cst_284 : f32 to vector<16x256xf32>
    %329 = arith.maximumf %327, %328 : vector<16x256xf32>
    %330 = arith.truncf %329 : vector<16x256xf32> to vector<16x256xbf16>
    %c928 = arith.constant 928 : index
    %c0_285 = arith.constant 0 : index
    %331 = vector.load %arg16[%c928, %c0_285] : memref<1296x256xbf16, #tpu.memory_space<vmem>>, vector<16x256xbf16>
    tpu.vector_store %arg16[%c928, %c0_285], %330 {strides = array<i32>} : memref<1296x256xbf16, #tpu.memory_space<vmem>>, vector<16x256xbf16>,
    %c0_286 = arith.constant 0 : index
    %c128_287 = arith.constant 128 : index
    %332 = vector.load %arg15[%c0_286, %c128_287] : memref<16x512xf32, #tpu.memory_space<vmem>>, vector<16x256xf32>
    tpu.vector_store %arg15[%c0_286, %c128_287], %329 {strides = array<i32>} : memref<16x512xf32, #tpu.memory_space<vmem>>, vector<16x256xf32>,
    %c0_288 = arith.constant 0 : index
    %c111_289 = arith.constant 111 : index
    %333 = vector.load %arg15[%c0_288, %c111_289] : memref<16x512xf32, #tpu.memory_space<vmem>>, vector<16x256xf32>
    %c0_290 = arith.constant 0 : index
    %c0_291 = arith.constant 0 : index
    %334 = vector.load %arg13[%c0_290, %c0_291] : memref<2x256xf32, #tpu.memory_space<vmem>>, vector<1x256xf32>
    %335 = vector.broadcast %334 : vector<1x256xf32> to vector<16x256xf32>
    %336 = arith.mulf %333, %335 : vector<16x256xf32>
    %337 = arith.truncf %336 : vector<16x256xf32> to vector<16x256xbf16>
    %c864 = arith.constant 864 : index
    %c0_292 = arith.constant 0 : index
    %338 = vector.load %arg16[%c864, %c0_292] : memref<1296x256xbf16, #tpu.memory_space<vmem>>, vector<16x256xbf16>
    tpu.vector_store %arg16[%c864, %c0_292], %337 {strides = array<i32>} : memref<1296x256xbf16, #tpu.memory_space<vmem>>, vector<16x256xbf16>,
    %c0_293 = arith.constant 0 : index
    %c112_294 = arith.constant 112 : index
    %339 = vector.load %arg15[%c0_293, %c112_294] : memref<16x512xf32, #tpu.memory_space<vmem>>, vector<16x256xf32>
    %340 = arith.truncf %339 : vector<16x256xf32> to vector<16x256xbf16>
    %c880 = arith.constant 880 : index
    %c0_295 = arith.constant 0 : index
    %341 = vector.load %arg16[%c880, %c0_295] : memref<1296x256xbf16, #tpu.memory_space<vmem>>, vector<16x256xbf16>
    tpu.vector_store %arg16[%c880, %c0_295], %340 {strides = array<i32>} : memref<1296x256xbf16, #tpu.memory_space<vmem>>, vector<16x256xbf16>,
    %c0_296 = arith.constant 0 : index
    %c113_297 = arith.constant 113 : index
    %342 = vector.load %arg15[%c0_296, %c113_297] : memref<16x512xf32, #tpu.memory_space<vmem>>, vector<16x256xf32>
    %c1_298 = arith.constant 1 : index
    %c0_299 = arith.constant 0 : index
    %343 = vector.load %arg13[%c1_298, %c0_299] : memref<2x256xf32, #tpu.memory_space<vmem>>, vector<1x256xf32>
    %344 = vector.broadcast %343 : vector<1x256xf32> to vector<16x256xf32>
    %345 = arith.mulf %342, %344 : vector<16x256xf32>
    %346 = arith.truncf %345 : vector<16x256xf32> to vector<16x256xbf16>
    %c896 = arith.constant 896 : index
    %c0_300 = arith.constant 0 : index
    %347 = vector.load %arg16[%c896, %c0_300] : memref<1296x256xbf16, #tpu.memory_space<vmem>>, vector<16x256xbf16>
    tpu.vector_store %arg16[%c896, %c0_300], %346 {strides = array<i32>} : memref<1296x256xbf16, #tpu.memory_space<vmem>>, vector<16x256xbf16>,
    %c0_301 = arith.constant 0 : index
    %c127_302 = arith.constant 127 : index
    %348 = vector.load %arg15[%c0_301, %c127_302] : memref<16x512xf32, #tpu.memory_space<vmem>>, vector<16x256xf32>
    %c0_303 = arith.constant 0 : index
    %c0_304 = arith.constant 0 : index
    %349 = vector.load %arg13[%c0_303, %c0_304] : memref<2x256xf32, #tpu.memory_space<vmem>>, vector<1x256xf32>
    %350 = vector.broadcast %349 : vector<1x256xf32> to vector<16x256xf32>
    %351 = arith.mulf %348, %350 : vector<16x256xf32>
    %352 = arith.truncf %351 : vector<16x256xf32> to vector<16x256xbf16>
    %c912 = arith.constant 912 : index
    %c0_305 = arith.constant 0 : index
    %353 = vector.load %arg16[%c912, %c0_305] : memref<1296x256xbf16, #tpu.memory_space<vmem>>, vector<16x256xbf16>
    tpu.vector_store %arg16[%c912, %c0_305], %352 {strides = array<i32>} : memref<1296x256xbf16, #tpu.memory_space<vmem>>, vector<16x256xbf16>,
    %c0_306 = arith.constant 0 : index
    %c129_307 = arith.constant 129 : index
    %354 = vector.load %arg15[%c0_306, %c129_307] : memref<16x512xf32, #tpu.memory_space<vmem>>, vector<16x256xf32>
    %c1_308 = arith.constant 1 : index
    %c0_309 = arith.constant 0 : index
    %355 = vector.load %arg13[%c1_308, %c0_309] : memref<2x256xf32, #tpu.memory_space<vmem>>, vector<1x256xf32>
    %356 = vector.broadcast %355 : vector<1x256xf32> to vector<16x256xf32>
    %357 = arith.mulf %354, %356 : vector<16x256xf32>
    %358 = arith.truncf %357 : vector<16x256xf32> to vector<16x256xbf16>
    %c944 = arith.constant 944 : index
    %c0_310 = arith.constant 0 : index
    %359 = vector.load %arg16[%c944, %c0_310] : memref<1296x256xbf16, #tpu.memory_space<vmem>>, vector<16x256xbf16>
    tpu.vector_store %arg16[%c944, %c0_310], %358 {strides = array<i32>} : memref<1296x256xbf16, #tpu.memory_space<vmem>>, vector<16x256xbf16>,
    %c0_311 = arith.constant 0 : index
    %c143_312 = arith.constant 143 : index
    %360 = vector.load %arg15[%c0_311, %c143_312] : memref<16x512xf32, #tpu.memory_space<vmem>>, vector<16x256xf32>
    %c0_313 = arith.constant 0 : index
    %c0_314 = arith.constant 0 : index
    %361 = vector.load %arg13[%c0_313, %c0_314] : memref<2x256xf32, #tpu.memory_space<vmem>>, vector<1x256xf32>
    %362 = vector.broadcast %361 : vector<1x256xf32> to vector<16x256xf32>
    %363 = arith.mulf %360, %362 : vector<16x256xf32>
    %364 = arith.truncf %363 : vector<16x256xf32> to vector<16x256xbf16>
    %c960 = arith.constant 960 : index
    %c0_315 = arith.constant 0 : index
    %365 = vector.load %arg16[%c960, %c0_315] : memref<1296x256xbf16, #tpu.memory_space<vmem>>, vector<16x256xbf16>
    tpu.vector_store %arg16[%c960, %c0_315], %364 {strides = array<i32>} : memref<1296x256xbf16, #tpu.memory_space<vmem>>, vector<16x256xbf16>,
    %c0_316 = arith.constant 0 : index
    %c144_317 = arith.constant 144 : index
    %366 = vector.load %arg15[%c0_316, %c144_317] : memref<16x512xf32, #tpu.memory_space<vmem>>, vector<16x256xf32>
    %367 = arith.truncf %366 : vector<16x256xf32> to vector<16x256xbf16>
    %c976 = arith.constant 976 : index
    %c0_318 = arith.constant 0 : index
    %368 = vector.load %arg16[%c976, %c0_318] : memref<1296x256xbf16, #tpu.memory_space<vmem>>, vector<16x256xbf16>
    tpu.vector_store %arg16[%c976, %c0_318], %367 {strides = array<i32>} : memref<1296x256xbf16, #tpu.memory_space<vmem>>, vector<16x256xbf16>,
    %c0_319 = arith.constant 0 : index
    %c145_320 = arith.constant 145 : index
    %369 = vector.load %arg15[%c0_319, %c145_320] : memref<16x512xf32, #tpu.memory_space<vmem>>, vector<16x256xf32>
    %c1_321 = arith.constant 1 : index
    %c0_322 = arith.constant 0 : index
    %370 = vector.load %arg13[%c1_321, %c0_322] : memref<2x256xf32, #tpu.memory_space<vmem>>, vector<1x256xf32>
    %371 = vector.broadcast %370 : vector<1x256xf32> to vector<16x256xf32>
    %372 = arith.mulf %369, %371 : vector<16x256xf32>
    %373 = arith.truncf %372 : vector<16x256xf32> to vector<16x256xbf16>
    %c992 = arith.constant 992 : index
    %c0_323 = arith.constant 0 : index
    %374 = vector.load %arg16[%c992, %c0_323] : memref<1296x256xbf16, #tpu.memory_space<vmem>>, vector<16x256xbf16>
    tpu.vector_store %arg16[%c992, %c0_323], %373 {strides = array<i32>} : memref<1296x256xbf16, #tpu.memory_space<vmem>>, vector<16x256xbf16>,
    %c0_324 = arith.constant 0 : index
    %c0_325 = arith.constant 0 : index
    %375 = vector.load %arg16[%c0_324, %c0_325] : memref<1296x256xbf16, #tpu.memory_space<vmem>>, vector<1008x256xbf16>
    %c0_326 = arith.constant 0 : index
    %c0_327 = arith.constant 0 : index
    %376 = vector.load %arg8[%c0_326, %c0_327] : memref<16x1008xbf16, #tpu.memory_space<vmem>>, vector<16x1008xbf16>
    %cst_328 = arith.constant dense<0.000000e+00> : vector<16x256xf32>
    %377 = tpu.matmul %376, %375, %cst_328 {dimension_numbers = #tpu.dot_dimension_numbers<[1], [0], [0], [1], [0, 0, 1, 1], [], []>} : vector<16x1008xbf16>, vector<1008x256xbf16>, vector<16x256xf32> -> vector<16x256xf32>
    %c6 = arith.constant 6 : index
    %c0_329 = arith.constant 0 : index
    %c0_330 = arith.constant 0 : index
    %378 = vector.load %arg10[%c6, %c0_329, %c0_330] : memref<8x16x1xf32, #tpu.memory_space<vmem>>, vector<1x16x1xf32>
    %379 = vector.shape_cast %378 : vector<1x16x1xf32> to vector<16x1xf32>
    %380 = vector.broadcast %379 : vector<16x1xf32> to vector<16x256xf32>
    %381 = arith.addf %377, %380 : vector<16x256xf32>
    %cst_331 = arith.constant 0.000000e+00 : f32
    %382 = vector.broadcast %cst_331 : f32 to vector<16x256xf32>
    %383 = arith.maximumf %381, %382 : vector<16x256xf32>
    %384 = arith.truncf %383 : vector<16x256xf32> to vector<16x256xbf16>
    %c1072 = arith.constant 1072 : index
    %c0_332 = arith.constant 0 : index
    %385 = vector.load %arg16[%c1072, %c0_332] : memref<1296x256xbf16, #tpu.memory_space<vmem>>, vector<16x256xbf16>
    tpu.vector_store %arg16[%c1072, %c0_332], %384 {strides = array<i32>} : memref<1296x256xbf16, #tpu.memory_space<vmem>>, vector<16x256xbf16>,
    %c0_333 = arith.constant 0 : index
    %c128_334 = arith.constant 128 : index
    %386 = vector.load %arg15[%c0_333, %c128_334] : memref<16x512xf32, #tpu.memory_space<vmem>>, vector<16x256xf32>
    tpu.vector_store %arg15[%c0_333, %c128_334], %383 {strides = array<i32>} : memref<16x512xf32, #tpu.memory_space<vmem>>, vector<16x256xf32>,
    %c0_335 = arith.constant 0 : index
    %c111_336 = arith.constant 111 : index
    %387 = vector.load %arg15[%c0_335, %c111_336] : memref<16x512xf32, #tpu.memory_space<vmem>>, vector<16x256xf32>
    %c0_337 = arith.constant 0 : index
    %c0_338 = arith.constant 0 : index
    %388 = vector.load %arg13[%c0_337, %c0_338] : memref<2x256xf32, #tpu.memory_space<vmem>>, vector<1x256xf32>
    %389 = vector.broadcast %388 : vector<1x256xf32> to vector<16x256xf32>
    %390 = arith.mulf %387, %389 : vector<16x256xf32>
    %391 = arith.truncf %390 : vector<16x256xf32> to vector<16x256xbf16>
    %c1008 = arith.constant 1008 : index
    %c0_339 = arith.constant 0 : index
    %392 = vector.load %arg16[%c1008, %c0_339] : memref<1296x256xbf16, #tpu.memory_space<vmem>>, vector<16x256xbf16>
    tpu.vector_store %arg16[%c1008, %c0_339], %391 {strides = array<i32>} : memref<1296x256xbf16, #tpu.memory_space<vmem>>, vector<16x256xbf16>,
    %c0_340 = arith.constant 0 : index
    %c112_341 = arith.constant 112 : index
    %393 = vector.load %arg15[%c0_340, %c112_341] : memref<16x512xf32, #tpu.memory_space<vmem>>, vector<16x256xf32>
    %394 = arith.truncf %393 : vector<16x256xf32> to vector<16x256xbf16>
    %c1024 = arith.constant 1024 : index
    %c0_342 = arith.constant 0 : index
    %395 = vector.load %arg16[%c1024, %c0_342] : memref<1296x256xbf16, #tpu.memory_space<vmem>>, vector<16x256xbf16>
    tpu.vector_store %arg16[%c1024, %c0_342], %394 {strides = array<i32>} : memref<1296x256xbf16, #tpu.memory_space<vmem>>, vector<16x256xbf16>,
    %c0_343 = arith.constant 0 : index
    %c113_344 = arith.constant 113 : index
    %396 = vector.load %arg15[%c0_343, %c113_344] : memref<16x512xf32, #tpu.memory_space<vmem>>, vector<16x256xf32>
    %c1_345 = arith.constant 1 : index
    %c0_346 = arith.constant 0 : index
    %397 = vector.load %arg13[%c1_345, %c0_346] : memref<2x256xf32, #tpu.memory_space<vmem>>, vector<1x256xf32>
    %398 = vector.broadcast %397 : vector<1x256xf32> to vector<16x256xf32>
    %399 = arith.mulf %396, %398 : vector<16x256xf32>
    %400 = arith.truncf %399 : vector<16x256xf32> to vector<16x256xbf16>
    %c1040 = arith.constant 1040 : index
    %c0_347 = arith.constant 0 : index
    %401 = vector.load %arg16[%c1040, %c0_347] : memref<1296x256xbf16, #tpu.memory_space<vmem>>, vector<16x256xbf16>
    tpu.vector_store %arg16[%c1040, %c0_347], %400 {strides = array<i32>} : memref<1296x256xbf16, #tpu.memory_space<vmem>>, vector<16x256xbf16>,
    %c0_348 = arith.constant 0 : index
    %c127_349 = arith.constant 127 : index
    %402 = vector.load %arg15[%c0_348, %c127_349] : memref<16x512xf32, #tpu.memory_space<vmem>>, vector<16x256xf32>
    %c0_350 = arith.constant 0 : index
    %c0_351 = arith.constant 0 : index
    %403 = vector.load %arg13[%c0_350, %c0_351] : memref<2x256xf32, #tpu.memory_space<vmem>>, vector<1x256xf32>
    %404 = vector.broadcast %403 : vector<1x256xf32> to vector<16x256xf32>
    %405 = arith.mulf %402, %404 : vector<16x256xf32>
    %406 = arith.truncf %405 : vector<16x256xf32> to vector<16x256xbf16>
    %c1056 = arith.constant 1056 : index
    %c0_352 = arith.constant 0 : index
    %407 = vector.load %arg16[%c1056, %c0_352] : memref<1296x256xbf16, #tpu.memory_space<vmem>>, vector<16x256xbf16>
    tpu.vector_store %arg16[%c1056, %c0_352], %406 {strides = array<i32>} : memref<1296x256xbf16, #tpu.memory_space<vmem>>, vector<16x256xbf16>,
    %c0_353 = arith.constant 0 : index
    %c129_354 = arith.constant 129 : index
    %408 = vector.load %arg15[%c0_353, %c129_354] : memref<16x512xf32, #tpu.memory_space<vmem>>, vector<16x256xf32>
    %c1_355 = arith.constant 1 : index
    %c0_356 = arith.constant 0 : index
    %409 = vector.load %arg13[%c1_355, %c0_356] : memref<2x256xf32, #tpu.memory_space<vmem>>, vector<1x256xf32>
    %410 = vector.broadcast %409 : vector<1x256xf32> to vector<16x256xf32>
    %411 = arith.mulf %408, %410 : vector<16x256xf32>
    %412 = arith.truncf %411 : vector<16x256xf32> to vector<16x256xbf16>
    %c1088 = arith.constant 1088 : index
    %c0_357 = arith.constant 0 : index
    %413 = vector.load %arg16[%c1088, %c0_357] : memref<1296x256xbf16, #tpu.memory_space<vmem>>, vector<16x256xbf16>
    tpu.vector_store %arg16[%c1088, %c0_357], %412 {strides = array<i32>} : memref<1296x256xbf16, #tpu.memory_space<vmem>>, vector<16x256xbf16>,
    %c0_358 = arith.constant 0 : index
    %c143_359 = arith.constant 143 : index
    %414 = vector.load %arg15[%c0_358, %c143_359] : memref<16x512xf32, #tpu.memory_space<vmem>>, vector<16x256xf32>
    %c0_360 = arith.constant 0 : index
    %c0_361 = arith.constant 0 : index
    %415 = vector.load %arg13[%c0_360, %c0_361] : memref<2x256xf32, #tpu.memory_space<vmem>>, vector<1x256xf32>
    %416 = vector.broadcast %415 : vector<1x256xf32> to vector<16x256xf32>
    %417 = arith.mulf %414, %416 : vector<16x256xf32>
    %418 = arith.truncf %417 : vector<16x256xf32> to vector<16x256xbf16>
    %c1104 = arith.constant 1104 : index
    %c0_362 = arith.constant 0 : index
    %419 = vector.load %arg16[%c1104, %c0_362] : memref<1296x256xbf16, #tpu.memory_space<vmem>>, vector<16x256xbf16>
    tpu.vector_store %arg16[%c1104, %c0_362], %418 {strides = array<i32>} : memref<1296x256xbf16, #tpu.memory_space<vmem>>, vector<16x256xbf16>,
    %c0_363 = arith.constant 0 : index
    %c144_364 = arith.constant 144 : index
    %420 = vector.load %arg15[%c0_363, %c144_364] : memref<16x512xf32, #tpu.memory_space<vmem>>, vector<16x256xf32>
    %421 = arith.truncf %420 : vector<16x256xf32> to vector<16x256xbf16>
    %c1120 = arith.constant 1120 : index
    %c0_365 = arith.constant 0 : index
    %422 = vector.load %arg16[%c1120, %c0_365] : memref<1296x256xbf16, #tpu.memory_space<vmem>>, vector<16x256xbf16>
    tpu.vector_store %arg16[%c1120, %c0_365], %421 {strides = array<i32>} : memref<1296x256xbf16, #tpu.memory_space<vmem>>, vector<16x256xbf16>,
    %c0_366 = arith.constant 0 : index
    %c145_367 = arith.constant 145 : index
    %423 = vector.load %arg15[%c0_366, %c145_367] : memref<16x512xf32, #tpu.memory_space<vmem>>, vector<16x256xf32>
    %c1_368 = arith.constant 1 : index
    %c0_369 = arith.constant 0 : index
    %424 = vector.load %arg13[%c1_368, %c0_369] : memref<2x256xf32, #tpu.memory_space<vmem>>, vector<1x256xf32>
    %425 = vector.broadcast %424 : vector<1x256xf32> to vector<16x256xf32>
    %426 = arith.mulf %423, %425 : vector<16x256xf32>
    %427 = arith.truncf %426 : vector<16x256xf32> to vector<16x256xbf16>
    %c1136 = arith.constant 1136 : index
    %c0_370 = arith.constant 0 : index
    %428 = vector.load %arg16[%c1136, %c0_370] : memref<1296x256xbf16, #tpu.memory_space<vmem>>, vector<16x256xbf16>
    tpu.vector_store %arg16[%c1136, %c0_370], %427 {strides = array<i32>} : memref<1296x256xbf16, #tpu.memory_space<vmem>>, vector<16x256xbf16>,
    %c0_371 = arith.constant 0 : index
    %c0_372 = arith.constant 0 : index
    %429 = vector.load %arg16[%c0_371, %c0_372] : memref<1296x256xbf16, #tpu.memory_space<vmem>>, vector<1152x256xbf16>
    %c0_373 = arith.constant 0 : index
    %c0_374 = arith.constant 0 : index
    %430 = vector.load %arg9[%c0_373, %c0_374] : memref<16x1152xbf16, #tpu.memory_space<vmem>>, vector<16x1152xbf16>
    %cst_375 = arith.constant dense<0.000000e+00> : vector<16x256xf32>
    %431 = tpu.matmul %430, %429, %cst_375 {dimension_numbers = #tpu.dot_dimension_numbers<[1], [0], [0], [1], [0, 0, 1, 1], [], []>} : vector<16x1152xbf16>, vector<1152x256xbf16>, vector<16x256xf32> -> vector<16x256xf32>
    %c7 = arith.constant 7 : index
    %c0_376 = arith.constant 0 : index
    %c0_377 = arith.constant 0 : index
    %432 = vector.load %arg10[%c7, %c0_376, %c0_377] : memref<8x16x1xf32, #tpu.memory_space<vmem>>, vector<1x16x1xf32>
    %433 = vector.shape_cast %432 : vector<1x16x1xf32> to vector<16x1xf32>
    %434 = vector.broadcast %433 : vector<16x1xf32> to vector<16x256xf32>
    %435 = arith.addf %431, %434 : vector<16x256xf32>
    %cst_378 = arith.constant 0.000000e+00 : f32
    %436 = vector.broadcast %cst_378 : f32 to vector<16x256xf32>
    %437 = arith.maximumf %435, %436 : vector<16x256xf32>
    %438 = arith.truncf %437 : vector<16x256xf32> to vector<16x256xbf16>
    %c1216 = arith.constant 1216 : index
    %c0_379 = arith.constant 0 : index
    %439 = vector.load %arg16[%c1216, %c0_379] : memref<1296x256xbf16, #tpu.memory_space<vmem>>, vector<16x256xbf16>
    tpu.vector_store %arg16[%c1216, %c0_379], %438 {strides = array<i32>} : memref<1296x256xbf16, #tpu.memory_space<vmem>>, vector<16x256xbf16>,
    %c64_380 = arith.constant 64 : index
    %c0_381 = arith.constant 0 : index
    %440 = vector.load %arg16[%c64_380, %c0_381] : memref<1296x256xbf16, #tpu.memory_space<vmem>>, vector<16x256xbf16>
    %c208_382 = arith.constant 208 : index
    %c0_383 = arith.constant 0 : index
    %441 = vector.load %arg16[%c208_382, %c0_383] : memref<1296x256xbf16, #tpu.memory_space<vmem>>, vector<16x256xbf16>
    %c352_384 = arith.constant 352 : index
    %c0_385 = arith.constant 0 : index
    %442 = vector.load %arg16[%c352_384, %c0_385] : memref<1296x256xbf16, #tpu.memory_space<vmem>>, vector<16x256xbf16>
    %c496_386 = arith.constant 496 : index
    %c0_387 = arith.constant 0 : index
    %443 = vector.load %arg16[%c496_386, %c0_387] : memref<1296x256xbf16, #tpu.memory_space<vmem>>, vector<16x256xbf16>
    %c640_388 = arith.constant 640 : index
    %c0_389 = arith.constant 0 : index
    %444 = vector.load %arg16[%c640_388, %c0_389] : memref<1296x256xbf16, #tpu.memory_space<vmem>>, vector<16x256xbf16>
    %c784_390 = arith.constant 784 : index
    %c0_391 = arith.constant 0 : index
    %445 = vector.load %arg16[%c784_390, %c0_391] : memref<1296x256xbf16, #tpu.memory_space<vmem>>, vector<16x256xbf16>
    %c928_392 = arith.constant 928 : index
    %c0_393 = arith.constant 0 : index
    %446 = vector.load %arg16[%c928_392, %c0_393] : memref<1296x256xbf16, #tpu.memory_space<vmem>>, vector<16x256xbf16>
    %c1072_394 = arith.constant 1072 : index
    %c0_395 = arith.constant 0 : index
    %447 = vector.load %arg16[%c1072_394, %c0_395] : memref<1296x256xbf16, #tpu.memory_space<vmem>>, vector<16x256xbf16>
    %c1216_396 = arith.constant 1216 : index
    %c0_397 = arith.constant 0 : index
    %448 = vector.load %arg16[%c1216_396, %c0_397] : memref<1296x256xbf16, #tpu.memory_space<vmem>>, vector<16x256xbf16>
    %449 = tpu.concatenate %440, %441, %442, %443, %444, %445, %446, %447, %448 in 0 : vector<16x256xbf16>, vector<16x256xbf16>, vector<16x256xbf16>, vector<16x256xbf16>, vector<16x256xbf16>, vector<16x256xbf16>, vector<16x256xbf16>, vector<16x256xbf16>, vector<16x256xbf16> -> vector<144x256xbf16>
    %c0_398 = arith.constant 0 : index
    %c0_399 = arith.constant 0 : index
    %450 = vector.load %arg11[%c0_398, %c0_399] : memref<16x144xbf16, #tpu.memory_space<vmem>>, vector<16x144xbf16>
    %cst_400 = arith.constant dense<0.000000e+00> : vector<16x256xf32>
    %451 = tpu.matmul %450, %449, %cst_400 {dimension_numbers = #tpu.dot_dimension_numbers<[1], [0], [0], [1], [0, 0, 1, 1], [], []>} : vector<16x144xbf16>, vector<144x256xbf16>, vector<16x256xf32> -> vector<16x256xf32>
    %c0_401 = arith.constant 0 : index
    %c0_402 = arith.constant 0 : index
    %452 = vector.load %arg12[%c0_401, %c0_402] : memref<16x1xf32, #tpu.memory_space<vmem>>, vector<16x1xf32>
    %453 = vector.broadcast %452 : vector<16x1xf32> to vector<16x256xf32>
    %454 = arith.addf %451, %453 : vector<16x256xf32>
    %cst_403 = arith.constant 2.000000e-01 : f32
    %455 = vector.broadcast %cst_403 : f32 to vector<16x256xf32>
    %456 = arith.mulf %454, %455 : vector<16x256xf32>
    %457 = arith.addf %456, %5 : vector<16x256xf32>
    %458 = vector.shape_cast %457 : vector<16x256xf32> to vector<1x16x256xf32>
    %c0_404 = arith.constant 0 : index
    %c0_405 = arith.constant 0 : index
    %c0_406 = arith.constant 0 : index
    %459 = vector.load %arg14[%c0_404, %c0_405, %c0_406] : memref<1x16x256xf32, #tpu.memory_space<vmem>>, vector<1x16x256xf32>
    tpu.vector_store %arg14[%c0_404, %c0_405, %c0_406], %458 {strides = array<i32>} : memref<1x16x256xf32, #tpu.memory_space<vmem>>, vector<1x16x256xf32>,
    return
  }
  func.func @transform_0(%arg0: i32) -> (i32, i32, i32) {
    %c0_i32 = arith.constant 0 : i32
    %c0_i32_0 = arith.constant 0 : i32
    %c0_i32_1 = arith.constant 0 : i32
    return %arg0, %c0_i32, %c0_i32_0 : i32, i32, i32
  }
  func.func @transform_1(%arg0: i32) -> (i32, i32) {
    %c0_i32 = arith.constant 0 : i32
    %c0_i32_0 = arith.constant 0 : i32
    %c0_i32_1 = arith.constant 0 : i32
    return %c0_i32, %c0_i32_0 : i32, i32
  }
  func.func @transform_2(%arg0: i32) -> (i32, i32) {
    %c0_i32 = arith.constant 0 : i32
    %c0_i32_0 = arith.constant 0 : i32
    %c0_i32_1 = arith.constant 0 : i32
    return %c0_i32, %c0_i32_0 : i32, i32
  }
  func.func @transform_3(%arg0: i32) -> (i32, i32) {
    %c0_i32 = arith.constant 0 : i32
    %c0_i32_0 = arith.constant 0 : i32
    %c0_i32_1 = arith.constant 0 : i32
    return %c0_i32, %c0_i32_0 : i32, i32
  }
  func.func @transform_4(%arg0: i32) -> (i32, i32) {
    %c0_i32 = arith.constant 0 : i32
    %c0_i32_0 = arith.constant 0 : i32
    %c0_i32_1 = arith.constant 0 : i32
    return %c0_i32, %c0_i32_0 : i32, i32
  }
  func.func @transform_5(%arg0: i32) -> (i32, i32) {
    %c0_i32 = arith.constant 0 : i32
    %c0_i32_0 = arith.constant 0 : i32
    %c0_i32_1 = arith.constant 0 : i32
    return %c0_i32, %c0_i32_0 : i32, i32
  }
  func.func @transform_6(%arg0: i32) -> (i32, i32) {
    %c0_i32 = arith.constant 0 : i32
    %c0_i32_0 = arith.constant 0 : i32
    %c0_i32_1 = arith.constant 0 : i32
    return %c0_i32, %c0_i32_0 : i32, i32
  }
  func.func @transform_7(%arg0: i32) -> (i32, i32) {
    %c0_i32 = arith.constant 0 : i32
    %c0_i32_0 = arith.constant 0 : i32
    %c0_i32_1 = arith.constant 0 : i32
    return %c0_i32, %c0_i32_0 : i32, i32
  }
  func.func @transform_8(%arg0: i32) -> (i32, i32) {
    %c0_i32 = arith.constant 0 : i32
    %c0_i32_0 = arith.constant 0 : i32
    %c0_i32_1 = arith.constant 0 : i32
    return %c0_i32, %c0_i32_0 : i32, i32
  }
  func.func @transform_9(%arg0: i32) -> (i32, i32, i32) {
    %c0_i32 = arith.constant 0 : i32
    %c0_i32_0 = arith.constant 0 : i32
    %c0_i32_1 = arith.constant 0 : i32
    %c0_i32_2 = arith.constant 0 : i32
    return %c0_i32, %c0_i32_0, %c0_i32_1 : i32, i32, i32
  }
  func.func @transform_10(%arg0: i32) -> (i32, i32) {
    %c0_i32 = arith.constant 0 : i32
    %c0_i32_0 = arith.constant 0 : i32
    %c0_i32_1 = arith.constant 0 : i32
    return %c0_i32, %c0_i32_0 : i32, i32
  }
  func.func @transform_11(%arg0: i32) -> (i32, i32) {
    %c0_i32 = arith.constant 0 : i32
    %c0_i32_0 = arith.constant 0 : i32
    %c0_i32_1 = arith.constant 0 : i32
    return %c0_i32, %c0_i32_0 : i32, i32
  }
  func.func @transform_12(%arg0: i32) -> (i32, i32) {
    %c0_i32 = arith.constant 0 : i32
    %c0_i32_0 = arith.constant 0 : i32
    %c0_i32_1 = arith.constant 0 : i32
    return %c0_i32, %c0_i32_0 : i32, i32
  }
  func.func @transform_13(%arg0: i32) -> (i32, i32, i32) {
    %c0_i32 = arith.constant 0 : i32
    %c0_i32_0 = arith.constant 0 : i32
    %c0_i32_1 = arith.constant 0 : i32
    return %arg0, %c0_i32, %c0_i32_0 : i32, i32, i32
  }
}

</mosaic_0001>

<bundles_post_ra>
// kernel: tpu_custom_call.1
= control target key start
LH: loop header
LB: loop body
LE: loop exit
PB: predicated region body
PF: predicated region fallthrough
CT: control target
= control target key end

     0   :  { %s8623_s0 = inlined_call_operand.vmem [shape: f32[2,16,256], index: 0, kind: input, shape index: {}]   ;;  %s8624_s1 = inlined_call_operand.hbm [shape: bf16[16,144], index: 1, kind: input, shape index: {}]   ;;  %s8625_s2 = inlined_call_operand.vmem [shape: bf16[16,288], index: 2, kind: input, shape index: {}]   ;;  %s8626_s3 = inlined_call_operand.hbm [shape: bf16[16,432], index: 3, kind: input, shape index: {}]   ;;  %s8627_s4 = inlined_call_operand.hbm [shape: bf16[16,576], index: 4, kind: input, shape index: {}]   ;;  %s8628_s5 = inlined_call_operand.hbm [shape: bf16[16,720], index: 5, kind: input, shape index: {}]   ;;  %s8629_s6 = inlined_call_operand.hbm [shape: bf16[16,864], index: 6, kind: input, shape index: {}]   ;;  %s8630_s7 = inlined_call_operand.hbm [shape: bf16[16,1008], index: 7, kind: input, shape index: {}]   ;;  %s8631_s8 = inlined_call_operand.vmem [shape: bf16[16,1152], index: 8, kind: input, shape index: {}]   ;;  %s8632_s9 = inlined_call_operand.vmem [shape: f32[8,16,1], index: 9, kind: input, shape index: {}]   ;;  %s8633_s10 = inlined_call_operand.vmem [shape: bf16[16,144], index: 10, kind: input, shape index: {}]   ;;  %s8634_s11 = inlined_call_operand.vmem [shape: f32[16,1], index: 11, kind: input, shape index: {}]   ;;  %s8635_s12 = inlined_call_operand.vmem [shape: f32[2,256], index: 12, kind: input, shape index: {}]   ;;  %s8636_s13 = inlined_call_operand.hbm [shape: f32[2,16,256], index: 13, kind: output, shape index: {}]  }
   0x1   :  { %8786 = sst [smem:[#allocation103_spill]] %s8626_s3 }
   0x2   :  { %8787 = sst [smem:[#allocation104_spill]] %s8636_s13 }
   0x3   :  { %18 = vsyncpa [#allocation5], 0 }
   0x4   :  { %19 = vsyncpa [#allocation8], 0 }
   0x5   :  { %20 = vsyncpa [#allocation11], 0 }
   0x6   :  { %21 = vsyncpa [#allocation14], 0 }
   0x7   :  { %22 = vsyncpa [#allocation6], 0 }
   0x8   :  { %24 = vsyncpa [#allocation6 + $0x1], 0  ;;  %s6392_s25 = smov 0   ;;  %s6394_s26 = smov 0  }
   0x9   :  { %s6396_s27 = smov 0   ;;  %s6398_s28 = smov 0  }
   0xa LB: > { %8788 = sst [smem:[#allocation21_spill]] %s6278_s25  ;;  %s6413_s29 = sadd.s32 4294967295, %s6290_s28   ;;  %s6290_s28 = sphi %s6398_s28, %s9083_s28   ;;  %s6286_s27 = sphi %s6396_s27, %s9085_s27   ;;  %s6282_s26 = sphi %s6394_s26, %s9087_s26   ;;  %s6278_s25 = sphi %s6392_s25, %s9086_s25  }
   0xb   : > { %8789 = sst [smem:[#allocation22_spill]] %s6286_s27  ;;  %s5650_s30 = sadd.s32 4294967294, %s6290_s28  }
   0xc   : > { %8790 = sst [smem:[#allocation23_spill]] %s6290_s28  ;;  %s6417_s14 = sadd.s32 1, %s6290_s28  }
   0xd   : > { %8791 = sst [smem:[#allocation24_spill]] %s6417_s14  ;;  %s315_s15 = sadd.s32 1, %s6286_s27 }
   0xe   : > { %s312_s16 = ssub.s32 %s6290_s28, %s6417_s14  ;;  %p325_p0 = scmp.ne.s32.totalorder %s6286_s27, %s6282_s26 }
   0xf   : > { %p313_p1 = scmp.eq.s32.totalorder %s312_s16, 0  ;;  %p326_p2 = scmp.eq.s32.totalorder %s6413_s29, 1 }
  0x10   : > { %p331_p3 = scmp.ne.s32.totalorder %s6282_s26, %s6278_s25  ;;  %p332_p4 = scmp.eq.s32.totalorder %s5650_s30, 1 }
  0x11   : > { %s6428_s17 = scalar_select %p313_p1, %s6286_s27, %s315_s15  }
  0x12   : > { %p6430_p5 = por %p326_p2, %p325_p0  ;;  %p6434_p6 = por %p332_p4, %p331_p3 }
  0x13   : > { %8792 = sst [smem:[#allocation25_spill]] %s6428_s17  ;;  %p5651_p7 = scmp.ge.s32.totalorder %s6290_s28, 1 }
  0x14   : > { %s8793_s18 = scalar_select %p6430_p5, 1, 0 }
  0x15   : > { %s8795_s19 = scalar_select %p6434_p6, 1, 0 }
  0x16   : > { %8794 = sst [smem:[#allocation26_spill]] %s8793_s18  ;;  %p339_p8 = scmp.lt.s32.totalorder %s6290_s28, 3 }
  0x17   : > { %8796 = sst [smem:[#allocation27_spill]] %s8795_s19  ;;  %p8641_p9 = scmp.eq.s32.totalorder %s6413_s29, 0 }
  0x18   : > { %p6441_p10 = pnand %p5651_p7, %p339_p8  ;;  %s6292_s21 = smov [#allocation7]  }
  0x19   : > { %s367_s22 = sshll.u32 %s6292_s21, 4  ;;  %s6293_s24 = smov [#allocation10]   ;;  %s368_s22 = int_to_ptr.vmem [resolvable:$true] %s367_s22 }
  0x1a   : > { %s8797_s20 = scalar_select %p6441_p10, 1, 0 }
  0x1b   : > { %p5886_p11 = pneg %p6441_p10  ;;  %s393_s30 = sshll.u32 %s6293_s24, 4  ;;  %s6453_s30 = int_to_ptr.vmem [resolvable:$true] %s393_s30 }
  0x1c   : > { %s8799_s3 = sld [smem:[#allocation103_spill]] }
  0x1d   : > { %p6449_p12 = pnand %p8641_p9, %p5886_p11 }
  0x1f   : > { %p6463_p0 = pneg %p6449_p12 }
  0x22   : > { %s6044_s17 = scalar_lea.hbm %s8799_s3, 512 }
  0x23   : > { %p6045_p13 = scmp.ne.s32.totalorder %s8799_s3, %s6044_s17  ;;  %p6051_p3 = scmp.lt.u32.totalorder %s6044_s17, %s8799_s3 }
  0x25   : > { %p6047_p1 = pnand %p6463_p0, %p6045_p13 }
  0x27   : > { %p6048_p2 = pneg %p6047_p1 }
  0x29   : > { %p6053_p4 = pnand %p6051_p3, %p6048_p2 }
  0x2b   : > { %6056 = shalt.err (!%p6053_p4)
}
  0x2c   : > { %s6057_s15 = scalar_lea.vmem %s368_s22, 512  ;;  %p6065_p9 = scmp.lt.s32.totalorder %s368_s22, %s368_s22 }
  0x2d   : > { %p6058_p7 = scmp.ne.s32.totalorder %s368_s22, %s6057_s15  ;;  %p6066_p6 = scmp.lt.s32.totalorder %s6057_s15, %s6057_s15 }
  0x2f   : > { %p6060_p8 = pnand %p6058_p7, %p6463_p0  ;;  %p6067_p5 = por %p6066_p6, %p6065_p9 }
  0x31   : > { %p6061_p11 = pneg %p6060_p8 }
  0x33   : > { %p6068_p10 = pnand %p6067_p5, %p6061_p11 }
  0x35   : > { %6071 = shalt.err (!%p6068_p10)
}
  0x36   : > { %s6294_s27 = smov 256   ;;  %s6295_s14 = smov 16  }
  0x37   : > { %5892 = dma.hbm_to_vmem [thread:$0]  (!%p6449_p12), %s8799_s3, 512, %s368_s22, [#allocation8], %s6294_s27, %s6294_s27, %s6295_s14  }
  0x38   : > { %s6072_s25 = scalar_lea.hbm %s8628_s5, 768 }
  0x39   : > { %p6073_p13 = scmp.ne.s32.totalorder %s8628_s5, %s6072_s25  ;;  %p6079_p9 = scmp.lt.u32.totalorder %s6072_s25, %s8628_s5 }
  0x3b   : > { %p6075_p5 = pnand %p6073_p13, %p6463_p0 }
  0x3d   : > { %p6076_p6 = pneg %p6075_p5 }
  0x3f   : > { %p6081_p10 = pnand %p6079_p9, %p6076_p6 }
  0x41   : > { %6084 = shalt.err (!%p6081_p10)
}
  0x42   : > { %s6085_s22 = scalar_lea.vmem %s6453_s30, 768  ;;  %p6093_p4 = scmp.lt.s32.totalorder %s6453_s30, %s6453_s30 }
  0x43   : > { %p6086_p1 = scmp.ne.s32.totalorder %s6453_s30, %s6085_s22  ;;  %p6094_p7 = scmp.lt.s32.totalorder %s6085_s22, %s6085_s22 }
  0x45   : > { %p6088_p2 = pnand %p6086_p1, %p6463_p0  ;;  %p6095_p8 = por %p6094_p7, %p6093_p4 }
  0x47   : > { %p6089_p3 = pneg %p6088_p2 }
  0x49   : > { %p6096_p11 = pnand %p6095_p8, %p6089_p3 }
  0x4b   : > { %6099 = shalt.err (!%p6096_p11)
}
  0x4c   : > { %s6296_s13 = smov 384   ;;  %s6297_s25 = smov 24  }
  0x4d   : > { %5898 = dma.hbm_to_vmem [thread:$0]  (!%p6449_p12), %s8628_s5, 768, %s6453_s30, [#allocation11], %s6296_s13, %s6296_s13, %s6297_s25  }
  0x4e   : > { %s6298_s27 = smov [#allocation4]   ;;  %s6100_s16 = scalar_lea.hbm %s8624_s1, 256 }
  0x4f   : > { %s351_s14 = sshll.u32 %s6298_s27, 4  ;;  %p6101_p13 = scmp.ne.s32.totalorder %s8624_s1, %s6100_s16  ;;  %s352_s14 = int_to_ptr.vmem [resolvable:$true] %s351_s14 }
  0x50   : > { %p6107_p9 = scmp.lt.u32.totalorder %s6100_s16, %s8624_s1 }
  0x51   : > { %p6103_p5 = pnand %p6101_p13, %p6463_p0 }
  0x53   : > { %p6104_p6 = pneg %p6103_p5 }
  0x55   : > { %p6109_p10 = pnand %p6107_p9, %p6104_p6 }
  0x57   : > { %6112 = shalt.err (!%p6109_p10)
}
  0x58   : > { %s6113_s30 = scalar_lea.vmem %s352_s14, 256  ;;  %p6121_p4 = scmp.lt.s32.totalorder %s352_s14, %s352_s14 }
  0x59   : > { %p6114_p1 = scmp.ne.s32.totalorder %s352_s14, %s6113_s30  ;;  %p6122_p7 = scmp.lt.s32.totalorder %s6113_s30, %s6113_s30 }
  0x5b   : > { %p6116_p2 = pnand %p6114_p1, %p6463_p0  ;;  %p6123_p8 = por %p6122_p7, %p6121_p4 }
  0x5d   : > { %p6117_p3 = pneg %p6116_p2 }
  0x5f   : > { %p6124_p11 = pnand %p6123_p8, %p6117_p3 }
  0x61   : > { %6127 = shalt.err (!%p6124_p11)
}
  0x62   : > { %s6299_s13 = smov 128   ;;  %s6300_s25 = smov 8  }
  0x63   : > { %5889 = dma.hbm_to_vmem [thread:$0]  (!%p6449_p12), %s8624_s1, 256, %s352_s14, [#allocation5], %s6299_s13, %s6299_s13, %s6300_s25  }
  0x64   : > { %s6301_s18 = smov [#allocation9]   ;;  %s6128_s16 = scalar_lea.hbm %s8627_s4, 640 }
  0x65   : > { %s380_s27 = sshll.u32 %s6301_s18, 4  ;;  %p6129_p13 = scmp.ne.s32.totalorder %s8627_s4, %s6128_s16  ;;  %s381_s27 = int_to_ptr.vmem [resolvable:$true] %s380_s27 }
  0x66   : > { %p6135_p9 = scmp.lt.u32.totalorder %s6128_s16, %s8627_s4 }
  0x67   : > { %p6131_p5 = pnand %p6129_p13, %p6463_p0 }
  0x69   : > { %p6132_p6 = pneg %p6131_p5 }
  0x6b   : > { %p6137_p10 = pnand %p6135_p9, %p6132_p6 }
  0x6d   : > { %6140 = shalt.err (!%p6137_p10)
}
  0x6e   : > { %s6141_s14 = scalar_lea.vmem %s381_s27, 640  ;;  %p6149_p4 = scmp.lt.s32.totalorder %s381_s27, %s381_s27 }
  0x6f   : > { %p6142_p1 = scmp.ne.s32.totalorder %s381_s27, %s6141_s14  ;;  %p6150_p7 = scmp.lt.s32.totalorder %s6141_s14, %s6141_s14 }
  0x71   : > { %p6144_p2 = pnand %p6142_p1, %p6463_p0  ;;  %p6151_p8 = por %p6150_p7, %p6149_p4 }
  0x73   : > { %p6145_p3 = pneg %p6144_p2 }
  0x75   : > { %p6152_p11 = pnand %p6151_p8, %p6145_p3 }
  0x77   : > { %6155 = shalt.err (!%p6152_p11)
}
  0x78   : > { %s6302_s13 = smov 320   ;;  %s6303_s25 = smov 20  }
  0x79   : > { %5895 = dma.hbm_to_vmem [thread:$0]  (!%p6449_p12), %s8627_s4, 640, %s381_s27, [#allocation8], %s6302_s13, %s6302_s13, %s6303_s25  }
  0x7a   : > { %s6304_s18 = smov [#allocation12]   ;;  %s6156_s24 = scalar_lea.hbm %s8629_s6, 896 }
  0x7b   : > { %s406_s19 = sshll.u32 %s6304_s18, 4  ;;  %p6157_p13 = scmp.ne.s32.totalorder %s8629_s6, %s6156_s24  ;;  %s407_s19 = int_to_ptr.vmem [resolvable:$true] %s406_s19 }
  0x7c   : > { %p6163_p9 = scmp.lt.u32.totalorder %s6156_s24, %s8629_s6 }
  0x7d   : > { %p6159_p5 = pnand %p6157_p13, %p6463_p0 }
  0x7f   : > { %p6160_p6 = pneg %p6159_p5 }
  0x81   : > { %p6165_p10 = pnand %p6163_p9, %p6160_p6 }
  0x83   : > { %6168 = shalt.err (!%p6165_p10)
}
  0x84   : > { %s6169_s27 = scalar_lea.vmem %s407_s19, 896  ;;  %p6177_p4 = scmp.lt.s32.totalorder %s407_s19, %s407_s19 }
  0x85   : > { %p6170_p1 = scmp.ne.s32.totalorder %s407_s19, %s6169_s27  ;;  %p6178_p7 = scmp.lt.s32.totalorder %s6169_s27, %s6169_s27 }
  0x87   : > { %p6172_p2 = pnand %p6170_p1, %p6463_p0  ;;  %p6179_p8 = por %p6178_p7, %p6177_p4 }
  0x89   : > { %p6173_p3 = pneg %p6172_p2 }
  0x8b   : > { %p6180_p11 = pnand %p6179_p8, %p6173_p3 }
  0x8d   : > { %6183 = shalt.err (!%p6180_p11)
}
  0x8e   : > { %s6305_s13 = smov 448   ;;  %s6306_s25 = smov 28  }
  0x8f   : > { %5901 = dma.hbm_to_vmem [thread:$0]  (!%p6449_p12), %s8629_s6, 896, %s407_s19, [#allocation11], %s6305_s13, %s6305_s13, %s6306_s25  }
  0x90   : > { %s6307_s18 = smov [#allocation13]   ;;  %s6184_s15 = scalar_lea.hbm %s8630_s7, 1024 }
  0x91   : > { %s419_s17 = sshll.u32 %s6307_s18, 4  ;;  %p6185_p13 = scmp.ne.s32.totalorder %s8630_s7, %s6184_s15  ;;  %s420_s17 = int_to_ptr.vmem [resolvable:$true] %s419_s17 }
  0x92   : > { %p6191_p9 = scmp.lt.u32.totalorder %s6184_s15, %s8630_s7 }
  0x93   : > { %p6187_p5 = pnand %p6185_p13, %p6463_p0 }
  0x95   : > { %p6188_p6 = pneg %p6187_p5 }
  0x97   : > { %p6193_p10 = pnand %p6191_p9, %p6188_p6 }
  0x99   : > { %6196 = shalt.err (!%p6193_p10)
}
  0x9a   : > { %s6197_s19 = scalar_lea.vmem %s420_s17, 1024  ;;  %p6205_p4 = scmp.lt.s32.totalorder %s420_s17, %s420_s17 }
  0x9b   : > { %p6198_p1 = scmp.ne.s32.totalorder %s420_s17, %s6197_s19  ;;  %p6206_p7 = scmp.lt.s32.totalorder %s6197_s19, %s6197_s19 }
  0x9d   : > { %p6200_p2 = pnand %p6198_p1, %p6463_p0  ;;  %p6207_p8 = por %p6206_p7, %p6205_p4 }
  0x9f   : > { %p6201_p3 = pneg %p6200_p2 }
  0xa1   : > { %p6208_p11 = pnand %p6207_p8, %p6201_p3 }
  0xa3   : > { %6211 = shalt.err (!%p6208_p11)
}
  0xa4   : > { %s6308_s13 = smov 512   ;;  %s6309_s25 = smov 32  }
  0xa5   : > { %5904 = dma.hbm_to_vmem [thread:$0]  (!%p6449_p12), %s8630_s7, 1024, %s420_s17, [#allocation14], %s6308_s13, %s6308_s13, %s6309_s25  }
  0xa6   : > { %p8801_p13 = scmp.ne.s32.totalorder %s8797_s20, 0 }
  0xa8   : > { %458 = sbr.rel (%p8801_p13) target bundleno = 3587 (0xe03), region = 72 }
  0xaf   : > { %p8802_p5 = scmp.eq.s32.totalorder %s6413_s29, 0 }
  0xb1   : > { %6257 = dma.done.wait (%p8802_p5), [#allocation5], 256   ;;  %p8803_p0 = pmov %p8802_p5 }
  0xb3   : > { %6259 = vsyncadd (%p8803_p0), [#allocation5], 4294967040  ;;  %p8804_p6 = pmov %p8803_p0 }
  0xb4   : > { %p8805_p9 = pmov %p8803_p0 }
  0xb5   : > { %6261 = dma.done.wait (%p8804_p6), [#allocation8], 1152  }
  0xb6   : > { %6263 = vsyncadd (%p8805_p9), [#allocation8], 4294966144  ;;  %p8806_p10 = pmov %p8803_p0 }
  0xb7   : > { %p8807_p12 = pmov %p8803_p0 }
  0xb8   : > { %6265 = dma.done.wait (%p8806_p10), [#allocation11], 1664  }
  0xb9   : > { %6267 = vsyncadd (%p8807_p12), [#allocation11], 4294965632  ;;  %p8808_p1 = pmov %p8803_p0 }
  0xba   : > { %p8809_p2 = pmov %p8803_p0 }
  0xbb   : > { %6269 = dma.done.wait (%p8808_p1), [#allocation14], 1024  }
  0xbc   : > { %6271 = vsyncadd (%p8809_p2), [#allocation14], 4294966272  ;;  %v552_v0 = vlaneseq  ;;  %v5669_v4 = vld [vmem:[%s8635_s12 + $0x1] ss:$2 sm:$0x3]  ;;  %s6310_s24 = smov 113  }
  0xbd   : > { %v550_v5 = vld [vmem:[%s8635_s12] ss:$2 sm:$0x3]  ;;  %s6311_s15 = smov 111   ;;  %p522_p3 = scmp.lt.s32.totalorder %s6413_s29, 1  ;;  %v8651_v28 = vmov 0.0|0.0  }
  0xbe   : > { %v553_v1 = vshrl.u32 %v552_v0, 7  ;;  %v676_v8 = vld [vmem:[%s8635_s12] ss:$2 sm:$0x3]  ;;  %s6312_s13 = smov 127   ;;  %s6313_s20 = smov 1  }
  0xbf   : > { %v5670_v11 = vld [vmem:[%s8635_s12 + $0x1] ss:$2 sm:$0x3]  ;;  %s523_s14 = scalar_select %p522_p3, %s6413_s29, 1  ;;  %vm564_vm0 = vcmask 908288   ;;  %vm640_vm1 = vcmask 924672  }
  0xc0   : > { %v6592_v2 = vsub.s32 0, %v553_v1  ;;  %v6594_v3 = vsub.s32 1, %v553_v1  ;;  %v776_v14 = vld [vmem:[%s8635_s12] ss:$2 sm:$0x3]  ;;  %s6314_s17 = smov 15  }
  0xc1   : > { %s5766_s25 = sshll.u32 %s523_s14, 5  ;;  %v5671_v17 = vld [vmem:[%s8635_s12 + $0x1] ss:$2 sm:$0x3]  ;;  %s6315_s16 = smov 17   ;;  %vm690_vm2 = vcmask 1039360  }
  0xc2   : > { %v631_v6 = vrot.slane %v5669_v4, %v6592_v2  ;;  %v555_v7 = vrot.slane %v550_v5, %v6592_v2  ;;  %v635_v9 = vrot.slane %v5669_v4, %v6594_v3  ;;  %v559_v10 = vrot.slane %v550_v5, %v6594_v3  ;;  %s6637_s18 = scalar_lea.vmem %s8623_s0, %s5766_s25  ;;  %s6316_s22 = smov 16  }
  0xc3   : > { %v685_v12 = vrot.slane %v676_v8, %v6594_v3  ;;  %v681_v13 = vrot.slane %v676_v8, %v6592_v2  ;;  %v735_v15 = vrot.slane %v5670_v11, %v6594_v3  ;;  %v731_v16 = vrot.slane %v5670_v11, %v6592_v2  ;;  %v6644_v22 = vld [vmem:[%s6637_s18] sm:$0xff]  ;;  %v6647_v23 = vld [vmem:[%s6637_s18 + $0x10] sm:$0xff]  ;;  %v6650_v24 = vld [vmem:[%s6637_s18 + $0x8] sm:$0xff]  ;;  %s6318_s30 = smov 112   ;;  %s5767_s3 = sshll.u32 %s6413_s29, 9 }
  0xc4   : > { %636 = vrot.lane.b32.xlu1 %v631_v6, %s6310_s24  ;;  %560 = vrot.lane.b32.xlu0 %v555_v7, %s6311_s15  ;;  %v785_v18 = vrot.slane %v776_v14, %v6594_v3  ;;  %v781_v19 = vrot.slane %v776_v14, %v6592_v2  ;;  %v860_v20 = vrot.slane %v5671_v17, %v6594_v3  ;;  %v6653_v25 = vld [vmem:[%s6637_s18 + $0x18] sm:$0xff]  ;;  %vm713_vm3 = vcmask 7168   ;;  %s9077_s23 = sld [smem:[#allocation104_spill]]  ;;  %s6320_s27 = smov [#allocation15]  }
  0xc5   : > { %v856_v21 = vrot.slane %v5671_v17, %v6592_v2  ;;  %v6659_v26 = vpack.c.bf16 %v6647_v23, %v6644_v22  ;;  %v6663_v27 = vpack.c.bf16 %v6653_v25, %v6650_v24  ;;  %vm663_vm4 = vcmask 121856   ;;  %s6216_s19 = sshll.u32 %s6320_s27, 4  ;;  %s6217_s19 = int_to_ptr.vmem [resolvable:$false] %s6216_s19 }
  0xc6   : > { %vm587_vm5 = vcmask 138240   ;;  %vm612_vm6 = vcmask 130048   ;;  %vm838_vm7 = vcmask 916480   ;;  %vm1399_vm8 = vcmask 261120  }
  0xc7   : > { %vm1927_vm9 = vcmask 392192   ;;  %vm2481_vm10 = vcmask 523264   ;;  %vm3100_vm11 = vcmask 654336   ;;  %vm3745_vm12 = vcmask 785408  }
  0xc8   : > { %638 = vrot.lane.b32.xlu1 %v635_v9, %s6310_s24  ;;  %562 = vrot.lane.b32.xlu0 %v559_v10, %s6311_s15 }
  0xca   : > { %s8577_s21 = scalar_lea.hbm %s9077_s23, %s5767_s3 }
  0xcc   : > { %688 = vrot.lane.b32.xlu1 %v685_v12, %s6312_s13  ;;  %686 = vrot.lane.b32.xlu0 %v681_v13, %s6312_s13 }
  0xd0   : > { %738 = vrot.lane.b32.xlu1 %v735_v15, %s6313_s20  ;;  %736 = vrot.lane.b32.xlu0 %v731_v16, %s6313_s20 }
  0xd4   : > { %788 = vrot.lane.b32.xlu1 %v785_v18, %s6314_s17  ;;  %786 = vrot.lane.b32.xlu0 %v781_v19, %s6314_s17 }
  0xd8   : > { %863 = vrot.lane.b32.xlu1 %v860_v20, %s6315_s16  ;;  %861 = vrot.lane.b32.xlu0 %v856_v21, %s6315_s16 }
  0xdc   : > { %608 = vrot.lane.b32.xlu1 %v6659_v26, %s6316_s22  ;;  %610 = vrot.lane.b32.xlu0 %v6663_v27, %s6316_s22 }
  0xe0   : > { %606 = vrot.lane.b32.xlu1 %v8651_v28, %s6316_s22 }
 0x136   : > { %v637_v29 = vpop.permute.xlu1 %636  ;;  %v561_v30 = vpop.permute.xlu0 %560 }
 0x137   : > { %v645_v31 = vmul.f32 0.0, %v637_v29  ;;  %v569_v32 = vmul.f32 0.0, %v561_v30 }
 0x139   : > { %v575_v33 = vpack.c.bf16 %v569_v32, %v569_v32  ;;  %v651_v37 = vpack.c.bf16 %v645_v31, %v645_v31 }
 0x13a   : > { %v639_v34 = vpop.permute.xlu1 %638  ;;  %v563_v35 = vpop.permute.xlu0 %562 }
 0x13b   : > { %v565_v36 = vsel %vm564_vm0, %v561_v30, %v563_v35  ;;  %581 = vrot.lane.b32.xlu0 %v575_v33, %s6315_s16  ;;  %v647_v38 = vmul.f32 %v639_v34, %v6650_v24  ;;  %v650_v39 = vmul.f32 %v639_v34, %v6653_v25  ;;  %v571_v40 = vmul.f32 %v563_v35, %v6650_v24 }
 0x13c   : > { %v574_v41 = vmul.f32 %v563_v35, %v6653_v25  ;;  %v570_v42 = vmul.f32 %v565_v36, %v6644_v22  ;;  %v573_v43 = vmul.f32 %v565_v36, %v6647_v23  ;;  %v641_v52 = vsel %vm640_vm1, %v637_v29, %v639_v34  ;;  %v5987_v34 = vld [vmem:[#allocation4 + $0x4] ss:$8 sps:$4 sm:$0xff]  }
 0x13d   : > { %v653_v50 = vpack.c.bf16 %v650_v39, %v647_v38  ;;  %v646_v58 = vmul.f32 %v641_v52, %v6644_v22  ;;  %v649_v59 = vmul.f32 %v641_v52, %v6647_v23  ;;  %5674 = vmatprep.mubr.msk.bf16.mxu0 %vm612_vm6, %v5987_v34  ;;  %v915_v39 = vld [vmem:[%s8632_s9] sm:$0xff] }
 0x13e   : > { %v577_v44 = vpack.c.bf16 %v574_v41, %v571_v40  ;;  %v689_v45 = vpop.permute.xlu1 %688  ;;  %v687_v46 = vpop.permute.xlu0 %686  ;;  %v576_v51 = vpack.c.bf16 %v573_v43, %v570_v42  ;;  %v8649_v40 = vmov 0   ;;  %v5675_v43 = vld [vmem:[%s8635_s12 + $0x1] ss:$2 sm:$0x3] }
 0x13f   : > { %657 = vrot.lane.b32.xlu0 %v651_v37, %s6314_s17  ;;  %v697_v47 = vmul.f32 %v689_v45, %v6650_v24  ;;  %v700_v48 = vmul.f32 %v689_v45, %v6653_v25  ;;  %v695_v49 = vmul.f32 0.0, %v687_v46  ;;  %v691_v54 = vsel %vm690_vm2, %v687_v46, %v689_v45  ;;  %5984 = vset.pattern.permute.xlu1 %v8649_v40  ;;  %v1121_v46 = vld [vmem:[%s8635_s12] ss:$2 sm:$0x3] }
 0x140   : > { %585 = vrot.lane.b32.xlu1 %v577_v44, %s6315_s16  ;;  %v696_v60 = vmul.f32 %v691_v54, %v6644_v22  ;;  %v699_v61 = vmul.f32 %v691_v54, %v6647_v23  ;;  %v652_v4 = vpack.c.bf16 %v649_v59, %v646_v58  ;;  %5983 = vset.pattern.permute.xlu0 %v8649_v40  ;;  %v1217_v52 = vld [vmem:[%s8635_s12] ss:$2 sm:$0x3] }
 0x141   : > { %v703_v55 = vpack.c.bf16 %v700_v48, %v697_v47  ;;  %v701_v57 = vpack.c.bf16 %v695_v49, %v695_v49  ;;  %1478 = vmatprep.mubr.bf16.mxu1 %v8649_v40  ;;  %v1082_v44 = vrot.slane %v5675_v43, %v6594_v3  ;;  %v1078_v45 = vrot.slane %v5675_v43, %v6592_v2  ;;  %v5676_v49 = vld [vmem:[%s8635_s12 + $0x1] ss:$2 sm:$0x3] }
 0x142   : > { %v739_v53 = vpop.permute.xlu1 %738  ;;  %v737_v56 = vpop.permute.xlu0 %736  ;;  %v702_v6 = vpack.c.bf16 %v699_v61, %v696_v60  ;;  %v1130_v47 = vrot.slane %v1121_v46, %v6594_v3  ;;  %v1126_v48 = vrot.slane %v1121_v46, %v6592_v2  ;;  %v1222_v54 = vrot.slane %v1217_v52, %v6592_v2 }
 0x143   : > { %583 = vrot.lane.b32.xlu0 %v576_v51, %s6315_s16  ;;  %v745_v62 = vmul.f32 %v737_v56, %v6644_v22  ;;  %v748_v63 = vmul.f32 %v737_v56, %v6647_v23  ;;  %v747_v0 = vmul.f32 0.0, %v739_v53  ;;  %v741_v12 = vsel %vm713_vm3, %v737_v56, %v739_v53 }
 0x144   : > { %661 = vrot.lane.b32.xlu1 %v653_v50, %s6314_s17  ;;  %v746_v16 = vmul.f32 %v741_v12, %v6650_v24  ;;  %v749_v17 = vmul.f32 %v741_v12, %v6653_v25  ;;  %v1178_v50 = vrot.slane %v5676_v49, %v6594_v3  ;;  %v1174_v51 = vrot.slane %v5676_v49, %v6592_v2 }
 0x145   : > { %v751_v8 = vpack.c.bf16 %v748_v63, %v745_v62  ;;  %v753_v11 = vpack.c.bf16 %v747_v0, %v747_v0  ;;  %v1226_v53 = vrot.slane %v1217_v52, %v6594_v3 }
 0x146   : > { %v789_v1 = vpop.permute.xlu1 %788  ;;  %v787_v5 = vpop.permute.xlu0 %786  ;;  %v752_v29 = vpack.c.bf16 %v749_v17, %v746_v16 }
 0x147   : > { %711 = vrot.lane.b32.xlu0 %v703_v55, %s6313_s20  ;;  %v797_v7 = vmul.f32 0.0, %v789_v1  ;;  %v795_v9 = vmul.f32 %v787_v5, %v6644_v22  ;;  %v798_v10 = vmul.f32 %v787_v5, %v6647_v23  ;;  %v791_v13 = vsel %vm663_vm4, %v787_v5, %v789_v1  ;;  %v5677_v55 = vld [vmem:[%s8635_s12 + $0x1] ss:$2 sm:$0x3] }
 0x148   : > { %707 = vrot.lane.b32.xlu1 %v701_v57, %s6313_s20  ;;  %v796_v18 = vmul.f32 %v791_v13, %v6650_v24  ;;  %v799_v19 = vmul.f32 %v791_v13, %v6653_v25  ;;  %v1298_v56 = vrot.slane %v5677_v55, %v6594_v3  ;;  %v1294_v57 = vrot.slane %v5677_v55, %v6592_v2 }
 0x149   : > { %v803_v14 = vpack.c.bf16 %v797_v7, %v797_v7  ;;  %v801_v15 = vpack.c.bf16 %v798_v10, %v795_v9 }
 0x14a   : > { %v864_v20 = vpop.permute.xlu1 %863  ;;  %v862_v21 = vpop.permute.xlu0 %861  ;;  %v802_v31 = vpack.c.bf16 %v799_v19, %v796_v18 }
 0x14b   : > { %659 = vrot.lane.b32.xlu0 %v652_v4, %s6314_s17  ;;  %v866_v30 = vsel %vm587_vm5, %v862_v21, %v864_v20  ;;  %v872_v36 = vmul.f32 0.0, %v864_v20  ;;  %v870_v37 = vmul.f32 %v862_v21, %v6644_v22  ;;  %v873_v38 = vmul.f32 %v862_v21, %v6647_v23  ;;  %v916_v22 = vld [vmem:[%s8632_s9 + $0x8] sm:$0xff]  ;;  %v1001_v23 = vld [vmem:[%s8635_s12] ss:$2 sm:$0x3] }
 0x14c   : > { %709 = vrot.lane.b32.xlu1 %v702_v6, %s6313_s20  ;;  %v871_v32 = vmul.f32 %v866_v30, %v6650_v24  ;;  %v874_v33 = vmul.f32 %v866_v30, %v6653_v25  ;;  %v1010_v41 = vrot.slane %v1001_v23, %v6594_v3  ;;  %v1006_v42 = vrot.slane %v1001_v23, %v6592_v2  ;;  %v5985_v23 = vld [vmem:[#allocation4] ss:$8 sps:$4 sm:$0xff]  }
 0x14d   : > { %v878_v24 = vpack.c.bf16 %v872_v36, %v872_v36  ;;  %v876_v25 = vpack.c.bf16 %v873_v38, %v870_v37 }
 0x14e   : > { %v877_v35 = vpack.c.bf16 %v874_v33, %v871_v32  ;;  %v611_v58 = vpop.permute.xlu0 %610  ;;  %v609_v59 = vpop.permute.xlu1 %608 }
 0x14f   : > { %757 = vrot.lane.b32.xlu0 %v751_v8, %s6312_s13  ;;  %v6787_v6 = vsel %vm612_vm6, %v609_v59, %v611_v58 }
 0x150   : > { %761 = vrot.lane.b32.xlu1 %v753_v11, %s6312_s13 }
 0x152   : > { %v607_v61 = vpop.permute.xlu1 %606 }
 0x153   : > { %811 = vrot.lane.b32.xlu0 %v803_v14, %s6310_s24  ;;  %v6792_v9 = vsel %vm612_vm6, %v607_v61, %v609_v59 }
 0x154   : > { %807 = vrot.lane.b32.xlu1 %v801_v15, %s6310_s24 }
 0x157   : > { %759 = vrot.lane.b32.xlu0 %v752_v29, %s6312_s13 }
 0x158   : > { %809 = vrot.lane.b32.xlu1 %v802_v31, %s6310_s24 }
 0x15b   : > { %834 = vrot.lane.b32.xlu0 %v6663_v27, %s6318_s30 }
 0x15c   : > { %836 = vrot.lane.b32.xlu1 %v8651_v28, %s6318_s30 }
 0x15f   : > { %832 = vrot.lane.b32.xlu0 %v6659_v26, %s6318_s30 }
 0x160   : > { %884 = vrot.lane.b32.xlu1 %v877_v35, %s6311_s15 }
 0x163   : > { %886 = vrot.lane.b32.xlu0 %v878_v24, %s6311_s15 }
 0x164   : > { %882 = vrot.lane.b32.xlu1 %v876_v25, %s6311_s15 }
 0x167   : > { %919 = vperm.xlu0 %5983, %v915_v39  }
 0x168   : > { %924 = vperm.xlu1 %5984, %v916_v22  }
 0x16b   : > { %1013 = vrot.lane.b32.xlu0 %v1010_v41, %s6311_s15 }
 0x16c   : > { %1011 = vrot.lane.b32.xlu1 %v1006_v42, %s6311_s15 }
 0x16f   : > { %1085 = vrot.lane.b32.xlu0 %v1082_v44, %s6310_s24 }
 0x170   : > { %1083 = vrot.lane.b32.xlu1 %v1078_v45, %s6310_s24 }
 0x173   : > { %1133 = vrot.lane.b32.xlu0 %v1130_v47, %s6312_s13 }
 0x174   : > { %1131 = vrot.lane.b32.xlu1 %v1126_v48, %s6312_s13 }
 0x177   : > { %1181 = vrot.lane.b32.xlu0 %v1178_v50, %s6313_s20 }
 0x178   : > { %1179 = vrot.lane.b32.xlu1 %v1174_v51, %s6313_s20 }
 0x17b   : > { %1229 = vrot.lane.b32.xlu0 %v1226_v53, %s6314_s17 }
 0x17c   : > { %1227 = vrot.lane.b32.xlu1 %v1222_v54, %s6314_s17 }
 0x17f   : > { %1301 = vrot.lane.b32.xlu0 %v1298_v56, %s6315_s16 }
 0x180   : > { %1299 = vrot.lane.b32.xlu1 %v1294_v57, %s6315_s16 }
 0x183   : > { %1055 = vrot.lane.b32.xlu0 %v8651_v28, %s6316_s22 }
 0x1ad   : > { %v582_v60 = vpop.permute.xlu0 %581 }
 0x1b1   : > { %v658_v62 = vpop.permute.xlu0 %657 }
 0x1b2   : > { %v586_v63 = vpop.permute.xlu1 %585 }
 0x1b5   : > { %v584_v0 = vpop.permute.xlu0 %583 }
 0x1b6   : > { %v6780_v1 = vsel %vm587_vm5, %v582_v60, %v584_v0  ;;  %v6783_v4 = vsel %vm587_vm5, %v584_v0, %v586_v63  ;;  %v662_v5 = vpop.permute.xlu1 %661 }
 0x1b7   : > { %940 = vmatprep.subr.bf16.mxu0 %v6783_v4 }
 0x1b8   : > { %941 = vmatpush1.bf16.msra.mxu0 %v6780_v1 }
 0x1b9   : > { %v712_v7 = vpop.permute.xlu0 %711  ;;  %942 = vmatprep.subr.bf16.mxu0 %v6787_v6 }
 0x1ba   : > { %v708_v8 = vpop.permute.xlu1 %707 }
 0x1bc   : > { %943 = vmatpush1.bf16.msra.mxu0 %v6792_v9 }
 0x1bd   : > { %v660_v10 = vpop.permute.xlu0 %659 }
 0x1be   : > { %v6796_v11 = vsel %vm663_vm4, %v658_v62, %v660_v10  ;;  %v6799_v12 = vsel %vm663_vm4, %v660_v10, %v662_v5  ;;  %v710_v13 = vpop.permute.xlu1 %709 }
 0x1bf   : > { %944 = vmatprep.subr.bf16.mxu0 %v6799_v12  ;;  %v6803_v14 = vsel %vm713_vm3, %v710_v13, %v712_v7  ;;  %v6808_v17 = vsel %vm713_vm3, %v708_v8, %v710_v13 }
 0x1c0   : > { %945 = vmatpush1.bf16.msra.mxu0 %v6796_v11 }
 0x1c1   : > { %v758_v15 = vpop.permute.xlu0 %757  ;;  %946 = vmatprep.subr.bf16.mxu0 %v6803_v14 }
 0x1c2   : > { %v762_v16 = vpop.permute.xlu1 %761 }
 0x1c4   : > { %947 = vmatpush1.bf16.msra.mxu0 %v6808_v17 }
 0x1c5   : > { %v812_v18 = vpop.permute.xlu0 %811  ;;  %948 = vmatprep.subr.bf16.mxu0 %v6663_v27 }
 0x1c6   : > { %v808_v19 = vpop.permute.xlu1 %807 }
 0x1c8   : > { %949 = vmatpush1.bf16.msra.mxu0 %v6659_v26 }
 0x1c9   : > { %v760_v20 = vpop.permute.xlu0 %759 }
 0x1ca   : > { %v6814_v21 = vsel %vm690_vm2, %v758_v15, %v760_v20  ;;  %v6817_v29 = vsel %vm690_vm2, %v760_v20, %v762_v16  ;;  %v810_v30 = vpop.permute.xlu1 %809 }
 0x1cb   : > { %950 = vmatprep.subr.bf16.mxu0 %v6817_v29  ;;  %v6821_v31 = vsel %vm640_vm1, %v810_v30, %v812_v18  ;;  %v6826_v34 = vsel %vm640_vm1, %v808_v19, %v810_v30 }
 0x1cc   : > { %951 = vmatpush1.bf16.msra.mxu0 %v6814_v21 }
 0x1cd   : > { %v835_v32 = vpop.permute.xlu0 %834  ;;  %952 = vmatprep.subr.bf16.mxu0 %v6821_v31 }
 0x1ce   : > { %v837_v33 = vpop.permute.xlu1 %836 }
 0x1cf   : > { %v6829_v35 = vsel %vm838_vm7, %v835_v32, %v837_v33 }
 0x1d0   : > { %953 = vmatpush1.bf16.msra.mxu0 %v6826_v34 }
 0x1d1   : > { %v833_v36 = vpop.permute.xlu0 %832  ;;  %954 = vmatprep.subr.bf16.mxu0 %v6829_v35 }
 0x1d2   : > { %v6834_v37 = vsel %vm838_vm7, %v833_v36, %v835_v32  ;;  %v885_v38 = vpop.permute.xlu1 %884 }
 0x1d3   : > { %8810 = vst [vmem:[#allocation28_spill] sm:$0xff] %v6834_v37 }
 0x1d4   : > { %955 = vmatpush1.bf16.msra.mxu0 %v6834_v37 }
 0x1d5   : > { %v887_v24 = vpop.permute.xlu0 %886 }
 0x1d6   : > { %v6838_v25 = vsel %vm564_vm0, %v885_v38, %v887_v24  ;;  %v883_v39 = vpop.permute.xlu1 %882 }
 0x1d7   : > { %8811 = vst [vmem:[#allocation29_spill] sm:$0xff] %v6838_v25  ;;  %v6841_v22 = vsel %vm564_vm0, %v883_v39, %v885_v38  ;;  %956 = vmatprep.subr.bf16.mxu0 %v6838_v25 }
 0x1d8   : > { %8812 = vst [vmem:[#allocation30_spill] sm:$0xff] %v6841_v22  ;;  %957 = vmatpush1.bf16.msra.mxu0 %v6841_v22 }
 0x1d9   : > { %1403 = vmatprep.subr.bf16.mxu0 %v6783_v4 }
 0x1db   : > { %973 = vmatmul.mubr.bf16.vlgmr.msra.gmra.mrb[0].mxu0 %v5985_v23 }
 0x1dc   : > { %1404 = vmatpush1.bf16.msra.mxu0 %v6780_v1 }
 0x1dd   : > { %1405 = vmatprep.subr.bf16.mxu0 %v6787_v6 }
 0x1e0   : > { %1406 = vmatpush1.bf16.msra.mxu0 %v6792_v9 }
 0x1e1   : > { %1407 = vmatprep.subr.bf16.mxu0 %v6799_v12 }
 0x1e4   : > { %1408 = vmatpush1.bf16.msra.mxu0 %v6796_v11 }
 0x1e5   : > { %1409 = vmatprep.subr.bf16.mxu0 %v6803_v14 }
 0x1e6   : > { %v920_v51 = vpop.permute.xlu0 %919 }
 0x1e7   : > { %v925_v41 = vpop.permute.xlu1 %924 }
 0x1e8   : > { %1410 = vmatpush1.bf16.msra.mxu0 %v6808_v17 }
 0x1e9   : > { %1411 = vmatprep.subr.bf16.mxu0 %v6663_v27 }
 0x1ea   : > { %v1014_v52 = vpop.permute.xlu0 %1013 }
 0x1eb   : > { %v1012_v42 = vpop.permute.xlu1 %1011 }
 0x1ec   : > { %1412 = vmatpush1.bf16.msra.mxu0 %v6659_v26  ;;  %v1019_v43 = vmul.f32 0.0, %v1012_v42  ;;  %v1015_v0 = vsel %vm564_vm0, %v1012_v42, %v1014_v52 }
 0x1ed   : > { %1413 = vmatprep.subr.bf16.mxu0 %v6817_v29 }
 0x1ee   : > { %v1025_v44 = vpack.c.bf16 %v1019_v43, %v1019_v43  ;;  %v1086_v53 = vpop.permute.xlu0 %1085 }
 0x1ef   : > { %v1084_v45 = vpop.permute.xlu1 %1083 }
 0x1f0   : > { %1414 = vmatpush1.bf16.msra.mxu0 %v6814_v21  ;;  %1031 = vrot.lane.b32.xlu1 %v1025_v44, %s6315_s16  ;;  %v1091_v46 = vmul.f32 0.0, %v1084_v45  ;;  %v1087_v5 = vsel %vm640_vm1, %v1084_v45, %v1086_v53 }
 0x1f1   : > { %1415 = vmatprep.subr.bf16.mxu0 %v6821_v31 }
 0x1f2   : > { %v1097_v49 = vpack.c.bf16 %v1091_v46, %v1091_v46  ;;  %v1134_v54 = vpop.permute.xlu0 %1133 }
 0x1f3   : > { %v1132_v47 = vpop.permute.xlu1 %1131 }
 0x1f4   : > { %1416 = vmatpush1.bf16.msra.mxu0 %v6826_v34  ;;  %v1139_v48 = vmul.f32 0.0, %v1132_v47  ;;  %1103 = vrot.lane.b32.xlu1 %v1097_v49, %s6314_s17  ;;  %v1135_v7 = vsel %vm690_vm2, %v1132_v47, %v1134_v54 }
 0x1f5   : > { %1417 = vmatprep.subr.bf16.mxu0 %v6829_v35 }
 0x1f6   : > { %v1145_v50 = vpack.c.bf16 %v1139_v48, %v1139_v48  ;;  %v1182_v55 = vpop.permute.xlu0 %1181 }
 0x1f7   : > { %v1180_v56 = vpop.permute.xlu1 %1179  ;;  %v1189_v13 = vmul.f32 0.0, %v1182_v55 }
 0x1f8   : > { %1418 = vmatpush1.bf16.msra.mxu0 %v6834_v37  ;;  %1151 = vrot.lane.b32.xlu0 %v1145_v50, %s6313_s20  ;;  %v1183_v15 = vsel %vm713_vm3, %v1180_v56, %v1182_v55 }
 0x1f9   : > { %1419 = vmatprep.subr.bf16.mxu0 %v6838_v25 }
 0x1fa   : > { %v6866_v57 = vpop.permute.xlu0 %1229 }
 0x1fb   : > { %v1228_v58 = vpop.permute.xlu1 %1227 }
 0x1fc   : > { %1420 = vmatpush1.bf16.msra.mxu0 %v6841_v22  ;;  %v1231_v20 = vsel %vm663_vm4, %v1228_v58, %v6866_v57 }
 0x1fe   : > { %v6868_v60 = vpop.permute.xlu0 %1301 }
 0x1ff   : > { %v1300_v63 = vpop.permute.xlu1 %1299 }
 0x200   : > { %v1303_v33 = vsel %vm587_vm5, %v1300_v63, %v6868_v60 }
 0x2ae   : > { %v974_v59 = vpop.f32.mrb[0].mxu0 }
 0x2af   : > { %v975_v61 = vadd.f32 %v974_v59, %v920_v51  ;;  %v976_v62 = vpop.f32.mrb[1].mxu0 }
 0x2b0   : > { %v977_v8 = vadd.f32 %v976_v62, %v920_v51  ;;  %v978_v10 = vpop.f32.mrb[2].mxu0 }
 0x2b1   : > { %v983_v16 = vmax.f32 %v975_v61, 0.0  ;;  %v979_v18 = vadd.f32 %v978_v10, %v925_v41  ;;  %v980_v19 = vpop.f32.mrb[3].mxu0 }
 0x2b2   : > { %v984_v30 = vmax.f32 %v977_v8, 0.0  ;;  %v981_v32 = vadd.f32 %v980_v19, %v925_v41 }
 0x2b3   : > { %v1235_v36 = vmul.f32 %v1228_v58, %v983_v16  ;;  %v985_v38 = vmax.f32 %v979_v18, 0.0  ;;  %v6878_v24 = vmul.f32 %v1300_v63, %v983_v16  ;;  %v1140_v39 = vmul.f32 %v1135_v7, %v983_v16 }
 0x2b4   : > { %v986_v23 = vmax.f32 %v981_v32, 0.0  ;;  %v1020_v42 = vmul.f32 %v1015_v0, %v983_v16  ;;  %v1021_v43 = vmul.f32 %v1014_v52, %v984_v30  ;;  %v1092_v44 = vmul.f32 %v1087_v5, %v983_v16 }
 0x2b5   : > { %v6880_v45 = vpack.c.bf16 %v985_v38, %v983_v16  ;;  %v1310_v46 = vmul.f32 %v1300_v63, %v985_v38  ;;  %v1143_v47 = vmul.f32 %v1135_v7, %v985_v38  ;;  %v1023_v48 = vmul.f32 %v1015_v0, %v985_v38 }
 0x2b6   : > { %v6882_v49 = vpack.c.bf16 %v986_v23, %v984_v30  ;;  %v1024_v41 = vmul.f32 %v1014_v52, %v986_v23  ;;  %v1095_v50 = vmul.f32 %v1087_v5, %v985_v38  ;;  %v1187_v51 = vmul.f32 %v1180_v56, %v983_v16 }
 0x2b7   : > { %8813 = vst [vmem:[#allocation31_spill] sm:$0xff] %v6880_v45  ;;  %1057 = vrot.lane.b32.xlu0 %v6880_v45, %s6316_s22  ;;  %v1146_v55 = vpack.c.bf16 %v1143_v47, %v1140_v39  ;;  %v1026_v59 = vpack.c.bf16 %v1023_v48, %v1020_v42  ;;  %v1190_v61 = vmul.f32 %v1180_v56, %v985_v38 }
 0x2b8   : > { %8814 = vst [vmem:[#allocation32_spill] sm:$0xff] %v6882_v49  ;;  %v1093_v62 = vmul.f32 %v1086_v53, %v984_v30  ;;  %1059 = vrot.lane.b32.xlu1 %v6882_v49, %s6316_s22  ;;  %v1027_v8 = vpack.c.bf16 %v1024_v41, %v1021_v43  ;;  %v1098_v10 = vpack.c.bf16 %v1095_v50, %v1092_v44  ;;  %v1627_v41 = vld [vmem:[%s8635_s12] ss:$2 sm:$0x3]  ;;  %v1032_v50 = vpop.permute.xlu1 %1031 }
 0x2b9   : > { %v1096_v63 = vmul.f32 %v1086_v53, %v986_v23  ;;  %v1141_v7 = vmul.f32 %v1134_v54, %v984_v30  ;;  %v1193_v0 = vpack.c.bf16 %v1190_v61, %v1187_v51  ;;  %v1144_v18 = vmul.f32 %v1134_v54, %v986_v23 }
 0x2ba   : > { %v1238_v19 = vmul.f32 %v1228_v58, %v985_v38  ;;  %v1188_v52 = vmul.f32 %v1183_v15, %v984_v30  ;;  %v1191_v16 = vmul.f32 %v1183_v15, %v986_v23  ;;  %v1308_v32 = vmul.f32 %v1303_v33, %v984_v30 }
 0x2bb   : > { %v1099_v5 = vpack.c.bf16 %v1096_v63, %v1093_v62  ;;  %v1311_v40 = vmul.f32 %v1303_v33, %v986_v23  ;;  %1153 = vrot.lane.b32.xlu0 %v1146_v55, %s6313_s20  ;;  %v1147_v39 = vpack.c.bf16 %v1144_v18, %v1141_v7  ;;  %v1236_v42 = vmul.f32 %v1231_v20, %v984_v30  ;;  %v5678_v30 = vld [vmem:[%s8632_s9 + $0x10] sm:$0xff]  ;;  %v5684_v33 = vld [vmem:[%s8635_s12 + $0x1] ss:$2 sm:$0x3] }
 0x2bc   : > { %v1241_v56 = vpack.c.bf16 %v1238_v19, %v1235_v36  ;;  %v1239_v47 = vmul.f32 %v1231_v20, %v986_v23  ;;  %1033 = vrot.lane.b32.xlu1 %v1026_v59, %s6315_s16  ;;  %v1194_v43 = vpack.c.bf16 %v1191_v16, %v1188_v52  ;;  %v1313_v53 = vpack.c.bf16 %v1310_v46, %v6878_v24  ;;  %v5679_v20 = vld [vmem:[%s8632_s9 + $0x18] sm:$0xff]  ;;  %v1056_v46 = vpop.permute.xlu0 %1055  ;;  %v5685_v59 = vld [vmem:[%s8635_s12 + $0x1] ss:$2 sm:$0x3]  ;;  %v1104_v63 = vpop.permute.xlu1 %1103 }
 0x2bd   : > { %v1314_v44 = vpack.c.bf16 %v1311_v40, %v1308_v32  ;;  %v1195_v54 = vpack.c.bf16 %v1189_v13, %v1189_v13  ;;  %v1237_v58 = vmul.f32 0.0, %v6866_v57  ;;  %v5990_v13 = vld [vmem:[%s8625_s2 + $0x4] ss:$12 sps:$4 sm:$0xff]   ;;  %v1309_v57 = vmul.f32 0.0, %v6868_v60 }
 0x2be   : > { %v1242_v48 = vpack.c.bf16 %v1239_v47, %v1236_v42  ;;  %1435 = vmatprep.mubr.bf16.mxu0 %v5990_v13  ;;  %v1507_v60 = vld [vmem:[%s8635_s12] ss:$2 sm:$0x3]  ;;  %v1584_v24 = vrot.slane %v5684_v33, %v6592_v2  ;;  %v1588_v23 = vrot.slane %v5684_v33, %v6594_v3  ;;  %v1632_v51 = vrot.slane %v1627_v41, %v6592_v2  ;;  %v5686_v19 = vld [vmem:[%s8635_s12 + $0x1] ss:$2 sm:$0x3] }
 0x2bf   : > { %1035 = vrot.lane.b32.xlu0 %v1027_v8, %s6315_s16  ;;  %v1243_v40 = vpack.c.bf16 %v1237_v58, %v1237_v58  ;;  %v1315_v15 = vpack.c.bf16 %v1309_v57, %v1309_v57  ;;  %v1512_v36 = vrot.slane %v1507_v60, %v6592_v2  ;;  %v1516_v38 = vrot.slane %v1507_v60, %v6594_v3 }
 0x2c0   : > { %1105 = vrot.lane.b32.xlu1 %v1098_v10, %s6314_s17  ;;  %v1636_v55 = vrot.slane %v1627_v41, %v6594_v3  ;;  %v1152_v61 = vpop.permute.xlu0 %1151  ;;  %v1680_v62 = vrot.slane %v5685_v59, %v6592_v2  ;;  %v1684_v8 = vrot.slane %v5685_v59, %v6594_v3  ;;  %v1723_v10 = vld [vmem:[%s8635_s12] ss:$2 sm:$0x3]  ;;  %v1804_v16 = vrot.slane %v5686_v19, %v6594_v3 }
 0x2c1   : > { %v1728_v7 = vrot.slane %v1723_v10, %v6592_v2 }
 0x2c3   : > { %1203 = vrot.lane.b32.xlu0 %v1195_v54, %s6312_s13 }
 0x2c4   : > { %1199 = vrot.lane.b32.xlu1 %v1193_v0, %s6312_s13  ;;  %v1732_v0 = vrot.slane %v1723_v10, %v6594_v3 }
 0x2c7   : > { %1107 = vrot.lane.b32.xlu0 %v1099_v5, %s6314_s17  ;;  %v1800_v5 = vrot.slane %v5686_v19, %v6592_v2  ;;  %v5997_v19 = vld [vmem:[#allocation9 + $0x4] ss:$20 sps:$4 sm:$0xff]  }
 0x2c8   : > { %1275 = vrot.lane.b32.xlu1 %v8651_v28, %s6318_s30 }
 0x2cb   : > { %1273 = vrot.lane.b32.xlu0 %v6882_v49, %s6318_s30 }
 0x2cc   : > { %1155 = vrot.lane.b32.xlu1 %v1147_v39, %s6313_s20 }
 0x2cf   : > { %1271 = vrot.lane.b32.xlu0 %v6880_v45, %s6318_s30 }
 0x2d0   : > { %1247 = vrot.lane.b32.xlu1 %v1241_v56, %s6310_s24 }
 0x2d3   : > { %1251 = vrot.lane.b32.xlu0 %v1243_v40, %s6310_s24 }
 0x2d4   : > { %1201 = vrot.lane.b32.xlu1 %v1194_v43, %s6312_s13 }
 0x2d7   : > { %1321 = vrot.lane.b32.xlu0 %v1314_v44, %s6311_s15 }
 0x2d8   : > { %1249 = vrot.lane.b32.xlu1 %v1242_v48, %s6310_s24 }
 0x2db   : > { %1319 = vrot.lane.b32.xlu0 %v1313_v53, %s6311_s15 }
 0x2dc   : > { %1323 = vrot.lane.b32.xlu1 %v1315_v15, %s6311_s15 }
 0x2df   : > { %1381 = vperm.xlu0 %5983, %v5679_v20  }
 0x2e0   : > { %1376 = vperm.xlu1 %5984, %v5678_v30  }
 0x2e3   : > { %1519 = vrot.lane.b32.xlu0 %v1516_v38, %s6311_s15 }
 0x2e4   : > { %1517 = vrot.lane.b32.xlu1 %v1512_v36, %s6311_s15 }
 0x2e7   : > { %1591 = vrot.lane.b32.xlu0 %v1588_v23, %s6310_s24 }
 0x2e8   : > { %1589 = vrot.lane.b32.xlu1 %v1584_v24, %s6310_s24 }
 0x2eb   : > { %1639 = vrot.lane.b32.xlu0 %v1636_v55, %s6312_s13 }
 0x2ec   : > { %1637 = vrot.lane.b32.xlu1 %v1632_v51, %s6312_s13 }
 0x2ef   : > { %1687 = vrot.lane.b32.xlu0 %v1684_v8, %s6313_s20 }
 0x2f0   : > { %1685 = vrot.lane.b32.xlu1 %v1680_v62, %s6313_s20  ;;  %v5988_v62 = vld [vmem:[%s8625_s2] ss:$12 sps:$4 sm:$0xff]  }
 0x2f3   : > { %1735 = vrot.lane.b32.xlu0 %v1732_v0, %s6314_s17 }
 0x2f4   : > { %1733 = vrot.lane.b32.xlu1 %v1728_v7, %s6314_s17  ;;  %v5994_v7 = vld [vmem:[#allocation7 + $0x4] ss:$16 sps:$4 sm:$0xff]  }
 0x2f7   : > { %1807 = vrot.lane.b32.xlu0 %v1804_v16, %s6315_s16 }
 0x2f8   : > { %1805 = vrot.lane.b32.xlu1 %v1800_v5, %s6315_s16  ;;  %v5995_v5 = vld [vmem:[#allocation9] ss:$20 sps:$4 sm:$0xff]  }
 0x2fb   : > { %1561 = vrot.lane.b32.xlu0 %v8651_v28, %s6316_s22 }
 0x329   : > { %v1058_v18 = vpop.permute.xlu0 %1057 }
 0x32a   : > { %v1060_v52 = vpop.permute.xlu1 %1059  ;;  %v6978_v54 = vsel %vm612_vm6, %v1056_v46, %v1058_v18 }
 0x32b   : > { %v6971_v44 = vsel %vm612_vm6, %v1058_v18, %v1060_v52  ;;  %8818 = vst [vmem:[#allocation36_spill] sm:$0xff] %v6978_v54  ;;  %v5991_v18 = vld [vmem:[%s8625_s2 + $0x8] ss:$12 sps:$4 sm:$0xff]   ;;  %v5992_v52 = vld [vmem:[#allocation7] ss:$16 sps:$4 sm:$0xff]  }
 0x32c   : > { %8817 = vst [vmem:[#allocation35_spill] sm:$0xff] %v6971_v44 }
 0x32d   : > { %v1154_v32 = vpop.permute.xlu0 %1153 }
 0x32e   : > { %v1034_v39 = vpop.permute.xlu1 %1033  ;;  %v6997_v33 = vsel %vm713_vm3, %v1152_v61, %v1154_v32 }
 0x32f   : > { %v6967_v43 = vsel %vm587_vm5, %v1032_v50, %v1034_v39  ;;  %8823 = vst [vmem:[#allocation41_spill] sm:$0xff] %v6997_v33 }
 0x330   : > { %8816 = vst [vmem:[#allocation34_spill] sm:$0xff] %v6967_v43 }
 0x331   : > { %v1036_v56 = vpop.permute.xlu0 %1035 }
 0x332   : > { %v6964_v42 = vsel %vm587_vm5, %v1034_v39, %v1036_v56  ;;  %v1106_v47 = vpop.permute.xlu1 %1105 }
 0x333   : > { %8815 = vst [vmem:[#allocation33_spill] sm:$0xff] %v6964_v42  ;;  %1421 = vmatprep.subr.bf16.mxu0 %v6964_v42  ;;  %v6985_v57 = vsel %vm663_vm4, %v1104_v63, %v1106_v47 }
 0x334   : > { %1422 = vmatpush1.bf16.msra.mxu0 %v6967_v43  ;;  %8820 = vst [vmem:[#allocation38_spill] sm:$0xff] %v6985_v57 }
 0x335   : > { %v1204_v53 = vpop.permute.xlu0 %1203  ;;  %1423 = vmatprep.subr.bf16.mxu0 %v6971_v44 }
 0x336   : > { %v1200_v48 = vpop.permute.xlu1 %1199 }
 0x338   : > { %1424 = vmatpush1.bf16.msra.mxu0 %v6978_v54 }
 0x339   : > { %v1108_v58 = vpop.permute.xlu0 %1107 }
 0x33a   : > { %v6982_v40 = vsel %vm663_vm4, %v1106_v47, %v1108_v58  ;;  %v1276_v13 = vpop.permute.xlu1 %1275 }
 0x33b   : > { %8819 = vst [vmem:[#allocation37_spill] sm:$0xff] %v6982_v40  ;;  %1425 = vmatprep.subr.bf16.mxu0 %v6982_v40 }
 0x33c   : > { %1426 = vmatpush1.bf16.msra.mxu0 %v6985_v57 }
 0x33d   : > { %v1274_v15 = vpop.permute.xlu0 %1273 }
 0x33e   : > { %v6990_v20 = vsel %vm838_vm7, %v1274_v15, %v1276_v13  ;;  %v1156_v30 = vpop.permute.xlu1 %1155 }
 0x33f   : > { %8821 = vst [vmem:[#allocation39_spill] sm:$0xff] %v6990_v20  ;;  %v6993_v60 = vsel %vm713_vm3, %v1154_v32, %v1156_v30  ;;  %1446 = vmatprep.subr.bf16.mxu1 %v6990_v20 }
 0x340   : > { %8822 = vst [vmem:[#allocation40_spill] sm:$0xff] %v6993_v60  ;;  %1427 = vmatprep.subr.bf16.mxu0 %v6993_v60 }
 0x341   : > { %v1272_v36 = vpop.permute.xlu0 %1271  ;;  %1428 = vmatpush1.bf16.msra.mxu0 %v6997_v33 }
 0x342   : > { %v7002_v38 = vsel %vm838_vm7, %v1272_v36, %v1274_v15  ;;  %1429 = vmatprep.subr.bf16.mxu0 %v6882_v49  ;;  %v1248_v24 = vpop.permute.xlu1 %1247 }
 0x343   : > { %8824 = vst [vmem:[#allocation42_spill] sm:$0xff] %v7002_v38  ;;  %1447 = vmatpush1.bf16.msra.mxu1 %v7002_v38 }
 0x345   : > { %v1252_v23 = vpop.permute.xlu0 %1251  ;;  %1430 = vmatpush1.bf16.msra.mxu0 %v6880_v45 }
 0x346   : > { %v1202_v46 = vpop.permute.xlu1 %1201 }
 0x347   : > { %v7008_v41 = vsel %vm690_vm2, %v1200_v48, %v1202_v46  ;;  %v7011_v50 = vsel %vm690_vm2, %v1202_v46, %v1204_v53 }
 0x348   : > { %8825 = vst [vmem:[#allocation43_spill] sm:$0xff] %v7008_v41  ;;  %8826 = vst [vmem:[#allocation44_spill] sm:$0xff] %v7011_v50  ;;  %1431 = vmatprep.subr.bf16.mxu0 %v7011_v50 }
 0x349   : > { %v1322_v51 = vpop.permute.xlu0 %1321  ;;  %1432 = vmatpush1.bf16.msra.mxu0 %v7008_v41 }
 0x34a   : > { %v1250_v55 = vpop.permute.xlu1 %1249 }
 0x34b   : > { %v7016_v59 = vsel %vm640_vm1, %v1248_v24, %v1250_v55  ;;  %v7019_v61 = vsel %vm640_vm1, %v1250_v55, %v1252_v23 }
 0x34c   : > { %8827 = vst [vmem:[#allocation45_spill] sm:$0xff] %v7016_v59  ;;  %8828 = vst [vmem:[#allocation46_spill] sm:$0xff] %v7019_v61  ;;  %1433 = vmatprep.subr.bf16.mxu0 %v7019_v61 }
 0x34d   : > { %v1320_v8 = vpop.permute.xlu0 %1319  ;;  %1434 = vmatpush1.bf16.msra.mxu0 %v7016_v59 }
 0x34e   : > { %1931 = vmatprep.subr.bf16.mxu0 %v6783_v4  ;;  %v1324_v10 = vpop.permute.xlu1 %1323  ;;  %v7031_v0 = vsel %vm564_vm0, %v1320_v8, %v1322_v51 }
 0x34f   : > { %v7028_v63 = vsel %vm564_vm0, %v1322_v51, %v1324_v10  ;;  %8830 = vst [vmem:[#allocation48_spill] sm:$0xff] %v7031_v0 }
 0x350   : > { %8829 = vst [vmem:[#allocation47_spill] sm:$0xff] %v7028_v63  ;;  %1436 = vmatmul.mubr.bf16.vlgmr.msra.gmra.mrb[4].mxu0 %v5988_v62  ;;  %1448 = vmatprep.subr.bf16.mxu1 %v7028_v63 }
 0x351   : > { %1449 = vmatpush1.bf16.msra.mxu1 %v7031_v0  ;;  %1932 = vmatpush1.bf16.msra.mxu0 %v6780_v1 }
 0x352   : > { %1933 = vmatprep.subr.bf16.mxu0 %v6787_v6  ;;  %2485 = vmatprep.subr.bf16.mxu1 %v6783_v4 }
 0x353   : > { %1963 = vmatprep.mubr.bf16.mxu0 %v5994_v7 }
 0x354   : > { %5683 = vmatmul.mubr.msk.bf16.vlgmr.msra.gmra.mrb[0].mxu1 %vm1399_vm8, %v5991_v18 }
 0x355   : > { %1934 = vmatpush1.bf16.msra.mxu0 %v6792_v9  ;;  %2486 = vmatpush1.bf16.msra.mxu1 %v6780_v1 }
 0x356   : > { %1935 = vmatprep.subr.bf16.mxu0 %v6799_v12  ;;  %2487 = vmatprep.subr.bf16.mxu1 %v6787_v6 }
 0x357   : > { %2517 = vmatprep.mubr.bf16.mxu1 %v5997_v19 }
 0x359   : > { %1936 = vmatpush1.bf16.msra.mxu0 %v6796_v11  ;;  %2488 = vmatpush1.bf16.msra.mxu1 %v6792_v9 }
 0x35a   : > { %1937 = vmatprep.subr.bf16.mxu0 %v6803_v14  ;;  %2489 = vmatprep.subr.bf16.mxu1 %v6799_v12 }
 0x35d   : > { %1938 = vmatpush1.bf16.msra.mxu0 %v6808_v17  ;;  %2490 = vmatpush1.bf16.msra.mxu1 %v6796_v11 }
 0x35e   : > { %2491 = vmatprep.subr.bf16.mxu1 %v6803_v14  ;;  %1939 = vmatprep.subr.bf16.mxu0 %v6663_v27  ;;  %v1382_v58 = vpop.permute.xlu0 %1381 }
 0x35f   : > { %v1377_v16 = vpop.permute.xlu1 %1376 }
 0x361   : > { %1940 = vmatpush1.bf16.msra.mxu0 %v6659_v26  ;;  %2492 = vmatpush1.bf16.msra.mxu1 %v6808_v17 }
 0x362   : > { %1941 = vmatprep.subr.bf16.mxu0 %v6817_v29  ;;  %2493 = vmatprep.subr.bf16.mxu1 %v6663_v27  ;;  %v1520_v13 = vpop.permute.xlu0 %1519 }
 0x363   : > { %v1518_v32 = vpop.permute.xlu1 %1517 }
 0x364   : > { %v1525_v39 = vmul.f32 0.0, %v1518_v32 }
 0x365   : > { %1942 = vmatpush1.bf16.msra.mxu0 %v6814_v21  ;;  %2494 = vmatpush1.bf16.msra.mxu1 %v6659_v26 }
 0x366   : > { %1943 = vmatprep.subr.bf16.mxu0 %v6821_v31  ;;  %2495 = vmatprep.subr.bf16.mxu1 %v6817_v29  ;;  %v1531_v53 = vpack.c.bf16 %v1525_v39, %v1525_v39  ;;  %v1592_v15 = vpop.permute.xlu0 %1591 }
 0x367   : > { %v1590_v56 = vpop.permute.xlu1 %1589 }
 0x368   : > { %v1597_v47 = vmul.f32 0.0, %v1590_v56  ;;  %1537 = vrot.lane.b32.xlu1 %v1531_v53, %s6315_s16  ;;  %v1593_v28 = vsel %vm640_vm1, %v1590_v56, %v1592_v15 }
 0x369   : > { %1944 = vmatpush1.bf16.msra.mxu0 %v6826_v34  ;;  %2496 = vmatpush1.bf16.msra.mxu1 %v6814_v21 }
 0x36a   : > { %1945 = vmatprep.subr.bf16.mxu0 %v6829_v35  ;;  %2497 = vmatprep.subr.bf16.mxu1 %v6821_v31  ;;  %v1603_v48 = vpack.c.bf16 %v1597_v47, %v1597_v47  ;;  %v1640_v30 = vpop.permute.xlu0 %1639 }
 0x36b   : > { %v7111_v36 = vpop.permute.xlu1 %1637 }
 0x36c   : > { %1609 = vrot.lane.b32.xlu1 %v1603_v48, %s6314_s17  ;;  %v1521_v48 = vsel %vm564_vm0, %v1518_v32, %v1520_v13 }
 0x36d   : > { %1946 = vmatpush1.bf16.msra.mxu0 %v6834_v37  ;;  %2498 = vmatpush1.bf16.msra.mxu1 %v6826_v34 }
 0x36e   : > { %1947 = vmatprep.subr.bf16.mxu0 %v6838_v25  ;;  %2499 = vmatprep.subr.bf16.mxu1 %v6829_v35  ;;  %v7113_v24 = vpop.permute.xlu0 %1687 }
 0x36f   : > { %v1686_v23 = vpop.permute.xlu1 %1685 }
 0x371   : > { %1948 = vmatpush1.bf16.msra.mxu0 %v6841_v22  ;;  %2500 = vmatpush1.bf16.msra.mxu1 %v6834_v37 }
 0x372   : > { %1949 = vmatprep.subr.bf16.mxu0 %v6964_v42  ;;  %2501 = vmatprep.subr.bf16.mxu1 %v6838_v25  ;;  %v7115_v46 = vpop.permute.xlu0 %1735 }
 0x373   : > { %v1734_v51 = vpop.permute.xlu1 %1733 }
 0x374   : > { %v1737_v32 = vsel %vm663_vm4, %v1734_v51, %v7115_v46 }
 0x375   : > { %1950 = vmatpush1.bf16.msra.mxu0 %v6967_v43  ;;  %2502 = vmatpush1.bf16.msra.mxu1 %v6841_v22 }
 0x376   : > { %1951 = vmatprep.subr.bf16.mxu0 %v6971_v44  ;;  %2503 = vmatprep.subr.bf16.mxu1 %v6964_v42  ;;  %v7117_v18 = vpop.permute.xlu0 %1807 }
 0x379   : > { %1952 = vmatpush1.bf16.msra.mxu0 %v6978_v54  ;;  %2504 = vmatpush1.bf16.msra.mxu1 %v6967_v43 }
 0x37a   : > { %1953 = vmatprep.subr.bf16.mxu0 %v6982_v40  ;;  %2505 = vmatprep.subr.bf16.mxu1 %v6971_v44 }
 0x37d   : > { %1954 = vmatpush1.bf16.msra.mxu0 %v6985_v57  ;;  %2506 = vmatpush1.bf16.msra.mxu1 %v6978_v54 }
 0x37e   : > { %1955 = vmatprep.subr.bf16.mxu0 %v6993_v60  ;;  %2507 = vmatprep.subr.bf16.mxu1 %v6982_v40 }
 0x381   : > { %1956 = vmatpush1.bf16.msra.mxu0 %v6997_v33  ;;  %2508 = vmatpush1.bf16.msra.mxu1 %v6985_v57 }
 0x382   : > { %1957 = vmatprep.subr.bf16.mxu0 %v6882_v49  ;;  %2509 = vmatprep.subr.bf16.mxu1 %v6993_v60 }
 0x385   : > { %1958 = vmatpush1.bf16.msra.mxu0 %v6880_v45  ;;  %2510 = vmatpush1.bf16.msra.mxu1 %v6997_v33 }
 0x386   : > { %1959 = vmatprep.subr.bf16.mxu0 %v7011_v50  ;;  %2511 = vmatprep.subr.bf16.mxu1 %v6882_v49 }
 0x389   : > { %1960 = vmatpush1.bf16.msra.mxu0 %v7008_v41  ;;  %2512 = vmatpush1.bf16.msra.mxu1 %v6880_v45 }
 0x38a   : > { %1961 = vmatprep.subr.bf16.mxu0 %v7019_v61  ;;  %2513 = vmatprep.subr.bf16.mxu1 %v7011_v50 }
 0x38d   : > { %1962 = vmatpush1.bf16.msra.mxu0 %v7016_v59  ;;  %2514 = vmatpush1.bf16.msra.mxu1 %v7008_v41 }
 0x38e   : > { %1974 = vmatprep.subr.bf16.mxu0 %v6990_v20  ;;  %2515 = vmatprep.subr.bf16.mxu1 %v7019_v61 }
 0x390   : > { %1964 = vmatmul.mubr.bf16.vlgmr.msra.gmra.mrb[8].mxu0 %v5992_v52 }
 0x391   : > { %1975 = vmatpush1.bf16.msra.mxu0 %v7002_v38  ;;  %2516 = vmatpush1.bf16.msra.mxu1 %v7016_v59 }
 0x392   : > { %1976 = vmatprep.subr.bf16.mxu0 %v7028_v63  ;;  %2528 = vmatprep.subr.bf16.mxu1 %v6990_v20  ;;  %v1641_v20 = vsel %vm690_vm2, %v7111_v36, %v1640_v30 }
 0x394   : > { %2518 = vmatmul.mubr.bf16.vlgmr.msra.gmra.mrb[4].mxu1 %v5995_v5  ;;  %v1806_v5 = vpop.permute.xlu1 %1805 }
 0x395   : > { %1977 = vmatpush1.bf16.msra.mxu0 %v7031_v0  ;;  %2529 = vmatpush1.bf16.msra.mxu1 %v7002_v38 }
 0x396   : > { %2530 = vmatprep.subr.bf16.mxu1 %v7028_v63 }
 0x399   : > { %2531 = vmatpush1.bf16.msra.mxu1 %v7031_v0 }
 0x423   : > { %v1437_v55 = vpop.f32.mrb[4].mxu0 }
 0x424   : > { %v1439_v62 = vpop.f32.mrb[5].mxu0  ;;  %v1438_v10 = vadd.f32 %v1437_v55, %v1377_v16 }
 0x425   : > { %v1441_v8 = vpop.f32.mrb[6].mxu0  ;;  %v1440_v19 = vadd.f32 %v1439_v62, %v1377_v16  ;;  %v1809_v16 = vsel %vm587_vm5, %v1806_v5, %v7117_v18  ;;  %v1689_v62 = vsel %vm713_vm3, %v1686_v23, %v7113_v24 }
 0x426   : > { %v1443_v7 = vpop.f32.mrb[7].mxu0  ;;  %v1442_v39 = vadd.f32 %v1441_v8, %v1382_v58 }
 0x427   : > { %v1480_v52 = vpop.f32.mrb[0].mxu1  ;;  %v1444_v0 = vadd.f32 %v1443_v7, %v1382_v58 }
 0x428   : > { %v1481_v47 = vadd.f32 %v1480_v52, %v1438_v10  ;;  %v1482_v53 = vpop.f32.mrb[1].mxu1 }
 0x429   : > { %v1483_v63 = vadd.f32 %v1482_v53, %v1440_v19  ;;  %v1484_v38 = vpop.f32.mrb[2].mxu1 }
 0x42a   : > { %v1489_v55 = vmax.f32 %v1481_v47, 0.0  ;;  %v1485_v59 = vadd.f32 %v1484_v38, %v1442_v39  ;;  %v1486_v61 = vpop.f32.mrb[3].mxu1 }
 0x42b   : > { %v1490_v8 = vmax.f32 %v1483_v63, 0.0  ;;  %v1487_v56 = vadd.f32 %v1486_v61, %v1444_v0 }
 0x42c   : > { %v1741_v58 = vmul.f32 %v1734_v51, %v1489_v55  ;;  %v1491_v10 = vmax.f32 %v1485_v59, 0.0  ;;  %v7129_v7 = vmul.f32 %v1806_v5, %v1489_v55  ;;  %v1526_v19 = vmul.f32 %v1521_v48, %v1489_v55 }
 0x42d   : > { %v1492_v52 = vmax.f32 %v1487_v56, 0.0  ;;  %v7131_v47 = vmul.f32 %v1809_v16, %v1490_v8  ;;  %v1527_v38 = vmul.f32 %v1520_v13, %v1490_v8  ;;  %v1646_v39 = vmul.f32 %v1641_v20, %v1489_v55 }
 0x42e   : > { %v7133_v53 = vpack.c.bf16 %v1491_v10, %v1489_v55  ;;  %v7135_v41 = vmul.f32 %v1806_v5, %v1491_v10  ;;  %v1529_v50 = vmul.f32 %v1521_v48, %v1491_v10  ;;  %v1649_v45 = vmul.f32 %v1641_v20, %v1491_v10 }
 0x42f   : > { %v7137_v49 = vpack.c.bf16 %v1492_v52, %v1490_v8  ;;  %v1817_v63 = vmul.f32 %v1809_v16, %v1492_v52  ;;  %v1530_v61 = vmul.f32 %v1520_v13, %v1492_v52  ;;  %v1598_v0 = vmul.f32 %v1593_v28, %v1489_v55 }
 0x430   : > { %8831 = vst [vmem:[#allocation49_spill] sm:$0xff] %v7133_v53  ;;  %1563 = vrot.lane.b32.xlu0 %v7133_v53, %s6316_s22  ;;  %v1532_v59 = vpack.c.bf16 %v1529_v50, %v1526_v19  ;;  %v1652_v56 = vpack.c.bf16 %v1649_v45, %v1646_v39  ;;  %v1601_v33 = vmul.f32 %v1593_v28, %v1491_v10 }
 0x431   : > { %8832 = vst [vmem:[#allocation50_spill] sm:$0xff] %v7137_v49  ;;  %v1599_v60 = vmul.f32 %v1592_v15, %v1490_v8  ;;  %1565 = vrot.lane.b32.xlu1 %v7137_v49, %s6316_s22  ;;  %v1533_v57 = vpack.c.bf16 %v1530_v61, %v1527_v38  ;;  %v1602_v5 = vmul.f32 %v1592_v15, %v1492_v52 }
 0x432   : > { %v1693_v40 = vmul.f32 %v1686_v23, %v1489_v55  ;;  %v1696_v48 = vmul.f32 %v1686_v23, %v1491_v10  ;;  %v1604_v20 = vpack.c.bf16 %v1601_v33, %v1598_v0  ;;  %v1647_v54 = vmul.f32 %v1640_v30, %v1490_v8  ;;  %v5688_v23 = vld [vmem:[%s8632_s9 + $0x28] sm:$0xff]  ;;  %v2035_v55 = vld [vmem:[%s8635_s12] ss:$2 sm:$0x3] }
 0x433   : > { %v1650_v44 = vmul.f32 %v1640_v30, %v1492_v52  ;;  %v1744_v16 = vmul.f32 %v1734_v51, %v1491_v10  ;;  %v1605_v13 = vpack.c.bf16 %v1602_v5, %v1599_v60  ;;  %v1694_v42 = vmul.f32 %v1689_v62, %v1490_v8  ;;  %v1562_v51 = vpop.permute.xlu0 %1561  ;;  %v5695_v5 = vld [vmem:[%s8635_s12 + $0x1] ss:$2 sm:$0x3] }
 0x434   : > { %v1699_v43 = vpack.c.bf16 %v1696_v48, %v1693_v40  ;;  %v1697_v22 = vmul.f32 %v1689_v62, %v1492_v52  ;;  %1541 = vrot.lane.b32.xlu0 %v1533_v57, %s6315_s16  ;;  %v1742_v50 = vmul.f32 %v1737_v32, %v1490_v8  ;;  %v1745_v19 = vmul.f32 %v1737_v32, %v1492_v52  ;;  %v5694_v8 = vld [vmem:[%s8635_s12 + $0x1] ss:$2 sm:$0x3] }
 0x435   : > { %v1653_v45 = vpack.c.bf16 %v1650_v44, %v1647_v54  ;;  %v1747_v28 = vpack.c.bf16 %v1744_v16, %v1741_v58  ;;  %1539 = vrot.lane.b32.xlu1 %v1532_v59, %s6315_s16  ;;  %v1820_v15 = vpack.c.bf16 %v1817_v63, %v7131_v47  ;;  %v1819_v33 = vpack.c.bf16 %v7135_v41, %v7129_v7  ;;  %v2155_v47 = vld [vmem:[%s8635_s12] ss:$2 sm:$0x3] }
 0x436   : > { %v1700_v38 = vpack.c.bf16 %v1697_v22, %v1694_v42  ;;  %v1748_v30 = vpack.c.bf16 %v1745_v19, %v1742_v50  ;;  %v1645_v40 = vmul.f32 0.0, %v7111_v36  ;;  %v1695_v44 = vmul.f32 0.0, %v7113_v24  ;;  %v5687_v24 = vld [vmem:[%s8632_s9 + $0x20] sm:$0xff] }
 0x437   : > { %v1743_v54 = vmul.f32 0.0, %v7115_v46  ;;  %v1815_v60 = vmul.f32 0.0, %v7117_v18  ;;  %v8833_v41 = vmov 0.0|0.0   ;;  %v1538_v46 = vpop.permute.xlu1 %1537  ;;  %v2040_v62 = vrot.slane %v2035_v55, %v6592_v2  ;;  %v2251_v50 = vld [vmem:[%s8635_s12] ss:$2 sm:$0x3] }
 0x438   : > { %1659 = vrot.lane.b32.xlu0 %v1652_v56, %s6313_s20  ;;  %v1651_v22 = vpack.c.bf16 %v1645_v40, %v1645_v40  ;;  %v1701_v42 = vpack.c.bf16 %v1695_v44, %v1695_v44  ;;  %v2044_v32 = vrot.slane %v2035_v55, %v6594_v3  ;;  %v2112_v10 = vrot.slane %v5694_v8, %v6592_v2  ;;  %v5696_v44 = vld [vmem:[%s8635_s12 + $0x1] ss:$2 sm:$0x3] }
 0x439   : > { %1611 = vrot.lane.b32.xlu1 %v1604_v20, %s6314_s17  ;;  %v1749_v57 = vpack.c.bf16 %v1743_v54, %v1743_v54  ;;  %v1821_v36 = vpack.c.bf16 %v1815_v60, %v1815_v60  ;;  %v2116_v7 = vrot.slane %v5694_v8, %v6594_v3  ;;  %v2160_v63 = vrot.slane %v2155_v47, %v6592_v2 }
 0x43a   : > { %v2164_v61 = vrot.slane %v2155_v47, %v6594_v3  ;;  %v2208_v16 = vrot.slane %v5695_v5, %v6592_v2 }
 0x43b   : > { %v1610_v18 = vpop.permute.xlu1 %1609 }
 0x43c   : > { %1613 = vrot.lane.b32.xlu0 %v1605_v13, %s6314_s17  ;;  %v2212_v13 = vrot.slane %v5695_v5, %v6594_v3  ;;  %v6000_v5 = vld [vmem:[#allocation7 + $0x8] ss:$16 sps:$4 sm:$0xff]  }
 0x43d   : > { %1705 = vrot.lane.b32.xlu1 %v1699_v43, %s6312_s13  ;;  %v5998_v43 = vld [vmem:[#allocation7 + $0xc] ss:$16 sps:$4 sm:$0xff]  }
 0x43e   : > { %5693 = vmatprep.mubr.msk.bf16.mxu0 %vm1927_vm9, %v5998_v43  ;;  %v2332_v43 = vrot.slane %v5696_v44, %v6594_v3 }
 0x440   : > { %1657 = vrot.lane.b32.xlu0 %v1651_v22, %s6313_s20 }
 0x441   : > { %1661 = vrot.lane.b32.xlu1 %v1653_v45, %s6313_s20 }
 0x444   : > { %1709 = vrot.lane.b32.xlu0 %v1701_v42, %s6312_s13 }
 0x445   : > { %1757 = vrot.lane.b32.xlu1 %v1749_v57, %s6310_s24  ;;  %v2328_v57 = vrot.slane %v5696_v44, %v6592_v2  ;;  %v8858_v44 = vld [vmem:[#allocation41_spill] sm:$0xff] }
 0x448   : > { %1753 = vrot.lane.b32.xlu0 %v1747_v28, %s6310_s24 }
 0x449   : > { %1707 = vrot.lane.b32.xlu1 %v1700_v38, %s6312_s13  ;;  %v2256_v38 = vrot.slane %v2251_v50, %v6592_v2 }
 0x44c   : > { %1755 = vrot.lane.b32.xlu0 %v1748_v30, %s6310_s24 }
 0x44d   : > { %1779 = vrot.lane.b32.xlu1 %v7137_v49, %s6318_s30 }
 0x450   : > { %1781 = vrot.lane.b32.xlu0 %v8833_v41, %s6318_s30 }
 0x451   : > { %1777 = vrot.lane.b32.xlu1 %v7133_v53, %s6318_s30 }
 0x454   : > { %1827 = vrot.lane.b32.xlu0 %v1820_v15, %s6311_s15  ;;  %v2260_v15 = vrot.slane %v2251_v50, %v6594_v3  ;;  %v8853_v50 = vld [vmem:[#allocation35_spill] sm:$0xff] }
 0x455   : > { %1829 = vrot.lane.b32.xlu1 %v1821_v36, %s6311_s15 }
 0x458   : > { %1825 = vrot.lane.b32.xlu0 %v1819_v33, %s6311_s15 }
 0x459   : > { %1900 = vperm.xlu1 %5984, %v5687_v24  }
 0x45c   : > { %1905 = vperm.xlu0 %5983, %v5688_v23  }
 0x45d   : > { %2045 = vrot.lane.b32.xlu1 %v2040_v62, %s6311_s15 }
 0x460   : > { %2047 = vrot.lane.b32.xlu0 %v2044_v32, %s6311_s15 }
 0x461   : > { %2117 = vrot.lane.b32.xlu1 %v2112_v10, %s6310_s24 }
 0x464   : > { %2119 = vrot.lane.b32.xlu0 %v2116_v7, %s6310_s24 }
 0x465   : > { %2165 = vrot.lane.b32.xlu1 %v2160_v63, %s6312_s13 }
 0x468   : > { %2167 = vrot.lane.b32.xlu0 %v2164_v61, %s6312_s13 }
 0x469   : > { %2213 = vrot.lane.b32.xlu1 %v2208_v16, %s6313_s20  ;;  %v8850_v16 = vld [vmem:[#allocation30_spill] sm:$0xff] }
 0x46c   : > { %2215 = vrot.lane.b32.xlu0 %v2212_v13, %s6313_s20  ;;  %v8851_v13 = vld [vmem:[#allocation33_spill] sm:$0xff] }
 0x46d   : > { %2261 = vrot.lane.b32.xlu1 %v2256_v38, %s6314_s17  ;;  %v8855_v38 = vld [vmem:[#allocation37_spill] sm:$0xff] }
 0x470   : > { %2263 = vrot.lane.b32.xlu0 %v2260_v15, %s6314_s17  ;;  %v8856_v15 = vld [vmem:[#allocation38_spill] sm:$0xff] }
 0x471   : > { %2333 = vrot.lane.b32.xlu1 %v2328_v57, %s6315_s16  ;;  %v8861_v57 = vld [vmem:[#allocation44_spill] sm:$0xff] }
 0x474   : > { %2335 = vrot.lane.b32.xlu0 %v2332_v43, %s6315_s16  ;;  %v8862_v43 = vld [vmem:[#allocation43_spill] sm:$0xff] }
 0x478   : > { %2089 = vrot.lane.b32.xlu0 %v8833_v41, %s6316_s22 }
 0x4a2   : > { %v1564_v58 = vpop.permute.xlu0 %1563 }
 0x4a3   : > { %v1566_v52 = vpop.permute.xlu1 %1565  ;;  %v7222_v28 = vsel %vm612_vm6, %v1562_v51, %v1564_v58 }
 0x4a4   : > { %v7211_v48 = vsel %vm612_vm6, %v1564_v58, %v1566_v52  ;;  %8837 = vst [vmem:[#allocation54_spill] sm:$0xff] %v7222_v28 }
 0x4a5   : > { %8836 = vst [vmem:[#allocation53_spill] sm:$0xff] %v7211_v48 }
 0x4a6   : > { %v1542_v39 = vpop.permute.xlu0 %1541 }
 0x4a7   : > { %v1540_v0 = vpop.permute.xlu1 %1539 }
 0x4a8   : > { %v7198_v59 = vsel %vm587_vm5, %v1538_v46, %v1540_v0  ;;  %v7201_v56 = vsel %vm587_vm5, %v1540_v0, %v1542_v39 }
 0x4a9   : > { %8834 = vst [vmem:[#allocation51_spill] sm:$0xff] %v7198_v59  ;;  %8835 = vst [vmem:[#allocation52_spill] sm:$0xff] %v7201_v56  ;;  %1978 = vmatprep.subr.bf16.mxu0 %v7201_v56  ;;  %2532 = vmatprep.subr.bf16.mxu1 %v7201_v56 }
 0x4aa   : > { %v1660_v20 = vpop.permute.xlu0 %1659  ;;  %1979 = vmatpush1.bf16.msra.mxu0 %v7198_v59  ;;  %2533 = vmatpush1.bf16.msra.mxu1 %v7198_v59 }
 0x4ab   : > { %1980 = vmatprep.subr.bf16.mxu0 %v7211_v48  ;;  %2534 = vmatprep.subr.bf16.mxu1 %v7211_v48  ;;  %v1612_v45 = vpop.permute.xlu1 %1611 }
 0x4ac   : > { %v7237_v40 = vsel %vm663_vm4, %v1610_v18, %v1612_v45 }
 0x4ad   : > { %8839 = vst [vmem:[#allocation56_spill] sm:$0xff] %v7237_v40 }
 0x4ae   : > { %v1614_v19 = vpop.permute.xlu0 %1613  ;;  %1981 = vmatpush1.bf16.msra.mxu0 %v7222_v28  ;;  %2535 = vmatpush1.bf16.msra.mxu1 %v7222_v28 }
 0x4af   : > { %v7232_v33 = vsel %vm663_vm4, %v1612_v45, %v1614_v19  ;;  %v1706_v30 = vpop.permute.xlu1 %1705  ;;  %v8852_v45 = vld [vmem:[#allocation34_spill] sm:$0xff]  ;;  %v8854_v19 = vld [vmem:[#allocation36_spill] sm:$0xff] }
 0x4b0   : > { %8838 = vst [vmem:[#allocation55_spill] sm:$0xff] %v7232_v33  ;;  %1982 = vmatprep.subr.bf16.mxu0 %v7232_v33  ;;  %2536 = vmatprep.subr.bf16.mxu1 %v7232_v33 }
 0x4b2   : > { %v1658_v54 = vpop.permute.xlu0 %1657  ;;  %1983 = vmatpush1.bf16.msra.mxu0 %v7237_v40  ;;  %2537 = vmatpush1.bf16.msra.mxu1 %v7237_v40 }
 0x4b3   : > { %v1662_v22 = vpop.permute.xlu1 %1661  ;;  %v7252_v60 = vsel %vm713_vm3, %v1658_v54, %v1660_v20  ;;  %v8859_v54 = vld [vmem:[#allocation32_spill] sm:$0xff] }
 0x4b4   : > { %v7247_v42 = vsel %vm713_vm3, %v1660_v20, %v1662_v22  ;;  %8841 = vst [vmem:[#allocation58_spill] sm:$0xff] %v7252_v60  ;;  %v6003_v20 = vld [vmem:[#allocation10 + $0x4] ss:$24 sps:$4 sm:$0xff]  }
 0x4b5   : > { %8840 = vst [vmem:[#allocation57_spill] sm:$0xff] %v7247_v42  ;;  %1984 = vmatprep.subr.bf16.mxu0 %v7247_v42  ;;  %2538 = vmatprep.subr.bf16.mxu1 %v7247_v42  ;;  %v8860_v22 = vld [vmem:[#allocation31_spill] sm:$0xff] }
 0x4b6   : > { %v1710_v36 = vpop.permute.xlu0 %1709  ;;  %1985 = vmatpush1.bf16.msra.mxu0 %v7252_v60  ;;  %2539 = vmatpush1.bf16.msra.mxu1 %v7252_v60 }
 0x4b7   : > { %1986 = vmatprep.subr.bf16.mxu0 %v7137_v49  ;;  %2540 = vmatprep.subr.bf16.mxu1 %v7137_v49  ;;  %v1758_v24 = vpop.permute.xlu1 %1757 }
 0x4ba   : > { %v1754_v23 = vpop.permute.xlu0 %1753  ;;  %1987 = vmatpush1.bf16.msra.mxu0 %v7133_v53  ;;  %2541 = vmatpush1.bf16.msra.mxu1 %v7133_v53 }
 0x4bb   : > { %v1708_v46 = vpop.permute.xlu1 %1707 }
 0x4bc   : > { %v7265_v51 = vsel %vm690_vm2, %v1706_v30, %v1708_v46  ;;  %v7268_v18 = vsel %vm690_vm2, %v1708_v46, %v1710_v36  ;;  %v8857_v30 = vld [vmem:[#allocation40_spill] sm:$0xff]  ;;  %v8863_v36 = vld [vmem:[#allocation46_spill] sm:$0xff]  ;;  %v8865_v46 = vld [vmem:[#allocation39_spill] sm:$0xff] }
 0x4bd   : > { %8842 = vst [vmem:[#allocation59_spill] sm:$0xff] %v7265_v51  ;;  %8843 = vst [vmem:[#allocation60_spill] sm:$0xff] %v7268_v18  ;;  %1988 = vmatprep.subr.bf16.mxu0 %v7268_v18  ;;  %2542 = vmatprep.subr.bf16.mxu1 %v7268_v18 }
 0x4be   : > { %v1756_v55 = vpop.permute.xlu0 %1755  ;;  %1989 = vmatpush1.bf16.msra.mxu0 %v7265_v51  ;;  %2543 = vmatpush1.bf16.msra.mxu1 %v7265_v51 }
 0x4bf   : > { %v7277_v62 = vsel %vm640_vm1, %v1756_v55, %v1758_v24  ;;  %v1780_v32 = vpop.permute.xlu1 %1779  ;;  %v7282_v8 = vsel %vm640_vm1, %v1754_v23, %v1756_v55  ;;  %v6001_v24 = vld [vmem:[#allocation10] ss:$24 sps:$4 sm:$0xff]   ;;  %v8864_v23 = vld [vmem:[#allocation45_spill] sm:$0xff] }
 0x4c0   : > { %8844 = vst [vmem:[#allocation61_spill] sm:$0xff] %v7277_v62  ;;  %1990 = vmatprep.subr.bf16.mxu0 %v7277_v62  ;;  %2544 = vmatprep.subr.bf16.mxu1 %v7277_v62  ;;  %8845 = vst [vmem:[#allocation62_spill] sm:$0xff] %v7282_v8 }
 0x4c2   : > { %v1782_v58 = vpop.permute.xlu0 %1781  ;;  %1991 = vmatpush1.bf16.msra.mxu0 %v7282_v8  ;;  %2545 = vmatpush1.bf16.msra.mxu1 %v7282_v8 }
 0x4c3   : > { %v7287_v10 = vsel %vm838_vm7, %v1780_v32, %v1782_v58  ;;  %v1778_v7 = vpop.permute.xlu1 %1777  ;;  %v8867_v58 = vld [vmem:[#allocation47_spill] sm:$0xff] }
 0x4c4   : > { %8846 = vst [vmem:[#allocation63_spill] sm:$0xff] %v7287_v10  ;;  %v7290_v52 = vsel %vm838_vm7, %v1778_v7, %v1780_v32  ;;  %1992 = vmatprep.subr.bf16.mxu0 %v7287_v10  ;;  %2546 = vmatprep.subr.bf16.mxu1 %v7287_v10  ;;  %v8866_v32 = vld [vmem:[#allocation42_spill] sm:$0xff] }
 0x4c5   : > { %8847 = vst [vmem:[#allocation64_spill] sm:$0xff] %v7290_v52 }
 0x4c6   : > { %v1828_v47 = vpop.permute.xlu0 %1827  ;;  %1993 = vmatpush1.bf16.msra.mxu0 %v7290_v52  ;;  %2547 = vmatpush1.bf16.msra.mxu1 %v7290_v52 }
 0x4c7   : > { %v1830_v39 = vpop.permute.xlu1 %1829 }
 0x4c8   : > { %v7297_v63 = vsel %vm564_vm0, %v1828_v47, %v1830_v39  ;;  %v8868_v39 = vld [vmem:[#allocation48_spill] sm:$0xff] }
 0x4c9   : > { %8848 = vst [vmem:[#allocation65_spill] sm:$0xff] %v7297_v63  ;;  %1994 = vmatprep.subr.bf16.mxu0 %v7297_v63  ;;  %2548 = vmatprep.subr.bf16.mxu1 %v7297_v63 }
 0x4ca   : > { %v1826_v61 = vpop.permute.xlu0 %1825 }
 0x4cb   : > { %v7302_v0 = vsel %vm564_vm0, %v1826_v61, %v1828_v47 }
 0x4cc   : > { %8849 = vst [vmem:[#allocation66_spill] sm:$0xff] %v7302_v0  ;;  %1995 = vmatpush1.bf16.msra.mxu0 %v7302_v0  ;;  %2549 = vmatpush1.bf16.msra.mxu1 %v7302_v0 }
 0x4cd   : > { %3104 = vmatprep.subr.bf16.mxu0 %v6783_v4 }
 0x4cf   : > { %2007 = vmatmul.mubr.bf16.vlgmr.msra.gmra.mrb[8].mxu0 %v6000_v5 }
 0x4d0   : > { %3105 = vmatpush1.bf16.msra.mxu0 %v6780_v1  ;;  %3136 = vmatprep.mubr.bf16.mxu0 %v6003_v20 }
 0x4d1   : > { %3106 = vmatprep.subr.bf16.mxu0 %v6787_v6 }
 0x4d4   : > { %3107 = vmatpush1.bf16.msra.mxu0 %v6792_v9 }
 0x4d5   : > { %3108 = vmatprep.subr.bf16.mxu0 %v6799_v12 }
 0x4d8   : > { %3109 = vmatpush1.bf16.msra.mxu0 %v6796_v11  ;;  %v1901_v55 = vpop.permute.xlu1 %1900 }
 0x4d9   : > { %3110 = vmatprep.subr.bf16.mxu0 %v6803_v14 }
 0x4dc   : > { %3111 = vmatpush1.bf16.msra.mxu0 %v6808_v17  ;;  %v2046_v7 = vpop.permute.xlu1 %2045 }
 0x4dd   : > { %3112 = vmatprep.subr.bf16.mxu0 %v6663_v27  ;;  %v2053_v47 = vmul.f32 0.0, %v2046_v7 }
 0x4df   : > { %v2059_v61 = vpack.c.bf16 %v2053_v47, %v2053_v47  ;;  %v1906_v47 = vpop.permute.xlu0 %1905 }
 0x4e0   : > { %3113 = vmatpush1.bf16.msra.mxu0 %v6659_v26  ;;  %v2118_v5 = vpop.permute.xlu1 %2117 }
 0x4e1   : > { %3114 = vmatprep.subr.bf16.mxu0 %v6817_v29  ;;  %v2125_v20 = vmul.f32 0.0, %v2118_v5  ;;  %2065 = vrot.lane.b32.xlu1 %v2059_v61, %s6315_s16 }
 0x4e3   : > { %v2048_v61 = vpop.permute.xlu0 %2047 }
 0x4e4   : > { %3115 = vmatpush1.bf16.msra.mxu0 %v6814_v21 }
 0x4e5   : > { %3116 = vmatprep.subr.bf16.mxu0 %v6821_v31 }
 0x4e8   : > { %3117 = vmatpush1.bf16.msra.mxu0 %v6826_v34 }
 0x4e9   : > { %3118 = vmatprep.subr.bf16.mxu0 %v6829_v35 }
 0x4ec   : > { %3119 = vmatpush1.bf16.msra.mxu0 %v6834_v37 }
 0x4ed   : > { %3120 = vmatprep.subr.bf16.mxu0 %v6838_v25 }
 0x4f0   : > { %3121 = vmatpush1.bf16.msra.mxu0 %v8850_v16 }
 0x4f1   : > { %3122 = vmatprep.subr.bf16.mxu0 %v8851_v13 }
 0x4f4   : > { %3123 = vmatpush1.bf16.msra.mxu0 %v8852_v45 }
 0x4f5   : > { %3124 = vmatprep.subr.bf16.mxu0 %v8853_v50 }
 0x4f8   : > { %3125 = vmatpush1.bf16.msra.mxu0 %v8854_v19 }
 0x4f9   : > { %3126 = vmatprep.subr.bf16.mxu0 %v8855_v38 }
 0x4fc   : > { %3127 = vmatpush1.bf16.msra.mxu0 %v8856_v15 }
 0x4fd   : > { %3128 = vmatprep.subr.bf16.mxu0 %v8857_v30 }
 0x500   : > { %3129 = vmatpush1.bf16.msra.mxu0 %v8858_v44 }
 0x501   : > { %3130 = vmatprep.subr.bf16.mxu0 %v8859_v54 }
 0x504   : > { %3131 = vmatpush1.bf16.msra.mxu0 %v8860_v22 }
 0x505   : > { %3132 = vmatprep.subr.bf16.mxu0 %v8861_v57 }
 0x508   : > { %3133 = vmatpush1.bf16.msra.mxu0 %v8862_v43 }
 0x509   : > { %3134 = vmatprep.subr.bf16.mxu0 %v8863_v36 }
 0x50c   : > { %3135 = vmatpush1.bf16.msra.mxu0 %v8864_v23 }
 0x50d   : > { %3147 = vmatprep.subr.bf16.mxu0 %v8865_v46 }
 0x50f   : > { %3137 = vmatmul.mubr.bf16.vlgmr.msra.gmra.mrb[12].mxu0 %v6001_v24  ;;  %v2131_v24 = vpack.c.bf16 %v2125_v20, %v2125_v20  ;;  %v2120_v20 = vpop.permute.xlu0 %2119 }
 0x510   : > { %3148 = vmatpush1.bf16.msra.mxu0 %v8866_v32 }
 0x511   : > { %3149 = vmatprep.subr.bf16.mxu0 %v8867_v58  ;;  %2137 = vrot.lane.b32.xlu1 %v2131_v24, %s6314_s17 }
 0x513   : > { %v2168_v24 = vpop.permute.xlu0 %2167 }
 0x514   : > { %3150 = vmatpush1.bf16.msra.mxu0 %v8868_v39 }
 0x515   : > { %3151 = vmatprep.subr.bf16.mxu0 %v7201_v56 }
 0x518   : > { %3152 = vmatpush1.bf16.msra.mxu0 %v7198_v59 }
 0x519   : > { %3153 = vmatprep.subr.bf16.mxu0 %v7211_v48 }
 0x51c   : > { %3154 = vmatpush1.bf16.msra.mxu0 %v7222_v28 }
 0x51d   : > { %3155 = vmatprep.subr.bf16.mxu0 %v7232_v33 }
 0x520   : > { %3156 = vmatpush1.bf16.msra.mxu0 %v7237_v40 }
 0x521   : > { %3157 = vmatprep.subr.bf16.mxu0 %v7247_v42  ;;  %v2121_v42 = vsel %vm640_vm1, %v2118_v5, %v2120_v20 }
 0x524   : > { %3158 = vmatpush1.bf16.msra.mxu0 %v7252_v60 }
 0x525   : > { %3159 = vmatprep.subr.bf16.mxu0 %v7137_v49 }
 0x528   : > { %3160 = vmatpush1.bf16.msra.mxu0 %v7133_v53  ;;  %v7362_v53 = vpop.permute.xlu1 %2165 }
 0x529   : > { %3161 = vmatprep.subr.bf16.mxu0 %v7268_v18  ;;  %v7364_v18 = vpop.permute.xlu0 %2215  ;;  %v2169_v28 = vsel %vm690_vm2, %v7362_v53, %v2168_v24 }
 0x52c   : > { %3162 = vmatpush1.bf16.msra.mxu0 %v7265_v51  ;;  %v2214_v51 = vpop.permute.xlu1 %2213 }
 0x52d   : > { %3163 = vmatprep.subr.bf16.mxu0 %v7277_v62  ;;  %v7366_v62 = vpop.permute.xlu0 %2263  ;;  %v2217_v58 = vsel %vm713_vm3, %v2214_v51, %v7364_v18 }
 0x530   : > { %3164 = vmatpush1.bf16.msra.mxu0 %v7282_v8  ;;  %v2262_v8 = vpop.permute.xlu1 %2261 }
 0x531   : > { %3165 = vmatprep.subr.bf16.mxu0 %v7287_v10  ;;  %v7368_v49 = vpop.permute.xlu0 %2335 }
 0x534   : > { %3166 = vmatpush1.bf16.msra.mxu0 %v7290_v52  ;;  %v2334_v52 = vpop.permute.xlu1 %2333 }
 0x535   : > { %3167 = vmatprep.subr.bf16.mxu0 %v7297_v63  ;;  %v2337_v39 = vsel %vm587_vm5, %v2334_v52, %v7368_v49 }
 0x538   : > { %3168 = vmatpush1.bf16.msra.mxu0 %v7302_v0  ;;  %v2049_v0 = vsel %vm564_vm0, %v2046_v7, %v2048_v61 }
 0x5a2   : > { %v2008_v10 = vpop.f32.mrb[8].mxu0 }
 0x5a3   : > { %v5776_v60 = vadd.f32 %v2008_v10, %v1901_v55  ;;  %v2010_v63 = vpop.f32.mrb[9].mxu0  ;;  %v2265_v10 = vsel %vm663_vm4, %v2262_v8, %v7366_v62 }
 0x5a4   : > { %v5777_v40 = vadd.f32 %v2010_v63, %v1901_v55  ;;  %v2012_v33 = vpop.f32.mrb[10].mxu0 }
 0x5a5   : > { %v2017_v48 = vmax.f32 %v5776_v60, 0.0  ;;  %v5778_v59 = vadd.f32 %v2012_v33, %v1906_v47  ;;  %v2014_v56 = vpop.f32.mrb[11].mxu0 }
 0x5a6   : > { %v2018_v7 = vmax.f32 %v5777_v40, 0.0  ;;  %v5779_v32 = vadd.f32 %v2014_v56, %v1906_v47 }
 0x5a7   : > { %v2269_v5 = vmul.f32 %v2262_v8, %v2017_v48  ;;  %v2019_v63 = vmax.f32 %v5778_v59, 0.0  ;;  %v7380_v55 = vmul.f32 %v2334_v52, %v2017_v48  ;;  %v2054_v46 = vmul.f32 %v2049_v0, %v2017_v48 }
 0x5a8   : > { %v2020_v23 = vmax.f32 %v5779_v32, 0.0  ;;  %v7382_v60 = vmul.f32 %v2337_v39, %v2018_v7  ;;  %v2055_v33 = vmul.f32 %v2048_v61, %v2018_v7  ;;  %v2174_v36 = vmul.f32 %v2169_v28, %v2017_v48 }
 0x5a9   : > { %v7384_v43 = vpack.c.bf16 %v2019_v63, %v2017_v48  ;;  %v7386_v57 = vmul.f32 %v2334_v52, %v2019_v63  ;;  %v2057_v22 = vmul.f32 %v2049_v0, %v2019_v63  ;;  %v2177_v54 = vmul.f32 %v2169_v28, %v2019_v63 }
 0x5aa   : > { %v7388_v44 = vpack.c.bf16 %v2020_v23, %v2018_v7  ;;  %v2345_v40 = vmul.f32 %v2337_v39, %v2020_v23  ;;  %v2058_v56 = vmul.f32 %v2048_v61, %v2020_v23  ;;  %v2126_v47 = vmul.f32 %v2121_v42, %v2017_v48 }
 0x5ab   : > { %8869 = vst [vmem:[#allocation67_spill] sm:$0xff] %v7384_v43  ;;  %2091 = vrot.lane.b32.xlu0 %v7384_v43, %s6316_s22  ;;  %v2060_v59 = vpack.c.bf16 %v2057_v22, %v2054_v46  ;;  %v2180_v32 = vpack.c.bf16 %v2177_v54, %v2174_v36  ;;  %v2129_v30 = vmul.f32 %v2121_v42, %v2019_v63 }
 0x5ac   : > { %8870 = vst [vmem:[#allocation68_spill] sm:$0xff] %v7388_v44  ;;  %v2127_v15 = vmul.f32 %v2120_v20, %v2018_v7  ;;  %2093 = vrot.lane.b32.xlu1 %v7388_v44, %s6316_s22  ;;  %v2061_v38 = vpack.c.bf16 %v2058_v56, %v2055_v33  ;;  %v2130_v52 = vmul.f32 %v2120_v20, %v2020_v23 }
 0x5ad   : > { %v2221_v19 = vmul.f32 %v2214_v51, %v2017_v48  ;;  %v2224_v0 = vmul.f32 %v2214_v51, %v2019_v63  ;;  %v2132_v28 = vpack.c.bf16 %v2129_v30, %v2126_v47  ;;  %v2175_v50 = vmul.f32 %v2168_v24, %v2018_v7 }
 0x5ae   : > { %v2178_v45 = vmul.f32 %v2168_v24, %v2020_v23  ;;  %v2272_v39 = vmul.f32 %v2262_v8, %v2019_v63  ;;  %v2133_v61 = vpack.c.bf16 %v2130_v52, %v2127_v15  ;;  %v2222_v16 = vmul.f32 %v2217_v58, %v2018_v7  ;;  %v5706_v52 = vld [vmem:[%s8635_s12 + $0x1] ss:$2 sm:$0x3] }
 0x5af   : > { %v2227_v13 = vpack.c.bf16 %v2224_v0, %v2221_v19  ;;  %v2225_v25 = vmul.f32 %v2217_v58, %v2020_v23  ;;  %2069 = vrot.lane.b32.xlu0 %v2061_v38, %s6315_s16  ;;  %v2270_v22 = vmul.f32 %v2265_v10, %v2018_v7  ;;  %v2273_v36 = vmul.f32 %v2265_v10, %v2020_v23  ;;  %v2632_v58 = vld [vmem:[%s8635_s12] ss:$2 sm:$0x3]  ;;  %v5705_v10 = vld [vmem:[%s8635_s12 + $0x1] ss:$2 sm:$0x3] }
 0x5b0   : > { %v2181_v54 = vpack.c.bf16 %v2178_v45, %v2175_v50  ;;  %v2275_v42 = vpack.c.bf16 %v2272_v39, %v2269_v5  ;;  %2067 = vrot.lane.b32.xlu1 %v2060_v59, %s6315_s16  ;;  %v2348_v48 = vpack.c.bf16 %v2345_v40, %v7382_v60  ;;  %v2347_v51 = vpack.c.bf16 %v7386_v57, %v7380_v55  ;;  %v6006_v50 = vld [vmem:[#allocation9 + $0xc] ss:$20 sps:$4 sm:$0xff]   ;;  %v2090_v57 = vpop.permute.xlu0 %2089  ;;  %v2752_v60 = vld [vmem:[%s8635_s12] ss:$2 sm:$0x3] }
 0x5b1   : > { %v2228_v46 = vpack.c.bf16 %v2225_v25, %v2222_v16  ;;  %v2276_v30 = vpack.c.bf16 %v2273_v36, %v2270_v22  ;;  %v2173_v8 = vmul.f32 0.0, %v7362_v53  ;;  %v2223_v45 = vmul.f32 0.0, %v7364_v18  ;;  %v6009_v25 = vld [vmem:[#allocation10 + $0xc] ss:$24 sps:$4 sm:$0xff]   ;;  %2560 = vmatprep.mubr.bf16.mxu1 %v6006_v50 }
 0x5b2   : > { %v2271_v19 = vmul.f32 0.0, %v7366_v62  ;;  %3179 = vmatprep.mubr.bf16.mxu0 %v6009_v25  ;;  %v2343_v53 = vmul.f32 0.0, %v7368_v49  ;;  %v5697_v62 = vld [vmem:[%s8632_s9 + $0x30] sm:$0xff]  ;;  %v5698_v49 = vld [vmem:[%s8632_s9 + $0x38] sm:$0xff]  ;;  %v2637_v20 = vrot.slane %v2632_v58, %v6592_v2  ;;  %v2641_v24 = vrot.slane %v2632_v58, %v6594_v3 }
 0x5b3   : > { %2187 = vrot.lane.b32.xlu0 %v2180_v32, %s6313_s20  ;;  %v2179_v16 = vpack.c.bf16 %v2173_v8, %v2173_v8  ;;  %v2229_v38 = vpack.c.bf16 %v2223_v45, %v2223_v45  ;;  %v2709_v5 = vrot.slane %v5705_v10, %v6592_v2  ;;  %v2713_v63 = vrot.slane %v5705_v10, %v6594_v3  ;;  %v2848_v22 = vld [vmem:[%s8635_s12] ss:$2 sm:$0x3]  ;;  %v5707_v45 = vld [vmem:[%s8635_s12 + $0x1] ss:$2 sm:$0x3] }
 0x5b4   : > { %2139 = vrot.lane.b32.xlu1 %v2132_v28, %s6314_s17  ;;  %v2277_v15 = vpack.c.bf16 %v2271_v19, %v2271_v19  ;;  %v2349_v18 = vpack.c.bf16 %v2343_v53, %v2343_v53  ;;  %v2757_v40 = vrot.slane %v2752_v60, %v6592_v2  ;;  %v2761_v56 = vrot.slane %v2752_v60, %v6594_v3 }
 0x5b5   : > { %v2805_v39 = vrot.slane %v5706_v52, %v6592_v2 }
 0x5b7   : > { %2141 = vrot.lane.b32.xlu0 %v2133_v61, %s6314_s17  ;;  %v2809_v61 = vrot.slane %v5706_v52, %v6594_v3 }
 0x5b8   : > { %2233 = vrot.lane.b32.xlu1 %v2227_v13, %s6312_s13  ;;  %v2066_v13 = vpop.permute.xlu1 %2065 }
 0x5bb   : > { %2185 = vrot.lane.b32.xlu0 %v2179_v16, %s6313_s20  ;;  %v2925_v16 = vrot.slane %v5707_v45, %v6592_v2 }
 0x5bc   : > { %2189 = vrot.lane.b32.xlu1 %v2181_v54, %s6313_s20  ;;  %v2138_v23 = vpop.permute.xlu1 %2137 }
 0x5bf   : > { %2237 = vrot.lane.b32.xlu0 %v2229_v38, %s6312_s13  ;;  %v2929_v38 = vrot.slane %v5707_v45, %v6594_v3  ;;  %v8894_v45 = vld [vmem:[#allocation37_spill] sm:$0xff] }
 0x5c0   : > { %2285 = vrot.lane.b32.xlu1 %v2277_v15, %s6310_s24 }
 0x5c3   : > { %2281 = vrot.lane.b32.xlu0 %v2275_v42, %s6310_s24 }
 0x5c4   : > { %2235 = vrot.lane.b32.xlu1 %v2228_v46, %s6312_s13  ;;  %v2853_v46 = vrot.slane %v2848_v22, %v6592_v2 }
 0x5c7   : > { %2283 = vrot.lane.b32.xlu0 %v2276_v30, %s6310_s24 }
 0x5c8   : > { %2307 = vrot.lane.b32.xlu1 %v7388_v44, %s6318_s30 }
 0x5cb   : > { %2309 = vrot.lane.b32.xlu0 %v8833_v41, %s6318_s30 }
 0x5cc   : > { %2305 = vrot.lane.b32.xlu1 %v7384_v43, %s6318_s30 }
 0x5cf   : > { %2355 = vrot.lane.b32.xlu0 %v2348_v48, %s6311_s15  ;;  %v2857_v48 = vrot.slane %v2848_v22, %v6594_v3  ;;  %v8889_v22 = vld [vmem:[#allocation30_spill] sm:$0xff] }
 0x5d0   : > { %2357 = vrot.lane.b32.xlu1 %v2349_v18, %s6311_s15 }
 0x5d3   : > { %2353 = vrot.lane.b32.xlu0 %v2347_v51, %s6311_s15 }
 0x5d4   : > { %2448 = vperm.xlu1 %5984, %v5697_v62  }
 0x5d7   : > { %2453 = vperm.xlu0 %5983, %v5698_v49   ;;  %v6004_v49 = vld [vmem:[#allocation9 + $0x8] ss:$20 sps:$4 sm:$0xff]  }
 0x5d8   : > { %2642 = vrot.lane.b32.xlu1 %v2637_v20, %s6311_s15 }
 0x5db   : > { %2644 = vrot.lane.b32.xlu0 %v2641_v24, %s6311_s15 }
 0x5dc   : > { %2714 = vrot.lane.b32.xlu1 %v2709_v5, %s6310_s24 }
 0x5df   : > { %2716 = vrot.lane.b32.xlu0 %v2713_v63, %s6310_s24 }
 0x5e0   : > { %2762 = vrot.lane.b32.xlu1 %v2757_v40, %s6312_s13 }
 0x5e3   : > { %2764 = vrot.lane.b32.xlu0 %v2761_v56, %s6312_s13 }
 0x5e4   : > { %2810 = vrot.lane.b32.xlu1 %v2805_v39, %s6313_s20  ;;  %v6010_v39 = vld [vmem:[#allocation9 + $0x10] ss:$20 sps:$4 sm:$0xff]  }
 0x5e7   : > { %2812 = vrot.lane.b32.xlu0 %v2809_v61, %s6313_s20  ;;  %v6013_v61 = vld [vmem:[#allocation12 + $0x4] ss:$28 sps:$4 sm:$0xff]  }
 0x5e8   : > { %2858 = vrot.lane.b32.xlu1 %v2853_v46, %s6314_s17  ;;  %v8891_v46 = vld [vmem:[#allocation34_spill] sm:$0xff] }
 0x5eb   : > { %2860 = vrot.lane.b32.xlu0 %v2857_v48, %s6314_s17  ;;  %v8892_v48 = vld [vmem:[#allocation35_spill] sm:$0xff] }
 0x5ec   : > { %2930 = vrot.lane.b32.xlu1 %v2925_v16, %s6315_s16  ;;  %v8897_v16 = vld [vmem:[#allocation41_spill] sm:$0xff] }
 0x5ef   : > { %2932 = vrot.lane.b32.xlu0 %v2929_v38, %s6315_s16  ;;  %v8898_v38 = vld [vmem:[#allocation32_spill] sm:$0xff] }
 0x5f3   : > { %2686 = vrot.lane.b32.xlu0 %v8833_v41, %s6316_s22 }
 0x61d   : > { %v2092_v7 = vpop.permute.xlu0 %2091 }
 0x61e   : > { %v2094_v55 = vpop.permute.xlu1 %2093  ;;  %v7473_v42 = vsel %vm612_vm6, %v2090_v57, %v2092_v7 }
 0x61f   : > { %v7462_v0 = vsel %vm612_vm6, %v2092_v7, %v2094_v55  ;;  %8874 = vst [vmem:[#allocation72_spill] sm:$0xff] %v7473_v42  ;;  %v8882_v7 = vmov 0  }
 0x620   : > { %8873 = vst [vmem:[#allocation71_spill] sm:$0xff] %v7462_v0 }
 0x621   : > { %v2070_v33 = vpop.permute.xlu0 %2069 }
 0x622   : > { %v2068_v47 = vpop.permute.xlu1 %2067 }
 0x623   : > { %v7449_v59 = vsel %vm587_vm5, %v2066_v13, %v2068_v47  ;;  %v7452_v32 = vsel %vm587_vm5, %v2068_v47, %v2070_v33  ;;  %v6007_v13 = vld [vmem:[#allocation10 + $0x8] ss:$24 sps:$4 sm:$0xff]  }
 0x624   : > { %8871 = vst [vmem:[#allocation69_spill] sm:$0xff] %v7449_v59  ;;  %8872 = vst [vmem:[#allocation70_spill] sm:$0xff] %v7452_v32  ;;  %2550 = vmatprep.subr.bf16.mxu1 %v7452_v32  ;;  %3169 = vmatprep.subr.bf16.mxu0 %v7452_v32 }
 0x625   : > { %v2188_v28 = vpop.permute.xlu0 %2187  ;;  %2551 = vmatpush1.bf16.msra.mxu1 %v7449_v59  ;;  %3170 = vmatpush1.bf16.msra.mxu0 %v7449_v59 }
 0x626   : > { %2552 = vmatprep.subr.bf16.mxu1 %v7462_v0  ;;  %3171 = vmatprep.subr.bf16.mxu0 %v7462_v0  ;;  %v2140_v54 = vpop.permute.xlu1 %2139 }
 0x627   : > { %v7488_v8 = vsel %vm663_vm4, %v2138_v23, %v2140_v54 }
 0x628   : > { %8876 = vst [vmem:[#allocation74_spill] sm:$0xff] %v7488_v8 }
 0x629   : > { %v2142_v36 = vpop.permute.xlu0 %2141  ;;  %2553 = vmatpush1.bf16.msra.mxu1 %v7473_v42  ;;  %3172 = vmatpush1.bf16.msra.mxu0 %v7473_v42 }
 0x62a   : > { %v7483_v51 = vsel %vm663_vm4, %v2140_v54, %v2142_v36  ;;  %v2234_v30 = vpop.permute.xlu1 %2233  ;;  %v8888_v54 = vld [vmem:[#allocation29_spill] sm:$0xff] }
 0x62b   : > { %8875 = vst [vmem:[#allocation73_spill] sm:$0xff] %v7483_v51  ;;  %2554 = vmatprep.subr.bf16.mxu1 %v7483_v51  ;;  %3173 = vmatprep.subr.bf16.mxu0 %v7483_v51  ;;  %v8890_v36 = vld [vmem:[#allocation33_spill] sm:$0xff] }
 0x62d   : > { %v2186_v50 = vpop.permute.xlu0 %2185  ;;  %2555 = vmatpush1.bf16.msra.mxu1 %v7488_v8  ;;  %3174 = vmatpush1.bf16.msra.mxu0 %v7488_v8 }
 0x62e   : > { %v2190_v19 = vpop.permute.xlu1 %2189  ;;  %v7503_v15 = vsel %vm713_vm3, %v2186_v50, %v2188_v28  ;;  %v8895_v50 = vld [vmem:[#allocation38_spill] sm:$0xff] }
 0x62f   : > { %v7498_v25 = vsel %vm713_vm3, %v2188_v28, %v2190_v19  ;;  %8878 = vst [vmem:[#allocation76_spill] sm:$0xff] %v7503_v15  ;;  %v8896_v19 = vld [vmem:[#allocation40_spill] sm:$0xff] }
 0x630   : > { %8877 = vst [vmem:[#allocation75_spill] sm:$0xff] %v7498_v25  ;;  %2556 = vmatprep.subr.bf16.mxu1 %v7498_v25  ;;  %3175 = vmatprep.subr.bf16.mxu0 %v7498_v25 }
 0x631   : > { %v2238_v53 = vpop.permute.xlu0 %2237  ;;  %2557 = vmatpush1.bf16.msra.mxu1 %v7503_v15  ;;  %3176 = vmatpush1.bf16.msra.mxu0 %v7503_v15 }
 0x632   : > { %2558 = vmatprep.subr.bf16.mxu1 %v7388_v44  ;;  %3177 = vmatprep.subr.bf16.mxu0 %v7388_v44  ;;  %v2286_v18 = vpop.permute.xlu1 %2285 }
 0x635   : > { %v2282_v62 = vpop.permute.xlu0 %2281  ;;  %2559 = vmatpush1.bf16.msra.mxu1 %v7384_v43  ;;  %3178 = vmatpush1.bf16.msra.mxu0 %v7384_v43 }
 0x636   : > { %v2236_v57 = vpop.permute.xlu1 %2235 }
 0x637   : > { %v7516_v23 = vsel %vm690_vm2, %v2234_v30, %v2236_v57  ;;  %v7519_v58 = vsel %vm690_vm2, %v2236_v57, %v2238_v53  ;;  %v8893_v30 = vld [vmem:[#allocation36_spill] sm:$0xff]  ;;  %v8899_v53 = vld [vmem:[#allocation31_spill] sm:$0xff]  ;;  %v8903_v57 = vld [vmem:[#allocation45_spill] sm:$0xff] }
 0x638   : > { %8879 = vst [vmem:[#allocation77_spill] sm:$0xff] %v7516_v23  ;;  %8880 = vst [vmem:[#allocation78_spill] sm:$0xff] %v7519_v58  ;;  %2571 = vmatprep.subr.bf16.mxu1 %v7519_v58  ;;  %3190 = vmatprep.subr.bf16.mxu0 %v7519_v58 }
 0x639   : > { %v2284_v20 = vpop.permute.xlu0 %2283  ;;  %2561 = vmatmul.mubr.bf16.vlgmr.msra.gmra.mrb[4].mxu1 %v6004_v49  ;;  %3180 = vmatmul.mubr.bf16.vlgmr.msra.gmra.mrb[12].mxu0 %v6007_v13  ;;  %v8902_v49 = vld [vmem:[#allocation46_spill] sm:$0xff]  ;;  %v6011_v13 = vld [vmem:[#allocation12] ss:$28 sps:$4 sm:$0xff]  }
 0x63a   : > { %v7526_v24 = vsel %vm640_vm1, %v2284_v20, %v2286_v18  ;;  %2572 = vmatpush1.bf16.msra.mxu1 %v7516_v23  ;;  %3191 = vmatpush1.bf16.msra.mxu0 %v7516_v23  ;;  %v2308_v10 = vpop.permute.xlu1 %2307  ;;  %v7534_v5 = vsel %vm640_vm1, %v2282_v62, %v2284_v20  ;;  %v8900_v18 = vld [vmem:[#allocation44_spill] sm:$0xff]  ;;  %v8901_v62 = vld [vmem:[#allocation43_spill] sm:$0xff]  ;;  %v6016_v20 = vld [vmem:[#allocation12 + $0xc] ss:$28 sps:$4 sm:$0xff]  }
 0x63b   : > { %8881 = vst [vmem:[#allocation79_spill] sm:$0xff] %v7526_v24  ;;  %2573 = vmatprep.subr.bf16.mxu1 %v7526_v24  ;;  %3192 = vmatprep.subr.bf16.mxu0 %v7526_v24  ;;  %8883 = vst [vmem:[#allocation80_spill] sm:$0xff] %v7534_v5 }
 0x63c   : > { %2603 = vmatprep.mubr.bf16.mxu1 %v8882_v7 }
 0x63d   : > { %v2310_v63 = vpop.permute.xlu0 %2309 }
 0x63e   : > { %v7537_v55 = vsel %vm838_vm7, %v2308_v10, %v2310_v63  ;;  %2574 = vmatpush1.bf16.msra.mxu1 %v7534_v5  ;;  %3193 = vmatpush1.bf16.msra.mxu0 %v7534_v5  ;;  %v2306_v60 = vpop.permute.xlu1 %2305 }
 0x63f   : > { %8884 = vst [vmem:[#allocation81_spill] sm:$0xff] %v7537_v55  ;;  %v7542_v33 = vsel %vm838_vm7, %v2306_v60, %v2308_v10  ;;  %2575 = vmatprep.subr.bf16.mxu1 %v7537_v55  ;;  %3194 = vmatprep.subr.bf16.mxu0 %v7537_v55  ;;  %v8904_v10 = vld [vmem:[#allocation39_spill] sm:$0xff]  ;;  %v8905_v60 = vld [vmem:[#allocation42_spill] sm:$0xff] }
 0x640   : > { %8885 = vst [vmem:[#allocation82_spill] sm:$0xff] %v7542_v33 }
 0x641   : > { %v2356_v40 = vpop.permute.xlu0 %2355 }
 0x642   : > { %2576 = vmatpush1.bf16.msra.mxu1 %v7542_v33  ;;  %3195 = vmatpush1.bf16.msra.mxu0 %v7542_v33  ;;  %v2358_v56 = vpop.permute.xlu1 %2357 }
 0x643   : > { %v7549_v47 = vsel %vm564_vm0, %v2356_v40, %v2358_v56 }
 0x644   : > { %8886 = vst [vmem:[#allocation83_spill] sm:$0xff] %v7549_v47  ;;  %2577 = vmatprep.subr.bf16.mxu1 %v7549_v47  ;;  %3196 = vmatprep.subr.bf16.mxu0 %v7549_v47 }
 0x645   : > { %v2354_v52 = vpop.permute.xlu0 %2353 }
 0x646   : > { %v7554_v28 = vsel %vm564_vm0, %v2354_v52, %v2356_v40  ;;  %v8906_v40 = vld [vmem:[#allocation47_spill] sm:$0xff] }
 0x647   : > { %8887 = vst [vmem:[#allocation84_spill] sm:$0xff] %v7554_v28  ;;  %2578 = vmatpush1.bf16.msra.mxu1 %v7554_v28  ;;  %3197 = vmatpush1.bf16.msra.mxu0 %v7554_v28 }
 0x648   : > { %3749 = vmatprep.subr.bf16.mxu1 %v6783_v4 }
 0x64a   : > { %5704 = vmatmul.mubr.msk.bf16.vlgmr.msra.gmra.mrb[4].mxu1 %vm2481_vm10, %v6010_v39  ;;  %v8907_v39 = vld [vmem:[#allocation48_spill] sm:$0xff] }
 0x64b   : > { %3750 = vmatpush1.bf16.msra.mxu1 %v6780_v1  ;;  %3781 = vmatprep.mubr.bf16.mxu1 %v6013_v61  ;;  %v8908_v61 = vld [vmem:[#allocation52_spill] sm:$0xff] }
 0x64c   : > { %3751 = vmatprep.subr.bf16.mxu1 %v6787_v6 }
 0x64f   : > { %3752 = vmatpush1.bf16.msra.mxu1 %v6792_v9 }
 0x650   : > { %3753 = vmatprep.subr.bf16.mxu1 %v6799_v12 }
 0x653   : > { %3754 = vmatpush1.bf16.msra.mxu1 %v6796_v11  ;;  %v7591_v63 = vpop.permute.xlu1 %2448 }
 0x654   : > { %3755 = vmatprep.subr.bf16.mxu1 %v6803_v14 }
 0x657   : > { %3756 = vmatpush1.bf16.msra.mxu1 %v6808_v17  ;;  %v2643_v56 = vpop.permute.xlu1 %2642 }
 0x658   : > { %3757 = vmatprep.subr.bf16.mxu1 %v6663_v27  ;;  %v2650_v52 = vmul.f32 0.0, %v2643_v56 }
 0x65a   : > { %v2656_v7 = vpack.c.bf16 %v2650_v52, %v2650_v52  ;;  %v8915_v52 = vld [vmem:[#allocation58_spill] sm:$0xff] }
 0x65b   : > { %3758 = vmatpush1.bf16.msra.mxu1 %v6659_v26 }
 0x65c   : > { %3759 = vmatprep.subr.bf16.mxu1 %v6817_v29  ;;  %2662 = vrot.lane.b32.xlu1 %v2656_v7, %s6315_s16  ;;  %v8917_v7 = vld [vmem:[#allocation49_spill] sm:$0xff] }
 0x65f   : > { %3760 = vmatpush1.bf16.msra.mxu1 %v6814_v21 }
 0x660   : > { %3761 = vmatprep.subr.bf16.mxu1 %v6821_v31 }
 0x663   : > { %3762 = vmatpush1.bf16.msra.mxu1 %v6826_v34 }
 0x664   : > { %3763 = vmatprep.subr.bf16.mxu1 %v6829_v35 }
 0x667   : > { %3764 = vmatpush1.bf16.msra.mxu1 %v6834_v37 }
 0x668   : > { %3765 = vmatprep.subr.bf16.mxu1 %v8888_v54 }
 0x66b   : > { %3766 = vmatpush1.bf16.msra.mxu1 %v8889_v22 }
 0x66c   : > { %3767 = vmatprep.subr.bf16.mxu1 %v8890_v36 }
 0x66f   : > { %3768 = vmatpush1.bf16.msra.mxu1 %v8891_v46 }
 0x670   : > { %3769 = vmatprep.subr.bf16.mxu1 %v8892_v48 }
 0x673   : > { %3770 = vmatpush1.bf16.msra.mxu1 %v8893_v30 }
 0x674   : > { %3771 = vmatprep.subr.bf16.mxu1 %v8894_v45 }
 0x677   : > { %3772 = vmatpush1.bf16.msra.mxu1 %v8895_v50 }
 0x678   : > { %3773 = vmatprep.subr.bf16.mxu1 %v8896_v19 }
 0x67b   : > { %3774 = vmatpush1.bf16.msra.mxu1 %v8897_v16 }
 0x67c   : > { %3775 = vmatprep.subr.bf16.mxu1 %v8898_v38 }
 0x67f   : > { %3776 = vmatpush1.bf16.msra.mxu1 %v8899_v53 }
 0x680   : > { %3777 = vmatprep.subr.bf16.mxu1 %v8900_v18 }
 0x683   : > { %3778 = vmatpush1.bf16.msra.mxu1 %v8901_v62  ;;  %v8910_v62 = vld [vmem:[#allocation53_spill] sm:$0xff] }
 0x684   : > { %3779 = vmatprep.subr.bf16.mxu1 %v8902_v49  ;;  %v2715_v49 = vpop.permute.xlu1 %2714 }
 0x687   : > { %3780 = vmatpush1.bf16.msra.mxu1 %v8903_v57  ;;  %v2722_v57 = vmul.f32 0.0, %v2715_v49 }
 0x688   : > { %3792 = vmatprep.subr.bf16.mxu1 %v8904_v10  ;;  %v8909_v10 = vld [vmem:[#allocation51_spill] sm:$0xff] }
 0x68a   : > { %3782 = vmatmul.mubr.bf16.vlgmr.msra.gmra.mrb[8].mxu1 %v6011_v13  ;;  %v2728_v13 = vpack.c.bf16 %v2722_v57, %v2722_v57  ;;  %v8920_v57 = vld [vmem:[#allocation61_spill] sm:$0xff] }
 0x68b   : > { %3793 = vmatpush1.bf16.msra.mxu1 %v8905_v60  ;;  %3824 = vmatprep.mubr.bf16.mxu1 %v6016_v20  ;;  %v8911_v20 = vld [vmem:[#allocation54_spill] sm:$0xff]  ;;  %v8913_v60 = vld [vmem:[#allocation56_spill] sm:$0xff] }
 0x68c   : > { %3794 = vmatprep.subr.bf16.mxu1 %v8906_v40  ;;  %2734 = vrot.lane.b32.xlu1 %v2728_v13, %s6314_s17  ;;  %v8912_v40 = vld [vmem:[#allocation55_spill] sm:$0xff]  ;;  %v8921_v13 = vld [vmem:[#allocation62_spill] sm:$0xff] }
 0x68f   : > { %3795 = vmatpush1.bf16.msra.mxu1 %v8907_v39  ;;  %v8914_v39 = vld [vmem:[#allocation57_spill] sm:$0xff] }
 0x690   : > { %3796 = vmatprep.subr.bf16.mxu1 %v8908_v61  ;;  %v8916_v61 = vld [vmem:[#allocation50_spill] sm:$0xff] }
 0x693   : > { %3797 = vmatpush1.bf16.msra.mxu1 %v8909_v10  ;;  %v8918_v10 = vld [vmem:[#allocation60_spill] sm:$0xff] }
 0x694   : > { %3798 = vmatprep.subr.bf16.mxu1 %v8910_v62  ;;  %v8919_v62 = vld [vmem:[#allocation59_spill] sm:$0xff] }
 0x697   : > { %3799 = vmatpush1.bf16.msra.mxu1 %v8911_v20  ;;  %v8922_v20 = vld [vmem:[#allocation63_spill] sm:$0xff] }
 0x698   : > { %3800 = vmatprep.subr.bf16.mxu1 %v8912_v40  ;;  %v8923_v40 = vld [vmem:[#allocation64_spill] sm:$0xff] }
 0x69b   : > { %3801 = vmatpush1.bf16.msra.mxu1 %v8913_v60  ;;  %v8924_v60 = vld [vmem:[#allocation65_spill] sm:$0xff] }
 0x69c   : > { %3802 = vmatprep.subr.bf16.mxu1 %v8914_v39  ;;  %v8925_v39 = vld [vmem:[#allocation66_spill] sm:$0xff] }
 0x69f   : > { %3803 = vmatpush1.bf16.msra.mxu1 %v8915_v52 }
 0x6a0   : > { %3804 = vmatprep.subr.bf16.mxu1 %v8916_v61 }
 0x6a3   : > { %3805 = vmatpush1.bf16.msra.mxu1 %v8917_v7 }
 0x6a4   : > { %3806 = vmatprep.subr.bf16.mxu1 %v8918_v10 }
 0x6a7   : > { %3807 = vmatpush1.bf16.msra.mxu1 %v8919_v62 }
 0x6a8   : > { %3808 = vmatprep.subr.bf16.mxu1 %v8920_v57 }
 0x6ab   : > { %3809 = vmatpush1.bf16.msra.mxu1 %v8921_v13 }
 0x6ac   : > { %3810 = vmatprep.subr.bf16.mxu1 %v8922_v20 }
 0x6af   : > { %3811 = vmatpush1.bf16.msra.mxu1 %v8923_v40 }
 0x6b0   : > { %3812 = vmatprep.subr.bf16.mxu1 %v8924_v60  ;;  %v6014_v60 = vld [vmem:[#allocation12 + $0x8] ss:$28 sps:$4 sm:$0xff]  }
 0x6b3   : > { %3813 = vmatpush1.bf16.msra.mxu1 %v8925_v39 }
 0x6b4   : > { %3814 = vmatprep.subr.bf16.mxu1 %v7452_v32 }
 0x6b7   : > { %3815 = vmatpush1.bf16.msra.mxu1 %v7449_v59 }
 0x6b8   : > { %3816 = vmatprep.subr.bf16.mxu1 %v7462_v0 }
 0x6bb   : > { %3817 = vmatpush1.bf16.msra.mxu1 %v7473_v42 }
 0x6bc   : > { %3818 = vmatprep.subr.bf16.mxu1 %v7483_v51 }
 0x6bf   : > { %3819 = vmatpush1.bf16.msra.mxu1 %v7488_v8 }
 0x6c0   : > { %3820 = vmatprep.subr.bf16.mxu1 %v7498_v25 }
 0x6c3   : > { %3821 = vmatpush1.bf16.msra.mxu1 %v7503_v15 }
 0x6c4   : > { %3822 = vmatprep.subr.bf16.mxu1 %v7388_v44  ;;  %v2454_v44 = vpop.permute.xlu0 %2453 }
 0x6c7   : > { %3823 = vmatpush1.bf16.msra.mxu1 %v7384_v43 }
 0x6c8   : > { %3835 = vmatprep.subr.bf16.mxu1 %v7519_v58  ;;  %v2645_v15 = vpop.permute.xlu0 %2644  ;;  %v7634_v58 = vpop.permute.xlu1 %2762 }
 0x6ca   : > { %3825 = vmatmul.mubr.bf16.vlgmr.msra.gmra.mrb[8].mxu1 %v6014_v60 }
 0x6cb   : > { %3836 = vmatpush1.bf16.msra.mxu1 %v7516_v23 }
 0x6cc   : > { %3837 = vmatprep.subr.bf16.mxu1 %v7526_v24  ;;  %v2717_v43 = vpop.permute.xlu0 %2716  ;;  %v2811_v23 = vpop.permute.xlu1 %2810 }
 0x6cd   : > { %v2718_v42 = vsel %vm640_vm1, %v2715_v49, %v2717_v43 }
 0x6cf   : > { %3838 = vmatpush1.bf16.msra.mxu1 %v7534_v5 }
 0x6d0   : > { %3839 = vmatprep.subr.bf16.mxu1 %v7537_v55  ;;  %v2765_v25 = vpop.permute.xlu0 %2764  ;;  %v2859_v5 = vpop.permute.xlu1 %2858 }
 0x6d1   : > { %v2766_v32 = vsel %vm690_vm2, %v7634_v58, %v2765_v25 }
 0x6d3   : > { %3840 = vmatpush1.bf16.msra.mxu1 %v7542_v33 }
 0x6d4   : > { %3841 = vmatprep.subr.bf16.mxu1 %v7549_v47  ;;  %v7636_v60 = vpop.permute.xlu0 %2812  ;;  %v2931_v33 = vpop.permute.xlu1 %2930 }
 0x6d7   : > { %3842 = vmatpush1.bf16.msra.mxu1 %v7554_v28  ;;  %v2646_v28 = vsel %vm564_vm0, %v2643_v56, %v2645_v15 }
 0x6d8   : > { %v7638_v24 = vpop.permute.xlu0 %2860 }
 0x6d9   : > { %v2862_v56 = vsel %vm663_vm4, %v2859_v5, %v7638_v24 }
 0x6dc   : > { %v7640_v8 = vpop.permute.xlu0 %2932 }
 0x6dd   : > { %v2934_v13 = vsel %vm587_vm5, %v2931_v33, %v7640_v8 }
 0x71d   : > { %v2605_v55 = vpop.f32.mrb[4].mxu1 }
 0x71e   : > { %v5780_v47 = vadd.f32 %v2605_v55, %v7591_v63  ;;  %v2607_v51 = vpop.f32.mrb[5].mxu1  ;;  %v2814_v55 = vsel %vm713_vm3, %v2811_v23, %v7636_v60 }
 0x71f   : > { %v5781_v0 = vadd.f32 %v2607_v51, %v7591_v63  ;;  %v2609_v59 = vpop.f32.mrb[6].mxu1 }
 0x720   : > { %v2614_v39 = vmax.f32 %v5780_v47, 0.0  ;;  %v5782_v40 = vadd.f32 %v2609_v59, %v2454_v44  ;;  %v2611_v20 = vpop.f32.mrb[7].mxu1 }
 0x721   : > { %v2615_v57 = vmax.f32 %v5781_v0, 0.0  ;;  %v5783_v49 = vadd.f32 %v2611_v20, %v2454_v44 }
 0x722   : > { %v2866_v62 = vmul.f32 %v2859_v5, %v2614_v39  ;;  %v2616_v51 = vmax.f32 %v5782_v40, 0.0  ;;  %v7654_v63 = vmul.f32 %v2931_v33, %v2614_v39  ;;  %v2651_v10 = vmul.f32 %v2646_v28, %v2614_v39 }
 0x723   : > { %v2617_v7 = vmax.f32 %v5783_v49, 0.0  ;;  %v7656_v47 = vmul.f32 %v2934_v13, %v2615_v57  ;;  %v2652_v59 = vmul.f32 %v2645_v15, %v2615_v57  ;;  %v2771_v61 = vmul.f32 %v2766_v32, %v2614_v39 }
 0x724   : > { %v7658_v52 = vmul.f32 %v2931_v33, %v2616_v51  ;;  %v7660_v18 = vpack.c.bf16 %v2616_v51, %v2614_v39  ;;  %v2654_v53 = vmul.f32 %v2646_v28, %v2616_v51  ;;  %v2774_v38 = vmul.f32 %v2766_v32, %v2616_v51 }
 0x725   : > { %v2942_v16 = vmul.f32 %v2934_v13, %v2617_v7  ;;  %v7662_v19 = vpack.c.bf16 %v2617_v7, %v2615_v57  ;;  %v2655_v44 = vmul.f32 %v2645_v15, %v2617_v7  ;;  %v2723_v0 = vmul.f32 %v2718_v42, %v2614_v39 }
 0x726   : > { %8926 = vst [vmem:[#allocation85_spill] sm:$0xff] %v7660_v18  ;;  %2688 = vrot.lane.b32.xlu0 %v7660_v18, %s6316_s22  ;;  %v2657_v40 = vpack.c.bf16 %v2654_v53, %v2651_v10  ;;  %v2777_v20 = vpack.c.bf16 %v2774_v38, %v2771_v61  ;;  %v2726_v49 = vmul.f32 %v2718_v42, %v2616_v51 }
 0x727   : > { %8927 = vst [vmem:[#allocation86_spill] sm:$0xff] %v7662_v19  ;;  %v2724_v50 = vmul.f32 %v2717_v43, %v2615_v57  ;;  %2690 = vrot.lane.b32.xlu1 %v7662_v19, %s6316_s22  ;;  %v2658_v33 = vpack.c.bf16 %v2655_v44, %v2652_v59  ;;  %v2727_v45 = vmul.f32 %v2717_v43, %v2617_v7 }
 0x728   : > { %v2818_v30 = vmul.f32 %v2811_v23, %v2614_v39  ;;  %v2821_v28 = vmul.f32 %v2811_v23, %v2616_v51  ;;  %v2729_v32 = vpack.c.bf16 %v2726_v49, %v2723_v0  ;;  %v2772_v13 = vmul.f32 %v2765_v25, %v2615_v57  ;;  %v3251_v39 = vld [vmem:[%s8635_s12] ss:$2 sm:$0x3]  ;;  %v5718_v49 = vld [vmem:[%s8635_s12 + $0x1] ss:$2 sm:$0x3] }
 0x729   : > { %v2775_v48 = vmul.f32 %v2765_v25, %v2617_v7  ;;  %v2869_v46 = vmul.f32 %v2859_v5, %v2616_v51  ;;  %v2730_v15 = vpack.c.bf16 %v2727_v45, %v2724_v50  ;;  %v2819_v22 = vmul.f32 %v2814_v55, %v2615_v57  ;;  %v5708_v45 = vld [vmem:[%s8632_s9 + $0x40] sm:$0xff]  ;;  %v2663_v50 = vpop.permute.xlu1 %2662 }
 0x72a   : > { %v2824_v36 = vpack.c.bf16 %v2821_v28, %v2818_v30  ;;  %v2822_v54 = vmul.f32 %v2814_v55, %v2617_v7  ;;  %2666 = vrot.lane.b32.xlu0 %v2658_v33, %s6315_s16  ;;  %v2867_v53 = vmul.f32 %v2862_v56, %v2615_v57  ;;  %v2870_v10 = vmul.f32 %v2862_v56, %v2617_v7  ;;  %v5717_v57 = vld [vmem:[%s8635_s12 + $0x1] ss:$2 sm:$0x3] }
 0x72b   : > { %v2778_v38 = vpack.c.bf16 %v2775_v48, %v2772_v13  ;;  %v2872_v42 = vpack.c.bf16 %v2869_v46, %v2866_v62  ;;  %2664 = vrot.lane.b32.xlu1 %v2657_v40, %s6315_s16  ;;  %v2945_v43 = vpack.c.bf16 %v2942_v16, %v7656_v47  ;;  %v2944_v23 = vpack.c.bf16 %v7658_v52, %v7654_v63  ;;  %v2687_v16 = vpop.permute.xlu0 %2686  ;;  %v3371_v63 = vld [vmem:[%s8635_s12] ss:$2 sm:$0x3] }
 0x72c   : > { %v2825_v61 = vpack.c.bf16 %v2822_v54, %v2819_v22  ;;  %v2873_v25 = vpack.c.bf16 %v2870_v10, %v2867_v53  ;;  %v2770_v5 = vmul.f32 0.0, %v7634_v58  ;;  %v2820_v48 = vmul.f32 0.0, %v7636_v60  ;;  %v6017_v58 = vld [vmem:[#allocation10 + $0x14] ss:$24 sps:$4 sm:$0xff]  }
 0x72d   : > { %v2868_v46 = vmul.f32 0.0, %v7638_v24  ;;  %v2940_v24 = vmul.f32 0.0, %v7640_v8  ;;  %5716 = vmatprep.mubr.msk.bf16.mxu0 %vm3100_vm11, %v6017_v58  ;;  %v5709_v8 = vld [vmem:[%s8632_s9 + $0x48] sm:$0xff]  ;;  %v2735_v62 = vpop.permute.xlu1 %2734  ;;  %v3256_v52 = vrot.slane %v3251_v39, %v6592_v2  ;;  %v3260_v7 = vrot.slane %v3251_v39, %v6594_v3 }
 0x72e   : > { %2784 = vrot.lane.b32.xlu0 %v2777_v20, %s6313_s20  ;;  %v2776_v54 = vpack.c.bf16 %v2770_v5, %v2770_v5  ;;  %v2826_v22 = vpack.c.bf16 %v2820_v48, %v2820_v48  ;;  %v3328_v55 = vrot.slane %v5717_v57, %v6592_v2  ;;  %v3332_v56 = vrot.slane %v5717_v57, %v6594_v3  ;;  %v5719_v5 = vld [vmem:[%s8635_s12 + $0x1] ss:$2 sm:$0x3] }
 0x72f   : > { %2736 = vrot.lane.b32.xlu1 %v2729_v32, %s6314_s17  ;;  %v2874_v30 = vpack.c.bf16 %v2868_v46, %v2868_v46  ;;  %v3376_v59 = vrot.slane %v3371_v63, %v6592_v2  ;;  %v3380_v44 = vrot.slane %v3371_v63, %v6594_v3  ;;  %v3424_v32 = vrot.slane %v5718_v49, %v6592_v2 }
 0x730   : > { %v3428_v13 = vrot.slane %v5718_v49, %v6594_v3 }
 0x732   : > { %2738 = vrot.lane.b32.xlu0 %v2730_v15, %s6314_s17 }
 0x733   : > { %2830 = vrot.lane.b32.xlu1 %v2824_v36, %s6312_s13  ;;  %v2946_v36 = vpack.c.bf16 %v2940_v24, %v2940_v24 }
 0x736   : > { %2782 = vrot.lane.b32.xlu0 %v2776_v54, %s6313_s20 }
 0x737   : > { %2786 = vrot.lane.b32.xlu1 %v2778_v38, %s6313_s20 }
 0x73a   : > { %2834 = vrot.lane.b32.xlu0 %v2826_v22, %s6312_s13  ;;  %v3544_v22 = vrot.slane %v5719_v5, %v6592_v2 }
 0x73b   : > { %2882 = vrot.lane.b32.xlu1 %v2874_v30, %s6310_s24  ;;  %v3548_v30 = vrot.slane %v5719_v5, %v6594_v3  ;;  %v8951_v5 = vld [vmem:[#allocation38_spill] sm:$0xff] }
 0x73e   : > { %2878 = vrot.lane.b32.xlu0 %v2872_v42, %s6310_s24  ;;  %v3467_v42 = vld [vmem:[%s8635_s12] ss:$2 sm:$0x3] }
 0x73f   : > { %2832 = vrot.lane.b32.xlu1 %v2825_v61, %s6312_s13  ;;  %v3472_v10 = vrot.slane %v3467_v42, %v6592_v2  ;;  %v3476_v61 = vrot.slane %v3467_v42, %v6594_v3  ;;  %v8946_v42 = vld [vmem:[#allocation33_spill] sm:$0xff] }
 0x742   : > { %2880 = vrot.lane.b32.xlu0 %v2873_v25, %s6310_s24 }
 0x743   : > { %2904 = vrot.lane.b32.xlu1 %v7662_v19, %s6318_s30 }
 0x746   : > { %2906 = vrot.lane.b32.xlu0 %v8833_v41, %s6318_s30 }
 0x747   : > { %2902 = vrot.lane.b32.xlu1 %v7660_v18, %s6318_s30 }
 0x74a   : > { %2952 = vrot.lane.b32.xlu0 %v2945_v43, %s6311_s15 }
 0x74b   : > { %2954 = vrot.lane.b32.xlu1 %v2946_v36, %s6311_s15 }
 0x74e   : > { %2950 = vrot.lane.b32.xlu0 %v2944_v23, %s6311_s15 }
 0x74f   : > { %3063 = vperm.xlu1 %5984, %v5708_v45  }
 0x752   : > { %3068 = vperm.xlu0 %5983, %v5709_v8  }
 0x753   : > { %3261 = vrot.lane.b32.xlu1 %v3256_v52, %s6311_s15 }
 0x756   : > { %3263 = vrot.lane.b32.xlu0 %v3260_v7, %s6311_s15 }
 0x757   : > { %3333 = vrot.lane.b32.xlu1 %v3328_v55, %s6310_s24 }
 0x75a   : > { %3335 = vrot.lane.b32.xlu0 %v3332_v56, %s6310_s24 }
 0x75b   : > { %3381 = vrot.lane.b32.xlu1 %v3376_v59, %s6312_s13  ;;  %v4395_v59 = vld [vmem:[#allocation13] sm:$0xff] }
 0x75e   : > { %3383 = vrot.lane.b32.xlu0 %v3380_v44, %s6312_s13  ;;  %v4399_v44 = vld [vmem:[#allocation13 + $0x20] sm:$0xff] }
 0x75f   : > { %3429 = vrot.lane.b32.xlu1 %v3424_v32, %s6313_s20  ;;  %v5736_v32 = vcombine.high %v4395_v59, %v4399_v44 }
 0x762   : > { %3431 = vrot.lane.b32.xlu0 %v3428_v13, %s6313_s20  ;;  %v8944_v13 = vld [vmem:[#allocation29_spill] sm:$0xff] }
 0x763   : > { %3477 = vrot.lane.b32.xlu1 %v3472_v10, %s6314_s17  ;;  %v8948_v10 = vld [vmem:[#allocation35_spill] sm:$0xff] }
 0x766   : > { %3479 = vrot.lane.b32.xlu0 %v3476_v61, %s6314_s17  ;;  %v8949_v61 = vld [vmem:[#allocation36_spill] sm:$0xff] }
 0x767   : > { %3549 = vrot.lane.b32.xlu1 %v3544_v22, %s6315_s16  ;;  %v8954_v22 = vld [vmem:[#allocation32_spill] sm:$0xff] }
 0x76a   : > { %3551 = vrot.lane.b32.xlu0 %v3548_v30, %s6315_s16  ;;  %v8955_v30 = vld [vmem:[#allocation31_spill] sm:$0xff] }
 0x76e   : > { %3305 = vrot.lane.b32.xlu0 %v8833_v41, %s6316_s22 }
 0x798   : > { %v2689_v60 = vpop.permute.xlu0 %2688 }
 0x799   : > { %v2691_v51 = vpop.permute.xlu1 %2690  ;;  %v7747_v38 = vsel %vm612_vm6, %v2687_v16, %v2689_v60 }
 0x79a   : > { %v7736_v33 = vsel %vm612_vm6, %v2689_v60, %v2691_v51  ;;  %8931 = vst [vmem:[#allocation90_spill] sm:$0xff] %v7747_v38 }
 0x79b   : > { %8930 = vst [vmem:[#allocation89_spill] sm:$0xff] %v7736_v33 }
 0x79c   : > { %v2667_v47 = vpop.permute.xlu0 %2666 }
 0x79d   : > { %v2665_v0 = vpop.permute.xlu1 %2664 }
 0x79e   : > { %v7723_v40 = vsel %vm587_vm5, %v2665_v0, %v2667_v47  ;;  %v7726_v20 = vsel %vm587_vm5, %v2663_v50, %v2665_v0 }
 0x79f   : > { %8928 = vst [vmem:[#allocation87_spill] sm:$0xff] %v7723_v40  ;;  %8929 = vst [vmem:[#allocation88_spill] sm:$0xff] %v7726_v20  ;;  %3198 = vmatprep.subr.bf16.mxu0 %v7723_v40  ;;  %3843 = vmatprep.subr.bf16.mxu1 %v7723_v40 }
 0x7a0   : > { %v2785_v28 = vpop.permute.xlu0 %2784  ;;  %3199 = vmatpush1.bf16.msra.mxu0 %v7726_v20  ;;  %3844 = vmatpush1.bf16.msra.mxu1 %v7726_v20 }
 0x7a1   : > { %3200 = vmatprep.subr.bf16.mxu0 %v7736_v33  ;;  %3845 = vmatprep.subr.bf16.mxu1 %v7736_v33  ;;  %v2737_v15 = vpop.permute.xlu1 %2736 }
 0x7a2   : > { %v7762_v25 = vsel %vm663_vm4, %v2735_v62, %v2737_v15 }
 0x7a3   : > { %8933 = vst [vmem:[#allocation92_spill] sm:$0xff] %v7762_v25 }
 0x7a4   : > { %v2739_v53 = vpop.permute.xlu0 %2738  ;;  %3201 = vmatpush1.bf16.msra.mxu0 %v7747_v38  ;;  %3846 = vmatpush1.bf16.msra.mxu1 %v7747_v38 }
 0x7a5   : > { %v7757_v43 = vsel %vm663_vm4, %v2737_v15, %v2739_v53  ;;  %v2831_v23 = vpop.permute.xlu1 %2830  ;;  %v8945_v15 = vld [vmem:[#allocation30_spill] sm:$0xff] }
 0x7a6   : > { %8932 = vst [vmem:[#allocation91_spill] sm:$0xff] %v7757_v43  ;;  %3202 = vmatprep.subr.bf16.mxu0 %v7757_v43  ;;  %3847 = vmatprep.subr.bf16.mxu1 %v7757_v43  ;;  %v8947_v53 = vld [vmem:[#allocation34_spill] sm:$0xff] }
 0x7a8   : > { %v2783_v48 = vpop.permute.xlu0 %2782  ;;  %3203 = vmatpush1.bf16.msra.mxu0 %v7762_v25  ;;  %3848 = vmatpush1.bf16.msra.mxu1 %v7762_v25 }
 0x7a9   : > { %v2787_v46 = vpop.permute.xlu1 %2786  ;;  %v7777_v58 = vsel %vm713_vm3, %v2783_v48, %v2785_v28  ;;  %v8952_v48 = vld [vmem:[#allocation40_spill] sm:$0xff] }
 0x7aa   : > { %v7772_v54 = vsel %vm713_vm3, %v2785_v28, %v2787_v46  ;;  %8935 = vst [vmem:[#allocation94_spill] sm:$0xff] %v7777_v58  ;;  %v6019_v28 = vld [vmem:[#allocation10 + $0x10] ss:$24 sps:$4 sm:$0xff]  }
 0x7ab   : > { %8934 = vst [vmem:[#allocation93_spill] sm:$0xff] %v7772_v54  ;;  %3204 = vmatprep.subr.bf16.mxu0 %v7772_v54  ;;  %3849 = vmatprep.subr.bf16.mxu1 %v7772_v54  ;;  %v8953_v46 = vld [vmem:[#allocation41_spill] sm:$0xff] }
 0x7ac   : > { %v2835_v24 = vpop.permute.xlu0 %2834  ;;  %3205 = vmatpush1.bf16.msra.mxu0 %v7777_v58  ;;  %3850 = vmatpush1.bf16.msra.mxu1 %v7777_v58 }
 0x7ad   : > { %3206 = vmatprep.subr.bf16.mxu0 %v7662_v19  ;;  %3851 = vmatprep.subr.bf16.mxu1 %v7662_v19  ;;  %v2883_v36 = vpop.permute.xlu1 %2882 }
 0x7b0   : > { %v2879_v45 = vpop.permute.xlu0 %2878  ;;  %3207 = vmatpush1.bf16.msra.mxu0 %v7660_v18  ;;  %3852 = vmatpush1.bf16.msra.mxu1 %v7660_v18 }
 0x7b1   : > { %v2833_v8 = vpop.permute.xlu1 %2832 }
 0x7b2   : > { %v7790_v50 = vsel %vm690_vm2, %v2833_v8, %v2835_v24  ;;  %v7793_v16 = vsel %vm690_vm2, %v2831_v23, %v2833_v8  ;;  %v8950_v23 = vld [vmem:[#allocation37_spill] sm:$0xff]  ;;  %v8956_v24 = vld [vmem:[#allocation44_spill] sm:$0xff] }
 0x7b3   : > { %8936 = vst [vmem:[#allocation95_spill] sm:$0xff] %v7790_v50  ;;  %8937 = vst [vmem:[#allocation96_spill] sm:$0xff] %v7793_v16  ;;  %3208 = vmatprep.subr.bf16.mxu0 %v7790_v50  ;;  %3853 = vmatprep.subr.bf16.mxu1 %v7790_v50  ;;  %v4396_v8 = vld [vmem:[#allocation13 + $0x8] sm:$0xff] }
 0x7b4   : > { %v2881_v62 = vpop.permute.xlu0 %2880  ;;  %3209 = vmatpush1.bf16.msra.mxu0 %v7793_v16  ;;  %3854 = vmatpush1.bf16.msra.mxu1 %v7793_v16 }
 0x7b5   : > { %v2905_v39 = vpop.permute.xlu1 %2904  ;;  %v7802_v52 = vsel %vm640_vm1, %v2881_v62, %v2883_v36  ;;  %v7807_v7 = vsel %vm640_vm1, %v2879_v45, %v2881_v62  ;;  %v8957_v36 = vld [vmem:[#allocation43_spill] sm:$0xff]  ;;  %v8958_v45 = vld [vmem:[#allocation46_spill] sm:$0xff]  ;;  %v4400_v62 = vld [vmem:[#allocation13 + $0x28] sm:$0xff] }
 0x7b6   : > { %8938 = vst [vmem:[#allocation97_spill] sm:$0xff] %v7802_v52  ;;  %3210 = vmatprep.subr.bf16.mxu0 %v7802_v52  ;;  %3855 = vmatprep.subr.bf16.mxu1 %v7802_v52  ;;  %8939 = vst [vmem:[#allocation98_spill] sm:$0xff] %v7807_v7 }
 0x7b8   : > { %v2907_v57 = vpop.permute.xlu0 %2906  ;;  %3211 = vmatpush1.bf16.msra.mxu0 %v7807_v7  ;;  %3856 = vmatpush1.bf16.msra.mxu1 %v7807_v7 }
 0x7b9   : > { %v7812_v60 = vsel %vm838_vm7, %v2905_v39, %v2907_v57  ;;  %v2903_v55 = vpop.permute.xlu1 %2902  ;;  %v8959_v57 = vld [vmem:[#allocation45_spill] sm:$0xff] }
 0x7ba   : > { %8940 = vst [vmem:[#allocation99_spill] sm:$0xff] %v7812_v60  ;;  %v7815_v56 = vsel %vm838_vm7, %v2903_v55, %v2905_v39  ;;  %3212 = vmatprep.subr.bf16.mxu0 %v7812_v60  ;;  %3857 = vmatprep.subr.bf16.mxu1 %v7812_v60  ;;  %v5735_v39 = vcombine.low %v4395_v59, %v4399_v44  ;;  %v8964_v59 = vld [vmem:[#allocation52_spill] sm:$0xff] }
 0x7bb   : > { %8941 = vst [vmem:[#allocation100_spill] sm:$0xff] %v7815_v56  ;;  %v5738_v55 = vcombine.high %v4396_v8, %v4400_v62 }
 0x7bc   : > { %v2953_v51 = vpop.permute.xlu0 %2952  ;;  %3213 = vmatpush1.bf16.msra.mxu0 %v7815_v56  ;;  %3858 = vmatpush1.bf16.msra.mxu1 %v7815_v56 }
 0x7bd   : > { %v2955_v63 = vpop.permute.xlu1 %2954 }
 0x7be   : > { %v7822_v47 = vsel %vm564_vm0, %v2953_v51, %v2955_v63 }
 0x7bf   : > { %8942 = vst [vmem:[#allocation101_spill] sm:$0xff] %v7822_v47  ;;  %3214 = vmatprep.subr.bf16.mxu0 %v7822_v47  ;;  %3859 = vmatprep.subr.bf16.mxu1 %v7822_v47 }
 0x7c0   : > { %v2951_v0 = vpop.permute.xlu0 %2950 }
 0x7c1   : > { %v7827_v49 = vsel %vm564_vm0, %v2951_v0, %v2953_v51  ;;  %v8960_v51 = vld [vmem:[#allocation39_spill] sm:$0xff]  ;;  %v8961_v0 = vld [vmem:[#allocation42_spill] sm:$0xff] }
 0x7c2   : > { %8943 = vst [vmem:[#allocation102_spill] sm:$0xff] %v7827_v49  ;;  %3215 = vmatpush1.bf16.msra.mxu0 %v7827_v49  ;;  %3860 = vmatpush1.bf16.msra.mxu1 %v7827_v49 }
 0x7c3   : > { %4459 = vmatprep.subr.bf16.mxu0 %v6783_v4 }
 0x7c5   : > { %3223 = vmatmul.mubr.bf16.vlgmr.msra.gmra.mrb[12].mxu0 %v6019_v28  ;;  %v8962_v28 = vld [vmem:[#allocation47_spill] sm:$0xff] }
 0x7c6   : > { %4460 = vmatpush1.bf16.msra.mxu0 %v6780_v1  ;;  %4491 = vmatprep.mubr.bf16.mxu0 %v5736_v32 }
 0x7c7   : > { %4461 = vmatprep.subr.bf16.mxu0 %v6787_v6 }
 0x7ca   : > { %4462 = vmatpush1.bf16.msra.mxu0 %v6792_v9 }
 0x7cb   : > { %4463 = vmatprep.subr.bf16.mxu0 %v6799_v12 }
 0x7ce   : > { %4464 = vmatpush1.bf16.msra.mxu0 %v6796_v11  ;;  %v7864_v63 = vpop.permute.xlu1 %3063 }
 0x7cf   : > { %4465 = vmatprep.subr.bf16.mxu0 %v6803_v14 }
 0x7d2   : > { %4466 = vmatpush1.bf16.msra.mxu0 %v6808_v17  ;;  %v7868_v32 = vpop.permute.xlu1 %3261 }
 0x7d3   : > { %4467 = vmatprep.subr.bf16.mxu0 %v6663_v27 }
 0x7d6   : > { %4468 = vmatpush1.bf16.msra.mxu0 %v6659_v26 }
 0x7d7   : > { %4469 = vmatprep.subr.bf16.mxu0 %v6817_v29 }
 0x7da   : > { %4470 = vmatpush1.bf16.msra.mxu0 %v6814_v21 }
 0x7db   : > { %4471 = vmatprep.subr.bf16.mxu0 %v6821_v31 }
 0x7de   : > { %4472 = vmatpush1.bf16.msra.mxu0 %v6826_v34 }
 0x7df   : > { %4473 = vmatprep.subr.bf16.mxu0 %v6829_v35 }
 0x7e2   : > { %4474 = vmatpush1.bf16.msra.mxu0 %v6834_v37  ;;  %v6022_v37 = vld [vmem:[#allocation12 + $0x14] ss:$28 sps:$4 sm:$0xff]  }
 0x7e3   : > { %4475 = vmatprep.subr.bf16.mxu0 %v8944_v13  ;;  %3867 = vmatprep.mubr.bf16.mxu1 %v6022_v37 }
 0x7e6   : > { %4476 = vmatpush1.bf16.msra.mxu0 %v8945_v15 }
 0x7e7   : > { %4477 = vmatprep.subr.bf16.mxu0 %v8946_v42 }
 0x7ea   : > { %4478 = vmatpush1.bf16.msra.mxu0 %v8947_v53 }
 0x7eb   : > { %4479 = vmatprep.subr.bf16.mxu0 %v8948_v10 }
 0x7ee   : > { %4480 = vmatpush1.bf16.msra.mxu0 %v8949_v61 }
 0x7ef   : > { %4481 = vmatprep.subr.bf16.mxu0 %v8950_v23 }
 0x7f2   : > { %4482 = vmatpush1.bf16.msra.mxu0 %v8951_v5 }
 0x7f3   : > { %4483 = vmatprep.subr.bf16.mxu0 %v8952_v48 }
 0x7f6   : > { %4484 = vmatpush1.bf16.msra.mxu0 %v8953_v46 }
 0x7f7   : > { %4485 = vmatprep.subr.bf16.mxu0 %v8954_v22 }
 0x7fa   : > { %4486 = vmatpush1.bf16.msra.mxu0 %v8955_v30  ;;  %v8972_v30 = vld [vmem:[#allocation50_spill] sm:$0xff] }
 0x7fb   : > { %4487 = vmatprep.subr.bf16.mxu0 %v8956_v24  ;;  %v8968_v24 = vld [vmem:[#allocation55_spill] sm:$0xff] }
 0x7fe   : > { %4488 = vmatpush1.bf16.msra.mxu0 %v8957_v36  ;;  %v8963_v36 = vld [vmem:[#allocation48_spill] sm:$0xff] }
 0x7ff   : > { %4489 = vmatprep.subr.bf16.mxu0 %v8958_v45  ;;  %v3269_v45 = vmul.f32 0.0, %v7868_v32 }
 0x801   : > { %v3275_v44 = vpack.c.bf16 %v3269_v45, %v3269_v45  ;;  %v8970_v45 = vld [vmem:[#allocation57_spill] sm:$0xff] }
 0x802   : > { %4490 = vmatpush1.bf16.msra.mxu0 %v8959_v57  ;;  %v7873_v57 = vpop.permute.xlu1 %3333 }
 0x803   : > { %4502 = vmatprep.subr.bf16.mxu0 %v8960_v51  ;;  %v3341_v51 = vmul.f32 0.0, %v7873_v57  ;;  %3281 = vrot.lane.b32.xlu1 %v3275_v44, %s6315_s16  ;;  %v8973_v44 = vld [vmem:[#allocation49_spill] sm:$0xff] }
 0x805   : > { %4492 = vmatmul.mubr.bf16.vlgmr.msra.gmra.mrb[16].mxu0 %v5735_v39  ;;  %v8965_v39 = vld [vmem:[#allocation51_spill] sm:$0xff] }
 0x806   : > { %4503 = vmatpush1.bf16.msra.mxu0 %v8961_v0  ;;  %4534 = vmatprep.mubr.bf16.mxu0 %v5738_v55  ;;  %v8966_v55 = vld [vmem:[#allocation53_spill] sm:$0xff]  ;;  %v8967_v0 = vld [vmem:[#allocation54_spill] sm:$0xff] }
 0x807   : > { %4504 = vmatprep.subr.bf16.mxu0 %v8962_v28  ;;  %v3347_v28 = vpack.c.bf16 %v3341_v51, %v3341_v51  ;;  %v8976_v51 = vld [vmem:[#allocation61_spill] sm:$0xff] }
 0x809   : > { %3353 = vrot.lane.b32.xlu1 %v3347_v28, %s6314_s17  ;;  %v8977_v28 = vld [vmem:[#allocation62_spill] sm:$0xff] }
 0x80a   : > { %4505 = vmatpush1.bf16.msra.mxu0 %v8963_v36  ;;  %v8969_v36 = vld [vmem:[#allocation56_spill] sm:$0xff] }
 0x80b   : > { %4506 = vmatprep.subr.bf16.mxu0 %v8964_v59  ;;  %v8971_v59 = vld [vmem:[#allocation58_spill] sm:$0xff] }
 0x80e   : > { %4507 = vmatpush1.bf16.msra.mxu0 %v8965_v39  ;;  %v8974_v39 = vld [vmem:[#allocation60_spill] sm:$0xff] }
 0x80f   : > { %4508 = vmatprep.subr.bf16.mxu0 %v8966_v55  ;;  %v8975_v55 = vld [vmem:[#allocation59_spill] sm:$0xff] }
 0x812   : > { %4509 = vmatpush1.bf16.msra.mxu0 %v8967_v0  ;;  %v8978_v0 = vld [vmem:[#allocation63_spill] sm:$0xff] }
 0x813   : > { %4510 = vmatprep.subr.bf16.mxu0 %v8968_v24  ;;  %v8979_v24 = vld [vmem:[#allocation64_spill] sm:$0xff] }
 0x816   : > { %4511 = vmatpush1.bf16.msra.mxu0 %v8969_v36  ;;  %v8980_v36 = vld [vmem:[#allocation65_spill] sm:$0xff] }
 0x817   : > { %4512 = vmatprep.subr.bf16.mxu0 %v8970_v45  ;;  %v8981_v45 = vld [vmem:[#allocation66_spill] sm:$0xff] }
 0x81a   : > { %4513 = vmatpush1.bf16.msra.mxu0 %v8971_v59  ;;  %v8982_v59 = vld [vmem:[#allocation70_spill] sm:$0xff] }
 0x81b   : > { %4514 = vmatprep.subr.bf16.mxu0 %v8972_v30  ;;  %v8983_v30 = vld [vmem:[#allocation69_spill] sm:$0xff] }
 0x81e   : > { %4515 = vmatpush1.bf16.msra.mxu0 %v8973_v44  ;;  %v8984_v44 = vld [vmem:[#allocation71_spill] sm:$0xff] }
 0x81f   : > { %4516 = vmatprep.subr.bf16.mxu0 %v8974_v39  ;;  %v8985_v39 = vld [vmem:[#allocation72_spill] sm:$0xff] }
 0x822   : > { %4517 = vmatpush1.bf16.msra.mxu0 %v8975_v55  ;;  %v8986_v55 = vld [vmem:[#allocation73_spill] sm:$0xff] }
 0x823   : > { %4518 = vmatprep.subr.bf16.mxu0 %v8976_v51  ;;  %v8987_v51 = vld [vmem:[#allocation74_spill] sm:$0xff] }
 0x826   : > { %4519 = vmatpush1.bf16.msra.mxu0 %v8977_v28  ;;  %v8988_v28 = vld [vmem:[#allocation75_spill] sm:$0xff] }
 0x827   : > { %4520 = vmatprep.subr.bf16.mxu0 %v8978_v0  ;;  %v8989_v0 = vld [vmem:[#allocation76_spill] sm:$0xff] }
 0x82a   : > { %4521 = vmatpush1.bf16.msra.mxu0 %v8979_v24  ;;  %v8990_v24 = vld [vmem:[#allocation68_spill] sm:$0xff] }
 0x82b   : > { %4522 = vmatprep.subr.bf16.mxu0 %v8980_v36  ;;  %v5737_v36 = vcombine.low %v4396_v8, %v4400_v62 }
 0x82e   : > { %4523 = vmatpush1.bf16.msra.mxu0 %v8981_v45  ;;  %v8991_v45 = vld [vmem:[#allocation67_spill] sm:$0xff] }
 0x82f   : > { %4524 = vmatprep.subr.bf16.mxu0 %v8982_v59  ;;  %v8992_v59 = vld [vmem:[#allocation78_spill] sm:$0xff] }
 0x832   : > { %4525 = vmatpush1.bf16.msra.mxu0 %v8983_v30  ;;  %v8993_v30 = vld [vmem:[#allocation77_spill] sm:$0xff] }
 0x833   : > { %4526 = vmatprep.subr.bf16.mxu0 %v8984_v44  ;;  %v8994_v44 = vld [vmem:[#allocation79_spill] sm:$0xff] }
 0x836   : > { %4527 = vmatpush1.bf16.msra.mxu0 %v8985_v39  ;;  %v8995_v39 = vld [vmem:[#allocation80_spill] sm:$0xff] }
 0x837   : > { %4528 = vmatprep.subr.bf16.mxu0 %v8986_v55  ;;  %v8996_v55 = vld [vmem:[#allocation81_spill] sm:$0xff] }
 0x83a   : > { %4529 = vmatpush1.bf16.msra.mxu0 %v8987_v51  ;;  %v8997_v51 = vld [vmem:[#allocation82_spill] sm:$0xff] }
 0x83b   : > { %4530 = vmatprep.subr.bf16.mxu0 %v8988_v28  ;;  %v8998_v28 = vld [vmem:[#allocation83_spill] sm:$0xff] }
 0x83e   : > { %4531 = vmatpush1.bf16.msra.mxu0 %v8989_v0  ;;  %v8999_v0 = vld [vmem:[#allocation84_spill] sm:$0xff] }
 0x83f   : > { %4532 = vmatprep.subr.bf16.mxu0 %v8990_v24 }
 0x842   : > { %4533 = vmatpush1.bf16.msra.mxu0 %v8991_v45 }
 0x843   : > { %4545 = vmatprep.subr.bf16.mxu0 %v8992_v59 }
 0x845   : > { %4535 = vmatmul.mubr.bf16.vlgmr.msra.gmra.mrb[16].mxu0 %v5737_v36  ;;  %v3069_v36 = vpop.permute.xlu0 %3068 }
 0x846   : > { %4546 = vmatpush1.bf16.msra.mxu0 %v8993_v30 }
 0x847   : > { %4547 = vmatprep.subr.bf16.mxu0 %v8994_v44 }
 0x849   : > { %v3264_v8 = vpop.permute.xlu0 %3263 }
 0x84a   : > { %4548 = vmatpush1.bf16.msra.mxu0 %v8995_v39 }
 0x84b   : > { %4549 = vmatprep.subr.bf16.mxu0 %v8996_v55 }
 0x84d   : > { %v3336_v62 = vpop.permute.xlu0 %3335 }
 0x84e   : > { %4550 = vmatpush1.bf16.msra.mxu0 %v8997_v51 }
 0x84f   : > { %4551 = vmatprep.subr.bf16.mxu0 %v8998_v28 }
 0x852   : > { %4552 = vmatpush1.bf16.msra.mxu0 %v8999_v0 }
 0x853   : > { %4553 = vmatprep.subr.bf16.mxu0 %v7723_v40 }
 0x856   : > { %4554 = vmatpush1.bf16.msra.mxu0 %v7726_v20 }
 0x857   : > { %4555 = vmatprep.subr.bf16.mxu0 %v7736_v33 }
 0x85a   : > { %4556 = vmatpush1.bf16.msra.mxu0 %v7747_v38 }
 0x85b   : > { %4557 = vmatprep.subr.bf16.mxu0 %v7757_v43 }
 0x85e   : > { %4558 = vmatpush1.bf16.msra.mxu0 %v7762_v25  ;;  %v3337_v25 = vsel %vm640_vm1, %v7873_v57, %v3336_v62 }
 0x85f   : > { %4559 = vmatprep.subr.bf16.mxu0 %v7772_v54 }
 0x862   : > { %4560 = vmatpush1.bf16.msra.mxu0 %v7777_v58 }
 0x863   : > { %4561 = vmatprep.subr.bf16.mxu0 %v7662_v19  ;;  %v7931_v19 = vpop.permute.xlu1 %3381 }
 0x866   : > { %4562 = vmatpush1.bf16.msra.mxu0 %v7660_v18  ;;  %v3384_v18 = vpop.permute.xlu0 %3383 }
 0x867   : > { %4563 = vmatprep.subr.bf16.mxu0 %v7790_v50  ;;  %v3385_v33 = vsel %vm690_vm2, %v7931_v19, %v3384_v18 }
 0x86a   : > { %4564 = vmatpush1.bf16.msra.mxu0 %v7793_v16  ;;  %v7933_v50 = vpop.permute.xlu0 %3431  ;;  %v3430_v16 = vpop.permute.xlu1 %3429 }
 0x86b   : > { %4565 = vmatprep.subr.bf16.mxu0 %v7802_v52  ;;  %v3439_v37 = vmul.f32 0.0, %v7933_v50 }
 0x86e   : > { %4566 = vmatpush1.bf16.msra.mxu0 %v7807_v7  ;;  %v7935_v52 = vpop.permute.xlu0 %3479  ;;  %v3478_v7 = vpop.permute.xlu1 %3477 }
 0x86f   : > { %4567 = vmatprep.subr.bf16.mxu0 %v7812_v60 }
 0x872   : > { %4568 = vmatpush1.bf16.msra.mxu0 %v7815_v56  ;;  %v7937_v58 = vpop.permute.xlu0 %3551  ;;  %v3550_v56 = vpop.permute.xlu1 %3549 }
 0x873   : > { %4569 = vmatprep.subr.bf16.mxu0 %v7822_v47  ;;  %v3553_v28 = vsel %vm587_vm5, %v3550_v56, %v7937_v58 }
 0x876   : > { %4570 = vmatpush1.bf16.msra.mxu0 %v7827_v49  ;;  %v3265_v49 = vsel %vm564_vm0, %v7868_v32, %v3264_v8  ;;  %v3481_v32 = vsel %vm663_vm4, %v3478_v7, %v7935_v52 }
 0x898   : > { %v3224_v60 = vpop.f32.mrb[12].mxu0 }
 0x899   : > { %v5784_v47 = vadd.f32 %v3224_v60, %v7864_v63  ;;  %v3226_v54 = vpop.f32.mrb[13].mxu0  ;;  %v3433_v60 = vsel %vm713_vm3, %v3430_v16, %v7933_v50 }
 0x89a   : > { %v5785_v43 = vadd.f32 %v3226_v54, %v7864_v63  ;;  %v3228_v38 = vpop.f32.mrb[14].mxu0 }
 0x89b   : > { %v3233_v20 = vmax.f32 %v5784_v47, 0.0  ;;  %v5786_v40 = vadd.f32 %v3228_v38, %v3069_v36  ;;  %v3230_v0 = vpop.f32.mrb[15].mxu0 }
 0x89c   : > { %v3234_v51 = vmax.f32 %v5785_v43, 0.0  ;;  %v5787_v57 = vadd.f32 %v3230_v0, %v3069_v36 }
 0x89d   : > { %v7953_v55 = vmul.f32 %v3478_v7, %v3233_v20  ;;  %v3235_v54 = vmax.f32 %v5786_v40, 0.0  ;;  %v7955_v63 = vmul.f32 %v3550_v56, %v3233_v20  ;;  %v3270_v39 = vmul.f32 %v3265_v49, %v3233_v20 }
 0x89e   : > { %v3236_v47 = vmax.f32 %v5787_v57, 0.0  ;;  %v7957_v38 = vmul.f32 %v3553_v28, %v3234_v51  ;;  %v3271_v44 = vmul.f32 %v3264_v8, %v3234_v51  ;;  %v3390_v30 = vmul.f32 %v3385_v33, %v3233_v20 }
 0x89f   : > { %v7959_v59 = vmul.f32 %v3550_v56, %v3235_v54  ;;  %v7961_v45 = vpack.c.bf16 %v3235_v54, %v3233_v20  ;;  %v3273_v24 = vmul.f32 %v3265_v49, %v3235_v54  ;;  %v3393_v22 = vmul.f32 %v3385_v33, %v3235_v54 }
 0x8a0   : > { %v3561_v46 = vmul.f32 %v3553_v28, %v3236_v47  ;;  %v7963_v43 = vpack.c.bf16 %v3236_v47, %v3234_v51  ;;  %v3274_v0 = vmul.f32 %v3264_v8, %v3236_v47  ;;  %v3342_v36 = vmul.f32 %v3337_v25, %v3233_v20 }
 0x8a1   : > { %3307 = vrot.lane.b32.xlu0 %v7961_v45, %s6316_s22  ;;  %v3276_v40 = vpack.c.bf16 %v3273_v24, %v3270_v39  ;;  %v3396_v57 = vpack.c.bf16 %v3393_v22, %v3390_v30  ;;  %v3345_v48 = vmul.f32 %v3337_v25, %v3235_v54  ;;  %v3343_v5 = vmul.f32 %v3336_v62, %v3234_v51 }
 0x8a2   : > { %3309 = vrot.lane.b32.xlu1 %v7963_v43, %s6316_s22  ;;  %v3277_v56 = vpack.c.bf16 %v3274_v0, %v3271_v44  ;;  %v3346_v23 = vmul.f32 %v3336_v62, %v3236_v47  ;;  %v3437_v61 = vmul.f32 %v3430_v16, %v3233_v20  ;;  %v3440_v49 = vmul.f32 %v3430_v16, %v3235_v54  ;;  %v5730_v62 = vld [vmem:[%s8635_s12 + $0x1] ss:$2 sm:$0x3] }
 0x8a3   : > { %v3348_v33 = vpack.c.bf16 %v3345_v48, %v3342_v36  ;;  %v3391_v28 = vmul.f32 %v3384_v18, %v3234_v51  ;;  %v3394_v10 = vmul.f32 %v3384_v18, %v3236_v47  ;;  %v3488_v53 = vmul.f32 %v3478_v7, %v3235_v54  ;;  %v7975_v7 = vld [vmem:[#allocation13 + $0x10] sm:$0xff] }
 0x8a4   : > { %v3349_v8 = vpack.c.bf16 %v3346_v23, %v3343_v5  ;;  %v3443_v42 = vpack.c.bf16 %v3440_v49, %v3437_v61  ;;  %v3438_v15 = vmul.f32 %v3433_v60, %v3234_v51  ;;  %v3441_v13 = vmul.f32 %v3433_v60, %v3236_v47  ;;  %v7977_v61 = vld [vmem:[#allocation13 + $0x30] sm:$0xff]  ;;  %v5731_v49 = vld [vmem:[%s8635_s12 + $0x1] ss:$2 sm:$0x3] }
 0x8a5   : > { %3285 = vrot.lane.b32.xlu0 %v3277_v56, %s6315_s16  ;;  %v3397_v25 = vpack.c.bf16 %v3394_v10, %v3391_v28  ;;  %v3491_v22 = vpack.c.bf16 %v3488_v53, %v7953_v55  ;;  %v3486_v30 = vmul.f32 %v3481_v32, %v3234_v51  ;;  %v3489_v24 = vmul.f32 %v3481_v32, %v3236_v47  ;;  %v3939_v55 = vld [vmem:[%s8635_s12] ss:$2 sm:$0x3] }
 0x8a6   : > { %3283 = vrot.lane.b32.xlu1 %v3276_v40, %s6315_s16  ;;  %v3444_v20 = vpack.c.bf16 %v3441_v13, %v3438_v15  ;;  %v3564_v16 = vpack.c.bf16 %v3561_v46, %v7957_v38  ;;  %v3563_v18 = vpack.c.bf16 %v7959_v59, %v7955_v63  ;;  %v5739_v10 = vcombine.low %v7975_v7, %v7977_v61  ;;  %v3306_v59 = vpop.permute.xlu0 %3305  ;;  %v4059_v47 = vld [vmem:[%s8635_s12] ss:$2 sm:$0x3] }
 0x8a7   : > { %v3492_v23 = vpack.c.bf16 %v3489_v24, %v3486_v30  ;;  %v5740_v53 = vcombine.high %v7975_v7, %v7977_v61  ;;  %v3389_v13 = vmul.f32 0.0, %v7931_v19  ;;  %v3487_v15 = vmul.f32 0.0, %v7935_v52  ;;  %v5720_v52 = vld [vmem:[%s8632_s9 + $0x50] sm:$0xff]  ;;  %v4155_v24 = vld [vmem:[%s8635_s12] ss:$2 sm:$0x3] }
 0x8a8   : > { %v3445_v48 = vpack.c.bf16 %v3439_v37, %v3439_v37  ;;  %v3559_v19 = vmul.f32 0.0, %v7937_v58  ;;  %v5721_v58 = vld [vmem:[%s8632_s9 + $0x58] sm:$0xff]  ;;  %v3944_v44 = vrot.slane %v3939_v55, %v6592_v2  ;;  %v3948_v51 = vrot.slane %v3939_v55, %v6594_v3 }
 0x8a9   : > { %3403 = vrot.lane.b32.xlu0 %v3396_v57, %s6313_s20  ;;  %4577 = vmatprep.mubr.bf16.mxu0 %v5740_v53  ;;  %v3395_v5 = vpack.c.bf16 %v3389_v13, %v3389_v13  ;;  %v3493_v46 = vpack.c.bf16 %v3487_v15, %v3487_v15  ;;  %v4016_v32 = vrot.slane %v5730_v62, %v6592_v2  ;;  %v6020_v15 = vld [vmem:[#allocation12 + $0x10] ss:$28 sps:$4 sm:$0xff]  }
 0x8aa   : > { %3355 = vrot.lane.b32.xlu1 %v3348_v33, %s6314_s17  ;;  %v3565_v50 = vpack.c.bf16 %v3559_v19, %v3559_v19  ;;  %v4020_v54 = vrot.slane %v5730_v62, %v6594_v3  ;;  %v4064_v0 = vrot.slane %v4059_v47, %v6592_v2  ;;  %v4068_v36 = vrot.slane %v4059_v47, %v6594_v3 }
 0x8ad   : > { %3357 = vrot.lane.b32.xlu0 %v3349_v8, %s6314_s17  ;;  %v4112_v8 = vrot.slane %v5731_v49, %v6592_v2 }
 0x8ae   : > { %3449 = vrot.lane.b32.xlu1 %v3443_v42, %s6312_s13  ;;  %v3282_v42 = vpop.permute.xlu1 %3281 }
 0x8b1   : > { %3401 = vrot.lane.b32.xlu0 %v3395_v5, %s6313_s20  ;;  %v5732_v5 = vld [vmem:[%s8635_s12 + $0x1] ss:$2 sm:$0x3] }
 0x8b2   : > { %3405 = vrot.lane.b32.xlu1 %v3397_v25, %s6313_s20  ;;  %v3354_v39 = vpop.permute.xlu1 %3353  ;;  %v4116_v25 = vrot.slane %v5731_v49, %v6594_v3  ;;  %v4232_v19 = vrot.slane %v5732_v5, %v6592_v2  ;;  %v6023_v49 = vld [vmem:[#allocation12 + $0x18] ss:$28 sps:$4 sm:$0xff]  }
 0x8b5   : > { %3453 = vrot.lane.b32.xlu0 %v3445_v48, %s6312_s13 }
 0x8b6   : > { %3501 = vrot.lane.b32.xlu1 %v3493_v46, %s6310_s24 }
 0x8b9   : > { %3497 = vrot.lane.b32.xlu0 %v3491_v22, %s6310_s24 }
 0x8ba   : > { %3451 = vrot.lane.b32.xlu1 %v3444_v20, %s6312_s13 }
 0x8bd   : > { %3499 = vrot.lane.b32.xlu0 %v3492_v23, %s6310_s24 }
 0x8be   : > { %3523 = vrot.lane.b32.xlu1 %v7963_v43, %s6318_s30 }
 0x8c1   : > { %3525 = vrot.lane.b32.xlu0 %v8833_v41, %s6318_s30 }
 0x8c2   : > { %3521 = vrot.lane.b32.xlu1 %v7961_v45, %s6318_s30 }
 0x8c5   : > { %3571 = vrot.lane.b32.xlu0 %v3564_v16, %s6311_s15  ;;  %v4160_v16 = vrot.slane %v4155_v24, %v6592_v2 }
 0x8c6   : > { %3573 = vrot.lane.b32.xlu1 %v3565_v50, %s6311_s15 }
 0x8c9   : > { %3569 = vrot.lane.b32.xlu0 %v3563_v18, %s6311_s15  ;;  %v4164_v18 = vrot.slane %v4155_v24, %v6594_v3  ;;  %v6024_v24 = vld [vmem:[%s8631_s8] ss:$36 sps:$4 sm:$0xff]  }
 0x8ca   : > { %3702 = vperm.xlu1 %5984, %v5720_v52  }
 0x8cd   : > { %3707 = vperm.xlu0 %5983, %v5721_v58   ;;  %v4236_v58 = vrot.slane %v5732_v5, %v6594_v3 }
 0x8ce   : > { %3949 = vrot.lane.b32.xlu1 %v3944_v44, %s6311_s15 }
 0x8d1   : > { %3951 = vrot.lane.b32.xlu0 %v3948_v51, %s6311_s15 }
 0x8d2   : > { %4021 = vrot.lane.b32.xlu1 %v4016_v32, %s6310_s24 }
 0x8d5   : > { %4023 = vrot.lane.b32.xlu0 %v4020_v54, %s6310_s24 }
 0x8d6   : > { %4069 = vrot.lane.b32.xlu1 %v4064_v0, %s6312_s13 }
 0x8d9   : > { %4071 = vrot.lane.b32.xlu0 %v4068_v36, %s6312_s13 }
 0x8da   : > { %4117 = vrot.lane.b32.xlu1 %v4112_v8, %s6313_s20  ;;  %v9014_v8 = vld [vmem:[#allocation44_spill] sm:$0xff] }
 0x8dd   : > { %4119 = vrot.lane.b32.xlu0 %v4116_v25, %s6313_s20  ;;  %v9015_v25 = vld [vmem:[#allocation43_spill] sm:$0xff] }
 0x8de   : > { %4165 = vrot.lane.b32.xlu1 %v4160_v16, %s6314_s17  ;;  %v6029_v16 = vld [vmem:[%s8631_s8 + $0xc] ss:$36 sps:$4 sm:$0xff]  }
 0x8e1   : > { %4167 = vrot.lane.b32.xlu0 %v4164_v18, %s6314_s17  ;;  %v9018_v18 = vld [vmem:[#allocation39_spill] sm:$0xff] }
 0x8e2   : > { %4237 = vrot.lane.b32.xlu1 %v4232_v19, %s6315_s16  ;;  %v9021_v19 = vld [vmem:[#allocation48_spill] sm:$0xff] }
 0x8e5   : > { %4239 = vrot.lane.b32.xlu0 %v4236_v58, %s6315_s16 }
 0x8e9   : > { %3993 = vrot.lane.b32.xlu0 %v8833_v41, %s6316_s22 }
 0x913   : > { %v3308_v60 = vpop.permute.xlu0 %3307 }
 0x914   : > { %v3310_v63 = vpop.permute.xlu1 %3309  ;;  %v8057_v30 = vsel %vm612_vm6, %v3306_v59, %v3308_v60  ;;  %v9000_v59 = vmov 0  }
 0x915   : > { %v8048_v28 = vsel %vm612_vm6, %v3308_v60, %v3310_v63 }
 0x917   : > { %v3286_v38 = vpop.permute.xlu0 %3285 }
 0x918   : > { %v3284_v40 = vpop.permute.xlu1 %3283 }
 0x919   : > { %v8033_v57 = vsel %vm587_vm5, %v3282_v42, %v3284_v40  ;;  %v8036_v56 = vsel %vm587_vm5, %v3284_v40, %v3286_v38 }
 0x91a   : > { %3861 = vmatprep.subr.bf16.mxu1 %v8036_v56  ;;  %4571 = vmatprep.subr.bf16.mxu0 %v8036_v56 }
 0x91b   : > { %v3404_v33 = vpop.permute.xlu0 %3403  ;;  %3862 = vmatpush1.bf16.msra.mxu1 %v8033_v57  ;;  %4572 = vmatpush1.bf16.msra.mxu0 %v8033_v57 }
 0x91c   : > { %3863 = vmatprep.subr.bf16.mxu1 %v8048_v28  ;;  %4573 = vmatprep.subr.bf16.mxu0 %v8048_v28  ;;  %v3356_v22 = vpop.permute.xlu1 %3355 }
 0x91d   : > { %v8072_v13 = vsel %vm663_vm4, %v3354_v39, %v3356_v22 }
 0x91f   : > { %v3358_v20 = vpop.permute.xlu0 %3357  ;;  %3864 = vmatpush1.bf16.msra.mxu1 %v8057_v30  ;;  %4574 = vmatpush1.bf16.msra.mxu0 %v8057_v30 }
 0x920   : > { %v3450_v23 = vpop.permute.xlu1 %3449  ;;  %v8067_v53 = vsel %vm663_vm4, %v3356_v22, %v3358_v20  ;;  %v9016_v22 = vld [vmem:[#allocation46_spill] sm:$0xff]  ;;  %v9017_v20 = vld [vmem:[#allocation45_spill] sm:$0xff] }
 0x921   : > { %3865 = vmatprep.subr.bf16.mxu1 %v8067_v53  ;;  %4575 = vmatprep.subr.bf16.mxu0 %v8067_v53 }
 0x923   : > { %v3402_v37 = vpop.permute.xlu0 %3401  ;;  %3866 = vmatpush1.bf16.msra.mxu1 %v8072_v13  ;;  %4576 = vmatpush1.bf16.msra.mxu0 %v8072_v13 }
 0x924   : > { %v3406_v48 = vpop.permute.xlu1 %3405  ;;  %v8088_v50 = vsel %vm713_vm3, %v3402_v37, %v3404_v33  ;;  %v9019_v37 = vld [vmem:[#allocation42_spill] sm:$0xff] }
 0x925   : > { %v8082_v46 = vsel %vm713_vm3, %v3404_v33, %v3406_v48  ;;  %v6026_v33 = vld [vmem:[%s8631_s8 + $0x4] ss:$36 sps:$4 sm:$0xff]  }
 0x926   : > { %3878 = vmatprep.subr.bf16.mxu1 %v8082_v46  ;;  %4588 = vmatprep.subr.bf16.mxu0 %v8082_v46 }
 0x927   : > { %v3454_v52 = vpop.permute.xlu0 %3453  ;;  %3868 = vmatmul.mubr.bf16.vlgmr.msra.gmra.mrb[8].mxu1 %v6020_v15  ;;  %4578 = vmatmul.mubr.bf16.vlgmr.msra.gmra.mrb[16].mxu0 %v5739_v10  ;;  %v9020_v15 = vld [vmem:[#allocation47_spill] sm:$0xff] }
 0x928   : > { %3879 = vmatpush1.bf16.msra.mxu1 %v8088_v50  ;;  %4589 = vmatpush1.bf16.msra.mxu0 %v8088_v50  ;;  %v3502_v42 = vpop.permute.xlu1 %3501 }
 0x929   : > { %3880 = vmatprep.subr.bf16.mxu1 %v7963_v43  ;;  %4590 = vmatprep.subr.bf16.mxu0 %v7963_v43 }
 0x92a   : > { %3910 = vmatprep.mubr.bf16.mxu1 %v9000_v59 }
 0x92b   : > { %v3498_v39 = vpop.permute.xlu0 %3497 }
 0x92c   : > { %3881 = vmatpush1.bf16.msra.mxu1 %v7961_v45  ;;  %4591 = vmatpush1.bf16.msra.mxu0 %v7961_v45  ;;  %v3452_v7 = vpop.permute.xlu1 %3451 }
 0x92d   : > { %v8104_v61 = vsel %vm690_vm2, %v3450_v23, %v3452_v7  ;;  %v8107_v10 = vsel %vm690_vm2, %v3452_v7, %v3454_v52  ;;  %v9022_v52 = vld [vmem:[#allocation52_spill] sm:$0xff]  ;;  %v9023_v7 = vld [vmem:[#allocation51_spill] sm:$0xff] }
 0x92e   : > { %3882 = vmatprep.subr.bf16.mxu1 %v8107_v10  ;;  %4592 = vmatprep.subr.bf16.mxu0 %v8107_v10 }
 0x92f   : > { %v3500_v55 = vpop.permute.xlu0 %3499 }
 0x930   : > { %3883 = vmatpush1.bf16.msra.mxu1 %v8104_v61  ;;  %4593 = vmatpush1.bf16.msra.mxu0 %v8104_v61  ;;  %v3524_v44 = vpop.permute.xlu1 %3523  ;;  %v8116_v51 = vsel %vm640_vm1, %v3500_v55, %v3502_v42  ;;  %v8121_v62 = vsel %vm640_vm1, %v3498_v39, %v3500_v55  ;;  %v9024_v55 = vld [vmem:[#allocation53_spill] sm:$0xff] }
 0x931   : > { %3884 = vmatprep.subr.bf16.mxu1 %v8116_v51  ;;  %4594 = vmatprep.subr.bf16.mxu0 %v8116_v51 }
 0x933   : > { %v3526_v60 = vpop.permute.xlu0 %3525 }
 0x934   : > { %3885 = vmatpush1.bf16.msra.mxu1 %v8121_v62  ;;  %4595 = vmatpush1.bf16.msra.mxu0 %v8121_v62  ;;  %v3522_v32 = vpop.permute.xlu1 %3521  ;;  %v8126_v54 = vsel %vm838_vm7, %v3524_v44, %v3526_v60  ;;  %v9025_v60 = vld [vmem:[#allocation54_spill] sm:$0xff] }
 0x935   : > { %v8129_v63 = vsel %vm838_vm7, %v3522_v32, %v3524_v44  ;;  %3886 = vmatprep.subr.bf16.mxu1 %v8126_v54  ;;  %4596 = vmatprep.subr.bf16.mxu0 %v8126_v54  ;;  %v9026_v32 = vld [vmem:[#allocation55_spill] sm:$0xff] }
 0x937   : > { %v3572_v47 = vpop.permute.xlu0 %3571 }
 0x938   : > { %3887 = vmatpush1.bf16.msra.mxu1 %v8129_v63  ;;  %4597 = vmatpush1.bf16.msra.mxu0 %v8129_v63  ;;  %v3574_v38 = vpop.permute.xlu1 %3573 }
 0x939   : > { %v8136_v0 = vsel %vm564_vm0, %v3572_v47, %v3574_v38  ;;  %v9028_v38 = vld [vmem:[#allocation57_spill] sm:$0xff] }
 0x93a   : > { %3888 = vmatprep.subr.bf16.mxu1 %v8136_v0  ;;  %4598 = vmatprep.subr.bf16.mxu0 %v8136_v0 }
 0x93b   : > { %v3570_v36 = vpop.permute.xlu0 %3569 }
 0x93c   : > { %v8141_v40 = vsel %vm564_vm0, %v3570_v36, %v3572_v47  ;;  %v9027_v47 = vld [vmem:[#allocation56_spill] sm:$0xff]  ;;  %v9029_v36 = vld [vmem:[#allocation58_spill] sm:$0xff] }
 0x93d   : > { %3889 = vmatpush1.bf16.msra.mxu1 %v8141_v40  ;;  %4599 = vmatpush1.bf16.msra.mxu0 %v8141_v40 }
 0x93e   : > { %5192 = vmatprep.subr.bf16.mxu1 %v6783_v4  ;;  %v9002_v4 = vld [vmem:[#allocation29_spill] sm:$0xff] }
 0x940   : > { %5729 = vmatmul.mubr.msk.bf16.vlgmr.msra.gmra.mrb[8].mxu1 %vm3745_vm12, %v6023_v49  ;;  %v9030_v49 = vld [vmem:[#allocation50_spill] sm:$0xff] }
 0x941   : > { %5193 = vmatpush1.bf16.msra.mxu1 %v6780_v1  ;;  %5224 = vmatprep.mubr.bf16.mxu1 %v6026_v33  ;;  %v9001_v1 = vld [vmem:[#allocation28_spill] sm:$0xff]  ;;  %v9031_v33 = vld [vmem:[#allocation49_spill] sm:$0xff] }
 0x942   : > { %5194 = vmatprep.subr.bf16.mxu1 %v6787_v6  ;;  %v9003_v6 = vld [vmem:[#allocation30_spill] sm:$0xff] }
 0x945   : > { %5195 = vmatpush1.bf16.msra.mxu1 %v6792_v9  ;;  %v9004_v9 = vld [vmem:[#allocation33_spill] sm:$0xff] }
 0x946   : > { %5196 = vmatprep.subr.bf16.mxu1 %v6799_v12  ;;  %v9006_v12 = vld [vmem:[#allocation35_spill] sm:$0xff] }
 0x949   : > { %5197 = vmatpush1.bf16.msra.mxu1 %v6796_v11  ;;  %v9005_v11 = vld [vmem:[#allocation34_spill] sm:$0xff]  ;;  %v8187_v23 = vpop.permute.xlu1 %3702 }
 0x94a   : > { %5198 = vmatprep.subr.bf16.mxu1 %v6803_v14  ;;  %v9007_v14 = vld [vmem:[#allocation36_spill] sm:$0xff] }
 0x94d   : > { %5199 = vmatpush1.bf16.msra.mxu1 %v6808_v17  ;;  %v9008_v17 = vld [vmem:[#allocation37_spill] sm:$0xff]  ;;  %v8191_v5 = vpop.permute.xlu1 %3949 }
 0x94e   : > { %5200 = vmatprep.subr.bf16.mxu1 %v6663_v27  ;;  %v3957_v48 = vmul.f32 0.0, %v8191_v5 }
 0x950   : > { %v3963_v58 = vpack.c.bf16 %v3957_v48, %v3957_v48  ;;  %v9050_v48 = vld [vmem:[#allocation78_spill] sm:$0xff] }
 0x951   : > { %5201 = vmatpush1.bf16.msra.mxu1 %v6659_v26  ;;  %v8196_v42 = vpop.permute.xlu1 %4021 }
 0x952   : > { %5202 = vmatprep.subr.bf16.mxu1 %v6817_v29  ;;  %v9010_v29 = vld [vmem:[#allocation40_spill] sm:$0xff]  ;;  %v4029_v39 = vmul.f32 0.0, %v8196_v42  ;;  %3969 = vrot.lane.b32.xlu1 %v3963_v58, %s6315_s16 }
 0x953   : > { %v9053_v58 = vld [vmem:[#allocation80_spill] sm:$0xff] }
 0x954   : > { %v4035_v44 = vpack.c.bf16 %v4029_v39, %v4029_v39  ;;  %v9054_v39 = vld [vmem:[#allocation81_spill] sm:$0xff] }
 0x955   : > { %5203 = vmatpush1.bf16.msra.mxu1 %v6814_v21  ;;  %v9009_v21 = vld [vmem:[#allocation38_spill] sm:$0xff] }
 0x956   : > { %5204 = vmatprep.subr.bf16.mxu1 %v6821_v31  ;;  %v9011_v31 = vld [vmem:[#allocation41_spill] sm:$0xff]  ;;  %4041 = vrot.lane.b32.xlu1 %v4035_v44, %s6314_s17  ;;  %v9057_v44 = vld [vmem:[#allocation84_spill] sm:$0xff] }
 0x959   : > { %5205 = vmatpush1.bf16.msra.mxu1 %v6826_v34  ;;  %v9012_v34 = vld [vmem:[#allocation32_spill] sm:$0xff] }
 0x95a   : > { %5206 = vmatprep.subr.bf16.mxu1 %v6829_v35  ;;  %v9013_v35 = vld [vmem:[#allocation31_spill] sm:$0xff] }
 0x95d   : > { %5207 = vmatpush1.bf16.msra.mxu1 %v9001_v1  ;;  %v9032_v1 = vld [vmem:[#allocation60_spill] sm:$0xff] }
 0x95e   : > { %5208 = vmatprep.subr.bf16.mxu1 %v9002_v4  ;;  %v9033_v4 = vld [vmem:[#allocation59_spill] sm:$0xff] }
 0x961   : > { %5209 = vmatpush1.bf16.msra.mxu1 %v9003_v6  ;;  %v9034_v6 = vld [vmem:[#allocation61_spill] sm:$0xff] }
 0x962   : > { %5210 = vmatprep.subr.bf16.mxu1 %v9004_v9  ;;  %v9035_v9 = vld [vmem:[#allocation62_spill] sm:$0xff] }
 0x965   : > { %5211 = vmatpush1.bf16.msra.mxu1 %v9005_v11  ;;  %v9036_v11 = vld [vmem:[#allocation63_spill] sm:$0xff] }
 0x966   : > { %5212 = vmatprep.subr.bf16.mxu1 %v9006_v12  ;;  %v9037_v12 = vld [vmem:[#allocation64_spill] sm:$0xff] }
 0x969   : > { %5213 = vmatpush1.bf16.msra.mxu1 %v9007_v14  ;;  %v9038_v14 = vld [vmem:[#allocation65_spill] sm:$0xff] }
 0x96a   : > { %5214 = vmatprep.subr.bf16.mxu1 %v9008_v17  ;;  %v9039_v17 = vld [vmem:[#allocation66_spill] sm:$0xff] }
 0x96d   : > { %5215 = vmatpush1.bf16.msra.mxu1 %v9009_v21  ;;  %v9040_v21 = vld [vmem:[#allocation70_spill] sm:$0xff] }
 0x96e   : > { %5216 = vmatprep.subr.bf16.mxu1 %v9010_v29  ;;  %v9041_v29 = vld [vmem:[#allocation69_spill] sm:$0xff] }
 0x971   : > { %5217 = vmatpush1.bf16.msra.mxu1 %v9011_v31  ;;  %v9042_v31 = vld [vmem:[#allocation71_spill] sm:$0xff] }
 0x972   : > { %5218 = vmatprep.subr.bf16.mxu1 %v9012_v34 }
 0x975   : > { %5219 = vmatpush1.bf16.msra.mxu1 %v9013_v35 }
 0x976   : > { %5220 = vmatprep.subr.bf16.mxu1 %v9014_v8  ;;  %v9043_v8 = vld [vmem:[#allocation72_spill] sm:$0xff] }
 0x979   : > { %5221 = vmatpush1.bf16.msra.mxu1 %v9015_v25  ;;  %v9044_v25 = vld [vmem:[#allocation73_spill] sm:$0xff] }
 0x97a   : > { %5222 = vmatprep.subr.bf16.mxu1 %v9016_v22  ;;  %v9045_v22 = vld [vmem:[#allocation74_spill] sm:$0xff] }
 0x97d   : > { %5223 = vmatpush1.bf16.msra.mxu1 %v9017_v20  ;;  %v9047_v20 = vld [vmem:[#allocation76_spill] sm:$0xff] }
 0x97e   : > { %5235 = vmatprep.subr.bf16.mxu1 %v9018_v18  ;;  %v6027_v18 = vld [vmem:[%s8631_s8 + $0x8] ss:$36 sps:$4 sm:$0xff]  }
 0x980   : > { %5225 = vmatmul.mubr.bf16.vlgmr.msra.gmra.mrb[12].mxu1 %v6024_v24  ;;  %v9046_v24 = vld [vmem:[#allocation75_spill] sm:$0xff] }
 0x981   : > { %5236 = vmatpush1.bf16.msra.mxu1 %v9019_v37  ;;  %5267 = vmatprep.mubr.bf16.mxu1 %v6029_v16  ;;  %v9048_v16 = vld [vmem:[#allocation68_spill] sm:$0xff]  ;;  %v9049_v37 = vld [vmem:[#allocation67_spill] sm:$0xff] }
 0x982   : > { %5237 = vmatprep.subr.bf16.mxu1 %v9020_v15  ;;  %v6032_v15 = vld [vmem:[%s8631_s8 + $0x14] ss:$36 sps:$4 sm:$0xff]  }
 0x985   : > { %5238 = vmatpush1.bf16.msra.mxu1 %v9021_v19  ;;  %v9051_v19 = vld [vmem:[#allocation77_spill] sm:$0xff] }
 0x986   : > { %5239 = vmatprep.subr.bf16.mxu1 %v9022_v52  ;;  %v9052_v52 = vld [vmem:[#allocation79_spill] sm:$0xff] }
 0x989   : > { %5240 = vmatpush1.bf16.msra.mxu1 %v9023_v7  ;;  %v9055_v7 = vld [vmem:[#allocation82_spill] sm:$0xff] }
 0x98a   : > { %5241 = vmatprep.subr.bf16.mxu1 %v9024_v55  ;;  %v9056_v55 = vld [vmem:[#allocation83_spill] sm:$0xff] }
 0x98d   : > { %5242 = vmatpush1.bf16.msra.mxu1 %v9025_v60  ;;  %v9058_v60 = vld [vmem:[#allocation87_spill] sm:$0xff] }
 0x98e   : > { %5243 = vmatprep.subr.bf16.mxu1 %v9026_v32  ;;  %v9059_v32 = vld [vmem:[#allocation88_spill] sm:$0xff] }
 0x991   : > { %5244 = vmatpush1.bf16.msra.mxu1 %v9027_v47  ;;  %v9060_v47 = vld [vmem:[#allocation89_spill] sm:$0xff] }
 0x992   : > { %5245 = vmatprep.subr.bf16.mxu1 %v9028_v38  ;;  %v9061_v38 = vld [vmem:[#allocation90_spill] sm:$0xff] }
 0x995   : > { %5246 = vmatpush1.bf16.msra.mxu1 %v9029_v36  ;;  %v9062_v36 = vld [vmem:[#allocation91_spill] sm:$0xff] }
 0x996   : > { %5247 = vmatprep.subr.bf16.mxu1 %v9030_v49 }
 0x999   : > { %5248 = vmatpush1.bf16.msra.mxu1 %v9031_v33 }
 0x99a   : > { %5249 = vmatprep.subr.bf16.mxu1 %v9032_v1  ;;  %v9063_v1 = vld [vmem:[#allocation92_spill] sm:$0xff] }
 0x99d   : > { %5250 = vmatpush1.bf16.msra.mxu1 %v9033_v4  ;;  %v9064_v4 = vld [vmem:[#allocation93_spill] sm:$0xff] }
 0x99e   : > { %5251 = vmatprep.subr.bf16.mxu1 %v9034_v6  ;;  %v9065_v6 = vld [vmem:[#allocation94_spill] sm:$0xff] }
 0x9a1   : > { %5252 = vmatpush1.bf16.msra.mxu1 %v9035_v9  ;;  %v9066_v9 = vld [vmem:[#allocation86_spill] sm:$0xff] }
 0x9a2   : > { %5253 = vmatprep.subr.bf16.mxu1 %v9036_v11  ;;  %v9067_v11 = vld [vmem:[#allocation85_spill] sm:$0xff] }
 0x9a5   : > { %5254 = vmatpush1.bf16.msra.mxu1 %v9037_v12  ;;  %v9068_v12 = vld [vmem:[#allocation95_spill] sm:$0xff] }
 0x9a6   : > { %5255 = vmatprep.subr.bf16.mxu1 %v9038_v14  ;;  %v9069_v14 = vld [vmem:[#allocation96_spill] sm:$0xff] }
 0x9a9   : > { %5256 = vmatpush1.bf16.msra.mxu1 %v9039_v17  ;;  %v9070_v17 = vld [vmem:[#allocation97_spill] sm:$0xff] }
 0x9aa   : > { %5257 = vmatprep.subr.bf16.mxu1 %v9040_v21  ;;  %v9071_v21 = vld [vmem:[#allocation98_spill] sm:$0xff] }
 0x9ad   : > { %5258 = vmatpush1.bf16.msra.mxu1 %v9041_v29  ;;  %v9072_v29 = vld [vmem:[#allocation99_spill] sm:$0xff] }
 0x9ae   : > { %5259 = vmatprep.subr.bf16.mxu1 %v9042_v31  ;;  %v9073_v31 = vld [vmem:[#allocation100_spill] sm:$0xff] }
 0x9b1   : > { %5260 = vmatpush1.bf16.msra.mxu1 %v9043_v8  ;;  %v9074_v8 = vld [vmem:[#allocation101_spill] sm:$0xff] }
 0x9b2   : > { %5261 = vmatprep.subr.bf16.mxu1 %v9044_v25  ;;  %v3708_v25 = vpop.permute.xlu0 %3707 }
 0x9b5   : > { %5262 = vmatpush1.bf16.msra.mxu1 %v9045_v22  ;;  %v9075_v22 = vld [vmem:[#allocation102_spill] sm:$0xff] }
 0x9b6   : > { %5263 = vmatprep.subr.bf16.mxu1 %v9046_v24  ;;  %v3952_v24 = vpop.permute.xlu0 %3951 }
 0x9b9   : > { %5264 = vmatpush1.bf16.msra.mxu1 %v9047_v20 }
 0x9ba   : > { %5265 = vmatprep.subr.bf16.mxu1 %v9048_v16  ;;  %v8265_v20 = vpop.permute.xlu0 %4023 }
 0x9bd   : > { %5266 = vmatpush1.bf16.msra.mxu1 %v9049_v37 }
 0x9be   : > { %5278 = vmatprep.subr.bf16.mxu1 %v9050_v48 }
 0x9c0   : > { %5268 = vmatmul.mubr.bf16.vlgmr.msra.gmra.mrb[12].mxu1 %v6027_v18  ;;  %v6030_v18 = vld [vmem:[%s8631_s8 + $0x10] ss:$36 sps:$4 sm:$0xff]  }
 0x9c1   : > { %5279 = vmatpush1.bf16.msra.mxu1 %v9051_v19  ;;  %5310 = vmatprep.mubr.bf16.mxu1 %v6032_v15 }
 0x9c2   : > { %5280 = vmatprep.subr.bf16.mxu1 %v9052_v52 }
 0x9c5   : > { %5281 = vmatpush1.bf16.msra.mxu1 %v9053_v58 }
 0x9c6   : > { %5282 = vmatprep.subr.bf16.mxu1 %v9054_v39 }
 0x9c9   : > { %5283 = vmatpush1.bf16.msra.mxu1 %v9055_v7 }
 0x9ca   : > { %5284 = vmatprep.subr.bf16.mxu1 %v9056_v55 }
 0x9cd   : > { %5285 = vmatpush1.bf16.msra.mxu1 %v9057_v44 }
 0x9ce   : > { %5286 = vmatprep.subr.bf16.mxu1 %v9058_v60 }
 0x9d1   : > { %5287 = vmatpush1.bf16.msra.mxu1 %v9059_v32 }
 0x9d2   : > { %5288 = vmatprep.subr.bf16.mxu1 %v9060_v47 }
 0x9d5   : > { %5289 = vmatpush1.bf16.msra.mxu1 %v9061_v38 }
 0x9d6   : > { %5290 = vmatprep.subr.bf16.mxu1 %v9062_v36 }
 0x9d9   : > { %5291 = vmatpush1.bf16.msra.mxu1 %v9063_v1 }
 0x9da   : > { %5292 = vmatprep.subr.bf16.mxu1 %v9064_v4 }
 0x9dd   : > { %5293 = vmatpush1.bf16.msra.mxu1 %v9065_v6 }
 0x9de   : > { %5294 = vmatprep.subr.bf16.mxu1 %v9066_v9 }
 0x9e1   : > { %5295 = vmatpush1.bf16.msra.mxu1 %v9067_v11 }
 0x9e2   : > { %5296 = vmatprep.subr.bf16.mxu1 %v9068_v12 }
 0x9e5   : > { %5297 = vmatpush1.bf16.msra.mxu1 %v9069_v14 }
 0x9e6   : > { %5298 = vmatprep.subr.bf16.mxu1 %v9070_v17 }
 0x9e9   : > { %5299 = vmatpush1.bf16.msra.mxu1 %v9071_v21 }
 0x9ea   : > { %5300 = vmatprep.subr.bf16.mxu1 %v9072_v29 }
 0x9ed   : > { %5301 = vmatpush1.bf16.msra.mxu1 %v9073_v31 }
 0x9ee   : > { %5302 = vmatprep.subr.bf16.mxu1 %v9074_v8 }
 0x9f1   : > { %5303 = vmatpush1.bf16.msra.mxu1 %v9075_v22 }
 0x9f2   : > { %5304 = vmatprep.subr.bf16.mxu1 %v8036_v56  ;;  %v8272_v56 = vpop.permute.xlu1 %4069 }
 0x9f5   : > { %5305 = vmatpush1.bf16.msra.mxu1 %v8033_v57  ;;  %v8275_v57 = vpop.permute.xlu0 %4071 }
 0x9f6   : > { %5306 = vmatprep.subr.bf16.mxu1 %v8048_v28  ;;  %v4118_v28 = vpop.permute.xlu1 %4117 }
 0x9f9   : > { %5307 = vmatpush1.bf16.msra.mxu1 %v8057_v30  ;;  %v8280_v30 = vpop.permute.xlu0 %4119 }
 0x9fa   : > { %5308 = vmatprep.subr.bf16.mxu1 %v8067_v53  ;;  %v4166_v53 = vpop.permute.xlu1 %4165 }
 0x9fd   : > { %5309 = vmatpush1.bf16.msra.mxu1 %v8072_v13  ;;  %v8285_v13 = vpop.permute.xlu0 %4167 }
 0x9fe   : > { %5321 = vmatprep.subr.bf16.mxu1 %v8082_v46  ;;  %v4238_v46 = vpop.permute.xlu1 %4237 }
 0xa00   : > { %5311 = vmatmul.mubr.bf16.vlgmr.msra.gmra.mrb[12].mxu1 %v6030_v18 }
 0xa01   : > { %5322 = vmatpush1.bf16.msra.mxu1 %v8088_v50 }
 0xa02   : > { %5323 = vmatprep.subr.bf16.mxu1 %v7963_v43 }
 0xa05   : > { %5324 = vmatpush1.bf16.msra.mxu1 %v7961_v45 }
 0xa06   : > { %5325 = vmatprep.subr.bf16.mxu1 %v8107_v10  ;;  %v8290_v10 = vpop.permute.xlu0 %4239 }
 0xa07   : > { %v4241_v58 = vsel %vm587_vm5, %v4238_v46, %v8290_v10 }
 0xa09   : > { %5326 = vmatpush1.bf16.msra.mxu1 %v8104_v61 }
 0xa0a   : > { %5327 = vmatprep.subr.bf16.mxu1 %v8116_v51  ;;  %v3953_v51 = vsel %vm564_vm0, %v8191_v5, %v3952_v24  ;;  %v4121_v5 = vsel %vm713_vm3, %v4118_v28, %v8280_v30 }
 0xa0d   : > { %5328 = vmatpush1.bf16.msra.mxu1 %v8121_v62  ;;  %v4025_v62 = vsel %vm640_vm1, %v8196_v42, %v8265_v20  ;;  %v4169_v42 = vsel %vm663_vm4, %v4166_v53, %v8285_v13 }
 0xa0e   : > { %5329 = vmatprep.subr.bf16.mxu1 %v8126_v54 }
 0xa11   : > { %5330 = vmatpush1.bf16.msra.mxu1 %v8129_v63  ;;  %v4073_v63 = vsel %vm690_vm2, %v8272_v56, %v8275_v57 }
 0xa12   : > { %5331 = vmatprep.subr.bf16.mxu1 %v8136_v0 }
 0xa13   : > { %v3912_v50 = vpop.f32.mrb[8].mxu1 }
 0xa14   : > { %v5788_v15 = vadd.f32 %v3912_v50, %v8187_v23  ;;  %v3914_v61 = vpop.f32.mrb[9].mxu1 }
 0xa15   : > { %v5789_v54 = vadd.f32 %v3914_v61, %v8187_v23  ;;  %v3916_v48 = vpop.f32.mrb[10].mxu1  ;;  %5332 = vmatpush1.bf16.msra.mxu1 %v8141_v40 }
 0xa16   : > { %v3921_v0 = vmax.f32 %v5788_v15, 0.0  ;;  %v5790_v19 = vadd.f32 %v3916_v48, %v3708_v25  ;;  %v3918_v52 = vpop.f32.mrb[11].mxu1 }
 0xa17   : > { %v3922_v23 = vmax.f32 %v5789_v54, 0.0  ;;  %v5791_v39 = vadd.f32 %v3918_v52, %v3708_v25 }
 0xa18   : > { %v4173_v7 = vmul.f32 %v4166_v53, %v3921_v0  ;;  %v3923_v40 = vmax.f32 %v5790_v19, 0.0  ;;  %v8309_v55 = vmul.f32 %v4238_v46, %v3921_v0  ;;  %v3958_v44 = vmul.f32 %v3953_v51, %v3921_v0 }
 0xa19   : > { %v3924_v60 = vmax.f32 %v5791_v39, 0.0  ;;  %v8311_v32 = vmul.f32 %v4241_v58, %v3922_v23  ;;  %v3959_v47 = vmul.f32 %v3952_v24, %v3922_v23  ;;  %v4078_v38 = vmul.f32 %v4073_v63, %v3921_v0 }
 0xa1a   : > { %v8313_v36 = vmul.f32 %v4238_v46, %v3923_v40  ;;  %v8315_v1 = vpack.c.bf16 %v3923_v40, %v3921_v0  ;;  %v3961_v4 = vmul.f32 %v3953_v51, %v3923_v40  ;;  %v4081_v6 = vmul.f32 %v4073_v63, %v3923_v40 }
 0xa1b   : > { %v4249_v12 = vmul.f32 %v4241_v58, %v3924_v60  ;;  %v8317_v14 = vpack.c.bf16 %v3924_v60, %v3922_v23  ;;  %v3962_v17 = vmul.f32 %v3952_v24, %v3924_v60  ;;  %v4030_v21 = vmul.f32 %v4025_v62, %v3921_v0 }
 0xa1c   : > { %v4251_v29 = vpack.c.bf16 %v8313_v36, %v8309_v55  ;;  %3995 = vrot.lane.b32.xlu0 %v8315_v1, %s6316_s22  ;;  %v3964_v31 = vpack.c.bf16 %v3961_v4, %v3958_v44  ;;  %v4084_v8 = vpack.c.bf16 %v4081_v6, %v4078_v38  ;;  %v4033_v25 = vmul.f32 %v4025_v62, %v3923_v40  ;;  %v5744_v38 = vld [vmem:[%s8635_s12 + $0x1] ss:$2 sm:$0x3] }
 0xa1d   : > { %v4252_v22 = vpack.c.bf16 %v4249_v12, %v8311_v32  ;;  %3997 = vrot.lane.b32.xlu1 %v8317_v14, %s6316_s22  ;;  %v3965_v18 = vpack.c.bf16 %v3962_v17, %v3959_v47  ;;  %v4031_v46 = vmul.f32 %v8265_v20, %v3922_v23  ;;  %v4034_v24 = vmul.f32 %v8265_v20, %v3924_v60  ;;  %v5733_v32 = vld [vmem:[%s8632_s9 + $0x60] sm:$0xff] }
 0xa1e   : > { %v4036_v50 = vpack.c.bf16 %v4033_v25, %v4030_v21  ;;  %v4125_v15 = vmul.f32 %v4118_v28, %v3921_v0  ;;  %v4128_v61 = vmul.f32 %v4118_v28, %v3923_v40  ;;  %v4079_v51 = vmul.f32 %v8275_v57, %v3922_v23  ;;  %v4649_v47 = vld [vmem:[%s8635_s12] ss:$2 sm:$0x3] }
 0xa1f   : > { %v4037_v54 = vpack.c.bf16 %v4034_v24, %v4031_v46  ;;  %v4082_v48 = vmul.f32 %v8275_v57, %v3924_v60  ;;  %v4176_v63 = vmul.f32 %v4166_v53, %v3923_v40  ;;  %v4126_v62 = vmul.f32 %v4121_v5, %v3922_v23  ;;  %v4769_v17 = vld [vmem:[%s8635_s12] ss:$2 sm:$0x3]  ;;  %v5746_v24 = vld [vmem:[%s8635_s12 + $0x1] ss:$2 sm:$0x3] }
 0xa20   : > { %3973 = vrot.lane.b32.xlu0 %v3965_v18, %s6315_s16  ;;  %v4131_v19 = vpack.c.bf16 %v4128_v61, %v4125_v15  ;;  %v4129_v52 = vmul.f32 %v4121_v5, %v3924_v60  ;;  %v4174_v58 = vmul.f32 %v4169_v42, %v3922_v23  ;;  %v4177_v39 = vmul.f32 %v4169_v42, %v3924_v60  ;;  %v3970_v61 = vpop.permute.xlu1 %3969 }
 0xa21   : > { %3971 = vrot.lane.b32.xlu1 %v3964_v31, %s6315_s16  ;;  %v4085_v55 = vpack.c.bf16 %v4082_v48, %v4079_v51  ;;  %v4179_v20 = vpack.c.bf16 %v4176_v63, %v4173_v7  ;;  %v4077_v57 = vmul.f32 0.0, %v8272_v56  ;;  %v4127_v28 = vmul.f32 0.0, %v8280_v30  ;;  %v8346_v56 = vld [vmem:[#allocation13 + $0x18] sm:$0xff]  ;;  %v5745_v31 = vld [vmem:[%s8635_s12 + $0x1] ss:$2 sm:$0x3]  ;;  %v3994_v51 = vpop.permute.xlu0 %3993 }
 0xa22   : > { %v4132_v44 = vpack.c.bf16 %v4129_v52, %v4126_v62  ;;  %v4180_v0 = vpack.c.bf16 %v4177_v39, %v4174_v58  ;;  %v4175_v53 = vmul.f32 0.0, %v8285_v13  ;;  %v8348_v30 = vld [vmem:[#allocation13 + $0x38] sm:$0xff]  ;;  %v4247_v40 = vmul.f32 0.0, %v8290_v10  ;;  %v5734_v10 = vld [vmem:[%s8632_s9 + $0x68] sm:$0xff] }
 0xa23   : > { %v4083_v5 = vpack.c.bf16 %v4077_v57, %v4077_v57  ;;  %v4133_v42 = vpack.c.bf16 %v4127_v28, %v4127_v28  ;;  %v5742_v13 = vcombine.high %v8346_v56, %v8348_v30  ;;  %v5741_v7 = vcombine.low %v8346_v56, %v8348_v30 }
 0xa24   : > { %4091 = vrot.lane.b32.xlu0 %v4084_v8, %s6313_s20  ;;  %v4181_v23 = vpack.c.bf16 %v4175_v53, %v4175_v53  ;;  %v4253_v60 = vpack.c.bf16 %v4247_v40, %v4247_v40  ;;  %v4654_v36 = vrot.slane %v4649_v47, %v6592_v2  ;;  %v4658_v4 = vrot.slane %v4649_v47, %v6594_v3 }
 0xa25   : > { %4043 = vrot.lane.b32.xlu1 %v4036_v50, %s6314_s17  ;;  %5743 = vmatprep.mubr.msk.bf16.mxu0 %vm838_vm7, %v5742_v13  ;;  %v4726_v6 = vrot.slane %v5744_v38, %v6592_v2  ;;  %v4730_v12 = vrot.slane %v5744_v38, %v6594_v3  ;;  %v4774_v21 = vrot.slane %v4769_v17, %v6592_v2 }
 0xa26   : > { %v4822_v8 = vrot.slane %v5745_v31, %v6592_v2  ;;  %v4826_v25 = vrot.slane %v5745_v31, %v6594_v3  ;;  %v4942_v50 = vrot.slane %v5746_v24, %v6592_v2  ;;  %v4946_v15 = vrot.slane %v5746_v24, %v6594_v3 }
 0xa28   : > { %4045 = vrot.lane.b32.xlu0 %v4037_v54, %s6314_s17  ;;  %v4042_v54 = vpop.permute.xlu1 %4041 }
 0xa29   : > { %4137 = vrot.lane.b32.xlu1 %v4131_v19, %s6312_s13 }
 0xa2c   : > { %4089 = vrot.lane.b32.xlu0 %v4083_v5, %s6313_s20 }
 0xa2d   : > { %4093 = vrot.lane.b32.xlu1 %v4085_v55, %s6313_s20 }
 0xa30   : > { %4141 = vrot.lane.b32.xlu0 %v4133_v42, %s6312_s13 }
 0xa31   : > { %4189 = vrot.lane.b32.xlu1 %v4181_v23, %s6310_s24 }
 0xa34   : > { %4185 = vrot.lane.b32.xlu0 %v4179_v20, %s6310_s24 }
 0xa35   : > { %4139 = vrot.lane.b32.xlu1 %v4132_v44, %s6312_s13 }
 0xa38   : > { %4187 = vrot.lane.b32.xlu0 %v4180_v0, %s6310_s24 }
 0xa39   : > { %4211 = vrot.lane.b32.xlu1 %v8317_v14, %s6318_s30 }
 0xa3c   : > { %4213 = vrot.lane.b32.xlu0 %v8833_v41, %s6318_s30 }
 0xa3d   : > { %4209 = vrot.lane.b32.xlu1 %v8315_v1, %s6318_s30 }
 0xa40   : > { %4259 = vrot.lane.b32.xlu0 %v4252_v22, %s6311_s15  ;;  %v4865_v22 = vld [vmem:[%s8635_s12] ss:$2 sm:$0x3] }
 0xa41   : > { %4261 = vrot.lane.b32.xlu1 %v4253_v60, %s6311_s15  ;;  %v4870_v18 = vrot.slane %v4865_v22, %v6592_v2  ;;  %v4874_v46 = vrot.slane %v4865_v22, %v6594_v3 }
 0xa44   : > { %4257 = vrot.lane.b32.xlu0 %v4251_v29, %s6311_s15  ;;  %v4778_v29 = vrot.slane %v4769_v17, %v6594_v3 }
 0xa45   : > { %4408 = vperm.xlu1 %5984, %v5733_v32  }
 0xa48   : > { %4413 = vperm.xlu0 %5983, %v5734_v10  }
 0xa49   : > { %4659 = vrot.lane.b32.xlu1 %v4654_v36, %s6311_s15 }
 0xa4c   : > { %4661 = vrot.lane.b32.xlu0 %v4658_v4, %s6311_s15 }
 0xa4d   : > { %4731 = vrot.lane.b32.xlu1 %v4726_v6, %s6310_s24 }
 0xa50   : > { %4733 = vrot.lane.b32.xlu0 %v4730_v12, %s6310_s24 }
 0xa51   : > { %4779 = vrot.lane.b32.xlu1 %v4774_v21, %s6312_s13 }
 0xa54   : > { %4781 = vrot.lane.b32.xlu0 %v4778_v29, %s6312_s13 }
 0xa55   : > { %4827 = vrot.lane.b32.xlu1 %v4822_v8, %s6313_s20 }
 0xa58   : > { %4829 = vrot.lane.b32.xlu0 %v4826_v25, %s6313_s20 }
 0xa59   : > { %4875 = vrot.lane.b32.xlu1 %v4870_v18, %s6314_s17 }
 0xa5c   : > { %4877 = vrot.lane.b32.xlu0 %v4874_v46, %s6314_s17 }
 0xa5d   : > { %4947 = vrot.lane.b32.xlu1 %v4942_v50, %s6315_s16 }
 0xa60   : > { %4949 = vrot.lane.b32.xlu0 %v4946_v15, %s6315_s16 }
 0xa64   : > { %4703 = vrot.lane.b32.xlu0 %v8833_v41, %s6316_s22 }
 0xa8e   : > { %v3996_v48 = vpop.permute.xlu0 %3995 }
 0xa8f   : > { %v3998_v63 = vpop.permute.xlu1 %3997  ;;  %v3999_v55 = vsel %vm612_vm6, %v3994_v51, %v3996_v48 }
 0xa90   : > { %v4000_v58 = vsel %vm612_vm6, %v3996_v48, %v3998_v63 }
 0xa92   : > { %v3974_v62 = vpop.permute.xlu0 %3973 }
 0xa93   : > { %v3972_v19 = vpop.permute.xlu1 %3971 }
 0xa94   : > { %v3975_v52 = vsel %vm587_vm5, %v3970_v61, %v3972_v19  ;;  %v3976_v2 = vsel %vm587_vm5, %v3972_v19, %v3974_v62 }
 0xa95   : > { %4600 = vmatprep.subr.bf16.mxu0 %v3976_v2  ;;  %5333 = vmatprep.subr.bf16.mxu1 %v3976_v2 }
 0xa96   : > { %v4092_v3 = vpop.permute.xlu0 %4091  ;;  %4601 = vmatpush1.bf16.msra.mxu0 %v3975_v52  ;;  %5334 = vmatpush1.bf16.msra.mxu1 %v3975_v52 }
 0xa97   : > { %4602 = vmatprep.subr.bf16.mxu0 %v4000_v58  ;;  %5335 = vmatprep.subr.bf16.mxu1 %v4000_v58  ;;  %v4044_v39 = vpop.permute.xlu1 %4043 }
 0xa98   : > { %v4047_v57 = vsel %vm663_vm4, %v4042_v54, %v4044_v39 }
 0xa9a   : > { %v4046_v20 = vpop.permute.xlu0 %4045  ;;  %4603 = vmatpush1.bf16.msra.mxu0 %v3999_v55  ;;  %5336 = vmatpush1.bf16.msra.mxu1 %v3999_v55 }
 0xa9b   : > { %v4138_v44 = vpop.permute.xlu1 %4137  ;;  %v4048_v0 = vsel %vm663_vm4, %v4044_v39, %v4046_v20 }
 0xa9c   : > { %4604 = vmatprep.subr.bf16.mxu0 %v4048_v0  ;;  %5337 = vmatprep.subr.bf16.mxu1 %v4048_v0  ;;  %v6035_v0 = vld [vmem:[%s8631_s8 + $0x1c] ss:$36 sps:$4 sm:$0xff]  }
 0xa9d   : > { %5353 = vmatprep.mubr.bf16.mxu1 %v6035_v0 }
 0xa9e   : > { %v4090_v28 = vpop.permute.xlu0 %4089  ;;  %4605 = vmatpush1.bf16.msra.mxu0 %v4047_v57  ;;  %5338 = vmatpush1.bf16.msra.mxu1 %v4047_v57 }
 0xa9f   : > { %v4094_v53 = vpop.permute.xlu1 %4093  ;;  %v4095_v42 = vsel %vm713_vm3, %v4090_v28, %v4092_v3 }
 0xaa0   : > { %v4096_v5 = vsel %vm713_vm3, %v4092_v3, %v4094_v53 }
 0xaa1   : > { %4606 = vmatprep.subr.bf16.mxu0 %v4096_v5  ;;  %5339 = vmatprep.subr.bf16.mxu1 %v4096_v5 }
 0xaa2   : > { %v4142_v23 = vpop.permute.xlu0 %4141  ;;  %4607 = vmatpush1.bf16.msra.mxu0 %v4095_v42  ;;  %5340 = vmatpush1.bf16.msra.mxu1 %v4095_v42 }
 0xaa3   : > { %4608 = vmatprep.subr.bf16.mxu0 %v8317_v14  ;;  %5341 = vmatprep.subr.bf16.mxu1 %v8317_v14  ;;  %v4190_v13 = vpop.permute.xlu1 %4189 }
 0xaa6   : > { %v4186_v40 = vpop.permute.xlu0 %4185  ;;  %4609 = vmatpush1.bf16.msra.mxu0 %v8315_v1  ;;  %5342 = vmatpush1.bf16.msra.mxu1 %v8315_v1 }
 0xaa7   : > { %v4140_v60 = vpop.permute.xlu1 %4139 }
 0xaa8   : > { %v4143_v32 = vsel %vm690_vm2, %v4138_v44, %v4140_v60  ;;  %v4144_v10 = vsel %vm690_vm2, %v4140_v60, %v4142_v23 }
 0xaa9   : > { %4610 = vmatprep.subr.bf16.mxu0 %v4144_v10  ;;  %5343 = vmatprep.subr.bf16.mxu1 %v4144_v10 }
 0xaaa   : > { %v4188_v47 = vpop.permute.xlu0 %4187  ;;  %4611 = vmatpush1.bf16.msra.mxu0 %v4143_v32  ;;  %5344 = vmatpush1.bf16.msra.mxu1 %v4143_v32 }
 0xaab   : > { %v4212_v38 = vpop.permute.xlu1 %4211  ;;  %v4192_v36 = vsel %vm640_vm1, %v4188_v47, %v4190_v13  ;;  %v4191_v4 = vsel %vm640_vm1, %v4186_v40, %v4188_v47 }
 0xaac   : > { %4612 = vmatprep.subr.bf16.mxu0 %v4192_v36  ;;  %5345 = vmatprep.subr.bf16.mxu1 %v4192_v36 }
 0xaae   : > { %v4214_v6 = vpop.permute.xlu0 %4213  ;;  %4613 = vmatpush1.bf16.msra.mxu0 %v4191_v4  ;;  %5346 = vmatpush1.bf16.msra.mxu1 %v4191_v4 }
 0xaaf   : > { %v4210_v12 = vpop.permute.xlu1 %4209  ;;  %v4216_v17 = vsel %vm838_vm7, %v4212_v38, %v4214_v6 }
 0xab0   : > { %v4215_v21 = vsel %vm838_vm7, %v4210_v12, %v4212_v38  ;;  %4614 = vmatprep.subr.bf16.mxu0 %v4216_v17  ;;  %5347 = vmatprep.subr.bf16.mxu1 %v4216_v17 }
 0xab2   : > { %v4260_v29 = vpop.permute.xlu0 %4259  ;;  %4615 = vmatpush1.bf16.msra.mxu0 %v4215_v21  ;;  %5348 = vmatpush1.bf16.msra.mxu1 %v4215_v21 }
 0xab3   : > { %v4262_v31 = vpop.permute.xlu1 %4261 }
 0xab4   : > { %v4264_v8 = vsel %vm564_vm0, %v4260_v29, %v4262_v31 }
 0xab5   : > { %4616 = vmatprep.subr.bf16.mxu0 %v4264_v8  ;;  %5349 = vmatprep.subr.bf16.mxu1 %v4264_v8 }
 0xab6   : > { %v4258_v25 = vpop.permute.xlu0 %4257 }
 0xab7   : > { %v4263_v22 = vsel %vm564_vm0, %v4258_v25, %v4260_v29 }
 0xab8   : > { %4617 = vmatpush1.bf16.msra.mxu0 %v4263_v22  ;;  %5350 = vmatpush1.bf16.msra.mxu1 %v4263_v22 }
 0xab9   : > { %5459 = vmatprep.subr.bf16.mxu0 %v6663_v27 }
 0xabb   : > { %4621 = vmatmul.mubr.bf16.vlgmr.msra.gmra.mrb[16].mxu0 %v5741_v7 }
 0xabc   : > { %5460 = vmatpush1.bf16.msra.mxu0 %v6659_v26 }
 0xabd   : > { %5461 = vmatprep.subr.bf16.mxu0 %v9012_v34 }
 0xac0   : > { %5462 = vmatpush1.bf16.msra.mxu0 %v9013_v35 }
 0xac1   : > { %5463 = vmatprep.subr.bf16.mxu0 %v9030_v49 }
 0xac4   : > { %5464 = vmatpush1.bf16.msra.mxu0 %v9031_v33  ;;  %v4409_v18 = vpop.permute.xlu1 %4408 }
 0xac5   : > { %5465 = vmatprep.subr.bf16.mxu0 %v9048_v16 }
 0xac7   : > { %v4414_v33 = vpop.permute.xlu0 %4413 }
 0xac8   : > { %5466 = vmatpush1.bf16.msra.mxu0 %v9049_v37  ;;  %v4660_v27 = vpop.permute.xlu1 %4659 }
 0xac9   : > { %5467 = vmatprep.subr.bf16.mxu0 %v9066_v9  ;;  %v4667_v56 = vmul.f32 0.0, %v4660_v27 }
 0xacb   : > { %v4673_v26 = vpack.c.bf16 %v4667_v56, %v4667_v56  ;;  %v4662_v16 = vpop.permute.xlu0 %4661 }
 0xacc   : > { %5468 = vmatpush1.bf16.msra.mxu0 %v9067_v11  ;;  %v4732_v34 = vpop.permute.xlu1 %4731 }
 0xacd   : > { %5469 = vmatprep.subr.bf16.mxu0 %v7963_v43  ;;  %v4739_v35 = vmul.f32 0.0, %v4732_v34  ;;  %4679 = vrot.lane.b32.xlu1 %v4673_v26, %s6315_s16 }
 0xacf   : > { %v4745_v49 = vpack.c.bf16 %v4739_v35, %v4739_v35  ;;  %v4734_v37 = vpop.permute.xlu0 %4733 }
 0xad0   : > { %5470 = vmatpush1.bf16.msra.mxu0 %v7961_v45  ;;  %v8454_v11 = vpop.permute.xlu1 %4779  ;;  %v4735_v52 = vsel %vm640_vm1, %v4732_v34, %v4734_v37 }
 0xad1   : > { %5471 = vmatprep.subr.bf16.mxu0 %v8317_v14  ;;  %4751 = vrot.lane.b32.xlu1 %v4745_v49, %s6314_s17 }
 0xad3   : > { %v4782_v9 = vpop.permute.xlu0 %4781 }
 0xad4   : > { %5472 = vmatpush1.bf16.msra.mxu0 %v8315_v1  ;;  %v4828_v30 = vpop.permute.xlu1 %4827  ;;  %v4663_v1 = vsel %vm564_vm0, %v4660_v27, %v4662_v16  ;;  %v4783_v54 = vsel %vm690_vm2, %v8454_v11, %v4782_v9 }
 0xad7   : > { %v8456_v43 = vpop.permute.xlu0 %4829 }
 0xad8   : > { %v4876_v46 = vpop.permute.xlu1 %4875  ;;  %v4831_v2 = vsel %vm713_vm3, %v4828_v30, %v8456_v43 }
 0xadb   : > { %v8458_v7 = vpop.permute.xlu0 %4877 }
 0xadc   : > { %v4948_v14 = vpop.permute.xlu1 %4947  ;;  %v4879_v39 = vsel %vm663_vm4, %v4876_v46, %v8458_v7 }
 0xadf   : > { %v8460_v45 = vpop.permute.xlu0 %4949 }
 0xae0   : > { %v4951_v19 = vsel %vm587_vm5, %v4948_v14, %v8460_v45 }
 0xb8e   : > { %v4622_v24 = vpop.f32.mrb[16].mxu0 }
 0xb8f   : > { %v5792_v50 = vadd.f32 %v4622_v24, %v4409_v18  ;;  %v4624_v15 = vpop.f32.mrb[17].mxu0 }
 0xb90   : > { %v5793_v61 = vadd.f32 %v4624_v15, %v4409_v18  ;;  %v4626_v51 = vpop.f32.mrb[18].mxu0 }
 0xb91   : > { %v4631_v48 = vmax.f32 %v5792_v50, 0.0  ;;  %v5794_v63 = vadd.f32 %v4626_v51, %v4414_v33  ;;  %v4628_v62 = vpop.f32.mrb[19].mxu0  ;;  %v5436_v51 = vld [vmem:[%s8634_s11 + $0x8] sm:$0xff] }
 0xb92   : > { %v4632_v3 = vmax.f32 %v5793_v61, 0.0  ;;  %v5795_v58 = vadd.f32 %v4628_v62, %v4414_v33 }
 0xb93   : > { %v4633_v55 = vmax.f32 %v5794_v63, 0.0  ;;  %v8472_v20 = vmul.f32 %v4948_v14, %v4631_v48  ;;  %v4668_v44 = vmul.f32 %v4663_v1, %v4631_v48  ;;  %v4788_v5 = vmul.f32 %v4783_v54, %v4631_v48 }
 0xb94   : > { %v4634_v57 = vmax.f32 %v5795_v58, 0.0  ;;  %v8477_v28 = vmul.f32 %v4951_v19, %v4632_v3  ;;  %v4669_v53 = vmul.f32 %v4662_v16, %v4632_v3  ;;  %v4740_v47 = vmul.f32 %v4735_v52, %v4631_v48 }
 0xb95   : > { %v8479_v42 = vmul.f32 %v4948_v14, %v4633_v55  ;;  %v8481_v23 = vpack.c.bf16 %v4633_v55, %v4631_v48  ;;  %v4671_v13 = vmul.f32 %v4663_v1, %v4633_v55  ;;  %v4791_v40 = vmul.f32 %v4783_v54, %v4633_v55  ;;  %v4680_v54 = vpop.permute.xlu1 %4679 }
 0xb96   : > { %v4959_v60 = vmul.f32 %v4951_v19, %v4634_v57  ;;  %v8483_v32 = vpack.c.bf16 %v4634_v57, %v4632_v3  ;;  %v4672_v10 = vmul.f32 %v4662_v16, %v4634_v57  ;;  %v4743_v6 = vmul.f32 %v4735_v52, %v4633_v55 }
 0xb97   : > { %v4961_v38 = vpack.c.bf16 %v8479_v42, %v8472_v20  ;;  %4705 = vrot.lane.b32.xlu0 %v8481_v23, %s6316_s22  ;;  %v4674_v36 = vpack.c.bf16 %v4671_v13, %v4668_v44  ;;  %v4794_v4 = vpack.c.bf16 %v4791_v40, %v4788_v5  ;;  %v4741_v21 = vmul.f32 %v4734_v37, %v4632_v3 }
 0xb98   : > { %v4962_v12 = vpack.c.bf16 %v4959_v60, %v8477_v28  ;;  %5473 = vmatprep.subr.bf16.mxu0 %v8483_v32  ;;  %4707 = vrot.lane.b32.xlu1 %v8483_v32, %s6316_s22  ;;  %v4675_v17 = vpack.c.bf16 %v4672_v10, %v4669_v53  ;;  %v4746_v29 = vpack.c.bf16 %v4743_v6, %v4740_v47 }
 0xb99   : > { %5474 = vmatpush1.bf16.msra.mxu0 %v8481_v23  ;;  %v4744_v31 = vmul.f32 %v4734_v37, %v4634_v57  ;;  %v4835_v8 = vmul.f32 %v4828_v30, %v4631_v48  ;;  %v4838_v25 = vmul.f32 %v4828_v30, %v4633_v55  ;;  %v4883_v22 = vmul.f32 %v4876_v46, %v4631_v48  ;;  %v4704_v48 = vpop.permute.xlu0 %4703  ;;  %v4752_v63 = vpop.permute.xlu1 %4751 }
 0xb9a   : > { %v4789_v18 = vmul.f32 %v4782_v9, %v4632_v3  ;;  %v4792_v27 = vmul.f32 %v4782_v9, %v4634_v57  ;;  %v4886_v56 = vmul.f32 %v4876_v46, %v4633_v55  ;;  %v4836_v35 = vmul.f32 %v4831_v2, %v4632_v3 }
 0xb9b   : > { %4683 = vrot.lane.b32.xlu0 %v4675_v17, %s6315_s16  ;;  %v4747_v26 = vpack.c.bf16 %v4744_v31, %v4741_v21  ;;  %v4841_v34 = vpack.c.bf16 %v4838_v25, %v4835_v8  ;;  %v4839_v49 = vmul.f32 %v4831_v2, %v4634_v57  ;;  %v4884_v24 = vmul.f32 %v4879_v39, %v4632_v3 }
 0xb9c   : > { %4681 = vrot.lane.b32.xlu1 %v4674_v36, %s6315_s16  ;;  %v4795_v33 = vpack.c.bf16 %v4792_v27, %v4789_v18  ;;  %v4889_v16 = vpack.c.bf16 %v4886_v56, %v4883_v22  ;;  %v4887_v14 = vmul.f32 %v4879_v39, %v4634_v57  ;;  %v4787_v9 = vmul.f32 0.0, %v8454_v11  ;;  %v6033_v39 = vld [vmem:[%s8631_s8 + $0x18] ss:$36 sps:$4 sm:$0xff]   ;;  %v6036_v56 = vld [vmem:[%s8631_s8 + $0x20] ss:$36 sps:$4 sm:$0xff]  }
 0xb9d   : > { %v4842_v50 = vpack.c.bf16 %v4839_v49, %v4836_v35  ;;  %v4837_v30 = vmul.f32 0.0, %v8456_v43  ;;  %v4885_v46 = vmul.f32 0.0, %v8458_v7  ;;  %v4957_v11 = vmul.f32 0.0, %v8460_v45  ;;  %v5747_v7 = vld [vmem:[%s8632_s9 + $0x70] sm:$0xff]  ;;  %v5748_v45 = vld [vmem:[%s8632_s9 + $0x78] sm:$0xff] }
 0xb9e   : > { %v4890_v37 = vpack.c.bf16 %v4887_v14, %v4884_v24  ;;  %v4793_v15 = vpack.c.bf16 %v4787_v9, %v4787_v9 }
 0xb9f   : > { %4801 = vrot.lane.b32.xlu0 %v4794_v4, %s6313_s20  ;;  %v4843_v1 = vpack.c.bf16 %v4837_v30, %v4837_v30  ;;  %v4891_v61 = vpack.c.bf16 %v4885_v46, %v4885_v46  ;;  %v4963_v43 = vpack.c.bf16 %v4957_v11, %v4957_v11 }
 0xba0   : > { %4753 = vrot.lane.b32.xlu1 %v4746_v29, %s6314_s17 }
 0xba3   : > { %4755 = vrot.lane.b32.xlu0 %v4747_v26, %s6314_s17  ;;  %v6037_v26 = vld [vmem:[%s8633_s10 + $0x4] ss:$8 sps:$4 sm:$0xff]  }
 0xba4   : > { %4847 = vrot.lane.b32.xlu1 %v4841_v34, %s6312_s13  ;;  %5760 = vmatprep.mubr.msk.bf16.mxu0 %vm612_vm6, %v6037_v26 }
 0xba7   : > { %4799 = vrot.lane.b32.xlu0 %v4793_v15, %s6313_s20 }
 0xba8   : > { %4803 = vrot.lane.b32.xlu1 %v4795_v33, %s6313_s20 }
 0xbab   : > { %4851 = vrot.lane.b32.xlu0 %v4843_v1, %s6312_s13 }
 0xbac   : > { %4899 = vrot.lane.b32.xlu1 %v4891_v61, %s6310_s24 }
 0xbaf   : > { %4895 = vrot.lane.b32.xlu0 %v4889_v16, %s6310_s24 }
 0xbb0   : > { %4849 = vrot.lane.b32.xlu1 %v4842_v50, %s6312_s13  ;;  %s519_s13 = sand.u32 1, %s6282_s26  }
 0xbb1   : > { %s8581_s29 = scalar_lea.sflag [#allocation6], %s519_s13 }
 0xbb3   : > { %4897 = vrot.lane.b32.xlu0 %v4890_v37, %s6310_s24  ;;  %s5666_s24 = sshll.u32 %s519_s13, 5 }
 0xbb4   : > { %4921 = vrot.lane.b32.xlu1 %v8483_v32, %s6318_s30  ;;  %s521_s17 = scalar_lea.vmem [#allocation15], %s5666_s24 }
 0xbb5   : > { %s5528_s16 = sshll.u32 %s521_s17, 4  ;;  %s8570_s16 = int_to_ptr.vmem [resolvable:$true] %s5528_s16 }
 0xbb6   : > { %s6212_s14 = scalar_lea.vmem %s8570_s16, 512  ;;  %p6219_p13 = scmp.lt.s32.totalorder %s8570_s16, %s6217_s19 }
 0xbb7   : > { %4923 = vrot.lane.b32.xlu0 %v8833_v41, %s6318_s30  ;;  %v5435_v41 = vld [vmem:[%s8634_s11] sm:$0xff]  ;;  %p6213_p4 = scmp.ne.s32.totalorder %s8570_s16, %s6212_s14 }
 0xbb8   : > { %4919 = vrot.lane.b32.xlu1 %v8481_v23, %s6318_s30  ;;  %s9076_s30 = sld [smem:[#allocation26_spill]] }
 0xbbb   : > { %4969 = vrot.lane.b32.xlu0 %v4962_v12, %s6311_s15 }
 0xbbc   : > { %4971 = vrot.lane.b32.xlu1 %v4963_v43, %s6311_s15  ;;  %v6039_v43 = vld [vmem:[%s8633_s10] ss:$8 sps:$4 sm:$0xff]  }
 0xbbe   : > { %p9078_p7 = scmp.ne.s32.totalorder %s9076_s30, 0 }
 0xbbf   : > { %4967 = vrot.lane.b32.xlu0 %v4961_v38, %s6311_s15 }
 0xbc0   : > { %5138 = vperm.xlu1 %5984, %v5747_v7   ;;  %p6214_p8 = pnand %p6213_p4, %p9078_p7 }
 0xbc2   : > { %p6215_p11 = pneg %p6214_p8 }
 0xbc3   : > { %5143 = vperm.xlu0 %5983, %v5748_v45  }
 0xbc4   : > { %5439 = vperm.xlu1 %5984, %v5435_v41  }
 0xbc7   : > { %5444 = vperm.xlu0 %5983, %v5436_v51  }
 0xc09   : > { %v4706_v62 = vpop.permute.xlu0 %4705 }
 0xc0a   : > { %v4708_v19 = vpop.permute.xlu1 %4707  ;;  %v4709_v0 = vsel %vm612_vm6, %v4704_v48, %v4706_v62 }
 0xc0b   : > { %v4710_v20 = vsel %vm612_vm6, %v4706_v62, %v4708_v19 }
 0xc0d   : > { %v4684_v52 = vpop.permute.xlu0 %4683 }
 0xc0e   : > { %v4682_v2 = vpop.permute.xlu1 %4681 }
 0xc0f   : > { %v4685_v3 = vsel %vm587_vm5, %v4680_v54, %v4682_v2  ;;  %v4686_v58 = vsel %vm587_vm5, %v4682_v2, %v4684_v52 }
 0xc10   : > { %5351 = vmatprep.subr.bf16.mxu1 %v4686_v58  ;;  %v6040_v58 = vld [vmem:[%s6637_s18] sm:$0xff] }
 0xc11   : > { %v4802_v55 = vpop.permute.xlu0 %4801  ;;  %5352 = vmatpush1.bf16.msra.mxu1 %v4685_v3 }
 0xc12   : > { %5364 = vmatprep.subr.bf16.mxu1 %v4710_v20  ;;  %v4754_v44 = vpop.permute.xlu1 %4753  ;;  %v6041_v20 = vld [vmem:[%s6637_s18 + $0x8] sm:$0xff] }
 0xc13   : > { %v4757_v5 = vsel %vm663_vm4, %v4752_v63, %v4754_v44 }
 0xc14   : > { %5354 = vmatmul.mubr.bf16.vlgmr.msra.gmra.mrb[12].mxu1 %v6033_v39 }
 0xc15   : > { %v4756_v57 = vpop.permute.xlu0 %4755  ;;  %5365 = vmatpush1.bf16.msra.mxu1 %v4709_v0  ;;  %5396 = vmatprep.mubr.bf16.mxu1 %v9000_v59 }
 0xc16   : > { %v4848_v28 = vpop.permute.xlu1 %4847  ;;  %v4758_v53 = vsel %vm663_vm4, %v4754_v44, %v4756_v57  ;;  %v6042_v57 = vld [vmem:[%s6637_s18 + $0x10] sm:$0xff] }
 0xc17   : > { %5366 = vmatprep.subr.bf16.mxu1 %v4758_v53  ;;  %v6043_v53 = vld [vmem:[%s6637_s18 + $0x18] sm:$0xff]  ;;  %s6218_s18 = scalar_lea.vmem %s6217_s19, 1024 }
 0xc18   : > { %p6220_p5 = scmp.lt.s32.totalorder %s6218_s18, %s6212_s14 }
 0xc19   : > { %v4800_v42 = vpop.permute.xlu0 %4799  ;;  %5367 = vmatpush1.bf16.msra.mxu1 %v4757_v5 }
 0xc1a   : > { %v4804_v13 = vpop.permute.xlu1 %4803  ;;  %v4805_v60 = vsel %vm713_vm3, %v4800_v42, %v4802_v55  ;;  %p6221_p0 = por %p6220_p5, %p6219_p13 }
 0xc1b   : > { %v4806_v40 = vsel %vm713_vm3, %v4802_v55, %v4804_v13 }
 0xc1c   : > { %5368 = vmatprep.subr.bf16.mxu1 %v4806_v40  ;;  %p6222_p6 = pnand %p6221_p0, %p6215_p11 }
 0xc1d   : > { %v4852_v10 = vpop.permute.xlu0 %4851  ;;  %5369 = vmatpush1.bf16.msra.mxu1 %v4805_v60 }
 0xc1e   : > { %5370 = vmatprep.subr.bf16.mxu1 %v8483_v32  ;;  %v4900_v47 = vpop.permute.xlu1 %4899 }
 0xc21   : > { %v4896_v59 = vpop.permute.xlu0 %4895  ;;  %5371 = vmatpush1.bf16.msra.mxu1 %v8481_v23 }
 0xc22   : > { %v4850_v38 = vpop.permute.xlu1 %4849 }
 0xc23   : > { %v4853_v36 = vsel %vm690_vm2, %v4848_v28, %v4850_v38  ;;  %v4854_v4 = vsel %vm690_vm2, %v4850_v38, %v4852_v10 }
 0xc24   : > { %5372 = vmatprep.subr.bf16.mxu1 %v4854_v4 }
 0xc25   : > { %v4898_v6 = vpop.permute.xlu0 %4897  ;;  %5373 = vmatpush1.bf16.msra.mxu1 %v4853_v36 }
 0xc26   : > { %v4922_v12 = vpop.permute.xlu1 %4921  ;;  %v4902_v17 = vsel %vm640_vm1, %v4898_v6, %v4900_v47  ;;  %v4901_v21 = vsel %vm640_vm1, %v4896_v59, %v4898_v6 }
 0xc27   : > { %5374 = vmatprep.subr.bf16.mxu1 %v4902_v17 }
 0xc29   : > { %v4924_v29 = vpop.permute.xlu0 %4923  ;;  %5375 = vmatpush1.bf16.msra.mxu1 %v4901_v21 }
 0xc2a   : > { %v4920_v32 = vpop.permute.xlu1 %4919  ;;  %v4926_v31 = vsel %vm838_vm7, %v4922_v12, %v4924_v29 }
 0xc2b   : > { %v4925_v23 = vsel %vm838_vm7, %v4920_v32, %v4922_v12  ;;  %5376 = vmatprep.subr.bf16.mxu1 %v4926_v31 }
 0xc2d   : > { %v4970_v8 = vpop.permute.xlu0 %4969  ;;  %5377 = vmatpush1.bf16.msra.mxu1 %v4925_v23 }
 0xc2e   : > { %v4972_v25 = vpop.permute.xlu1 %4971 }
 0xc2f   : > { %v4974_v22 = vsel %vm564_vm0, %v4970_v8, %v4972_v25 }
 0xc30   : > { %5378 = vmatprep.subr.bf16.mxu1 %v4974_v22 }
 0xc31   : > { %v4968_v18 = vpop.permute.xlu0 %4967 }
 0xc32   : > { %v4973_v27 = vsel %vm564_vm0, %v4968_v18, %v4970_v8 }
 0xc33   : > { %5379 = vmatpush1.bf16.msra.mxu1 %v4973_v27 }
 0xc36   : > { %5397 = vmatmul.mubr.bf16.vlgmr.msra.gmra.mrb[12].mxu1 %v6036_v56 }
 0xc3f   : > { %v5139_v34 = vpop.permute.xlu1 %5138 }
 0xc42   : > { %v5144_v16 = vpop.permute.xlu0 %5143 }
 0xc43   : > { %v5440_v7 = vpop.permute.xlu1 %5439 }
 0xc46   : > { %v5445_v54 = vpop.permute.xlu0 %5444 }
 0xd09   : > { %v5398_v35 = vpop.f32.mrb[12].mxu1 }
 0xd0a   : > { %v5796_v49 = vadd.f32 %v5398_v35, %v5139_v34  ;;  %v5400_v33 = vpop.f32.mrb[13].mxu1 }
 0xd0b   : > { %v5797_v24 = vadd.f32 %v5400_v33, %v5139_v34  ;;  %v5402_v14 = vpop.f32.mrb[14].mxu1 }
 0xd0c   : > { %v5798_v50 = vadd.f32 %v5402_v14, %v5144_v16  ;;  %v5404_v37 = vpop.f32.mrb[15].mxu1  ;;  %v5407_v30 = vmax.f32 %v5796_v49, 0.0 }
 0xd0d   : > { %v5799_v9 = vadd.f32 %v5404_v37, %v5144_v16  ;;  %v5408_v15 = vmax.f32 %v5797_v24, 0.0 }
 0xd0e   : > { %v5409_v46 = vmax.f32 %v5798_v50, 0.0 }
 0xd0f   : > { %v5410_v1 = vmax.f32 %v5799_v9, 0.0 }
 0xd10   : > { %v5411_v61 = vpack.c.bf16 %v5409_v46, %v5407_v30 }
 0xd11   : > { %v5412_v11 = vpack.c.bf16 %v5410_v1, %v5408_v15 }
 0xd13   : > { %5475 = vmatprep.subr.bf16.mxu0 %v5412_v11 }
 0xd14   : > { %5476 = vmatpush1.bf16.msra.mxu0 %v5411_v61 }
 0xd17   : > { %5492 = vmatmul.mubr.bf16.vlgmr.msra.gmra.mrb[20].mxu0 %v6039_v43 }
 0xdea   : > { %v5493_v45 = vpop.f32.mrb[20].mxu0 }
 0xdeb   : > { %v5494_v41 = vadd.f32 %v5493_v45, %v5440_v7  ;;  %v5495_v51 = vpop.f32.mrb[21].mxu0 }
 0xdec   : > { %v5496_v48 = vadd.f32 %v5495_v51, %v5440_v7  ;;  %v5497_v63 = vpop.f32.mrb[22].mxu0 }
 0xded   : > { %v5502_v62 = vmul.f32 0.2, %v5494_v41  ;;  %v5498_v19 = vadd.f32 %v5497_v63, %v5445_v54  ;;  %v5499_v52 = vpop.f32.mrb[23].mxu0 }
 0xdee   : > { %v5503_v2 = vmul.f32 0.2, %v5496_v48  ;;  %v5500_v3 = vadd.f32 %v5499_v52, %v5445_v54 }
 0xdef   : > { %v5506_v39 = vadd.f32 %v6040_v58, %v5502_v62  ;;  %v5504_v55 = vmul.f32 0.2, %v5498_v19 }
 0xdf0   : > { %v5507_v44 = vadd.f32 %v6041_v20, %v5503_v2  ;;  %v5505_v0 = vmul.f32 0.2, %v5500_v3 }
 0xdf1   : > { %5510 = vst [vmem:[%s521_s17] sm:$0xff] %v5506_v39  ;;  %v5508_v28 = vadd.f32 %v6042_v57, %v5504_v55 }
 0xdf2   : > { %5511 = vst [vmem:[%s521_s17 + $0x8] sm:$0xff] %v5507_v44  ;;  %v5509_v5 = vadd.f32 %v6043_v53, %v5505_v0 }
 0xdf3   : > { %5512 = vst [vmem:[%s521_s17 + $0x10] sm:$0xff] %v5508_v28 }
 0xdf4   : > { %5513 = vst [vmem:[%s521_s17 + $0x18] sm:$0xff] %v5509_v5 }
 0xdf5   : > { %6225 = shalt.err (!%p6222_p6)
}
 0xdf6   : > { %s6226_s25 = scalar_lea.hbm %s8577_s21, 512  ;;  %s6230_s24 = scalar_lea.hbm %s9077_s23, 1024 }
 0xdf7   : > { %p6227_p9 = scmp.ne.s32.totalorder %s8577_s21, %s6226_s25  ;;  %p6231_p1 = scmp.lt.u32.totalorder %s8577_s21, %s9077_s23 }
 0xdf8   : > { %p6232_p2 = scmp.lt.u32.totalorder %s6230_s24, %s6226_s25  ;;  %p6234_p4 = scmp.lt.u32.totalorder %s6226_s25, %s8577_s21 }
 0xdf9   : > { %p6228_p10 = pnand %p6227_p9, %p9078_p7 }
 0xdfa   : > { %p6233_p3 = por %p6232_p2, %p6231_p1 }
 0xdfb   : > { %p6229_p12 = pneg %p6228_p10 }
 0xdfc   : > { %p6235_p8 = por %p6234_p4, %p6233_p3 }
 0xdfe   : > { %p6236_p11 = pnand %p6235_p8, %p6229_p12 }
 0xe00   : > { %6239 = shalt.err (!%p6236_p11)
}
 0xe01   : > { %s6321_s28 = smov 256  }
 0xe02   : > { %5884 = dma.vmem_to_hbm [thread:$0]  (%p9078_p7), %s8570_s16, 512, %s8577_s21, %s8581_s29, %s6321_s28, %s6321_s28, %s6316_s22  }
 0xe03 PF: > { %s9079_s15 = sld [smem:[#allocation23_spill]]  ;;  %s9080_s14 = sld [smem:[#allocation21_spill]] }
 0xe04   : > { %s9081_s27 = sld [smem:[#allocation27_spill]] }
 0xe09   : > { %p5921_p13 = scmp.ge.s32.totalorder %s9079_s15, 2  ;;  %s5543_s19 = sand.u32 1, %s9080_s14  }
 0xe0a   : > { %p9082_p5 = scmp.ne.s32.totalorder %s9081_s27, 0  ;;  %s5544_s18 = scalar_lea.sflag [#allocation6], %s5543_s19 }
 0xe0c   : > { %p5906_p0 = pnand %p5921_p13, %p9082_p5 }
 0xe0e   : > { %6273 = dma.done.wait (!%p5906_p0), %s5544_s18, 512  }
 0xe0f   : > { %6275 = vsyncadd (!%p5906_p0), %s5544_s18, 4294966784  ;;  %s9083_s28 = sld [smem:[#allocation24_spill]]  ;;  %s9084_s20 = sld [smem:[#allocation22_spill]] }
 0xe10   : > { %s9085_s27 = sld [smem:[#allocation25_spill]]  ;;  %s9086_s25 = smov %s6282_s26 }
 0xe15   : > { %p27_p6 = scmp.ge.s32.totalorder %s9083_s28, 4   ;;  %s9087_s26 = smov %s9084_s20 }
 0xe17   :  { %29 = sbr.rel (!%p27_p6) target bundleno = 10 (0xa), region = 140 }
 0xe1e   :  { %5549 = vsyncpa [#allocation5], 1 }
 0xe1f   :  { %5551 = vsyncpa [#allocation5 + $0x1], 1 }
 0xe20   :  { %5552 = vsyncpa [#allocation8], 1 }
 0xe21   :  { %5553 = vsyncpa [#allocation11], 1 }
 0xe22   :  { %5554 = vsyncpa [#allocation14], 1 }
 0xe23   :  { %5555 = vsyncpa [#allocation6], 1 }
 0xe24   :  { %5557 = vsyncpa [#allocation6 + $0x1], 1 }

</bundles_post_ra>
